<compile_context>
chip_gen: v5e
topology: v5e:2x2
jax: 0.10.0
libtpu: 0.0.40
codegen_flags: <defaults>
</compile_context>

<pallas_src>
import functools

import jax
import jax.numpy as jnp
from jax.experimental import pallas as pl
from jax.experimental.pallas import tpu as pltpu


# --------------------------------- Fused kernel -----------------------------------------
def cbam_kernel(x_ref, w1t_ref, b1_ref, w2_ref, b2_ref, cmask_ref, wsp_ref,
                bsp_ref, o_ref, pad_ref, *, W, K, padl):
    # x_ref block: (B_blk, C, HW), lane-dense (HW on lanes).
    B = x_ref.shape[0]
    C = x_ref.shape[1]
    HW = x_ref.shape[2]
    R = K // 2

    # Zero ONLY the pad columns; the interior [padl:padl+HW) is fully overwritten
    # per image below.  Done every step (cheap) so correctness does not depend on
    # which core executed grid step 0 under "parallel" megacore sharding.
    pad_ref[:, 0:padl] = jnp.zeros((2, padl), jnp.float32)
    pad_ref[:, padl + HW:padl + HW + padl] = jnp.zeros((2, padl), jnp.float32)

    w1t = w1t_ref[...].astype(jnp.float32)        # (C, Cr) == w1.T
    b1 = b1_ref[...].astype(jnp.float32)          # (1, Cr)
    w2 = w2_ref[...].astype(jnp.float32)          # (C, Cr)
    b2 = b2_ref[...].astype(jnp.float32)          # (C, 1)
    wsp = wsp_ref[...]                            # (2, K*K) f32: row0=avg w, row1=max w
    bsp = bsp_ref[0]                              # scalar f32 (SMEM)

    def mlp(v):                                   # v: (C, 1) f32 — tiny, pure VPU/XLU
        h = jnp.sum(w1t * v, axis=0, keepdims=True) + b1       # (1, Cr)  fc1
        h = jnp.maximum(h, 0.0)                                 # relu
        return jnp.sum(w2 * h, axis=1, keepdims=True) + b2      # (C, 1)   fc2

    for b in range(B):                            # static unroll over images in block
        x = x_ref[b].astype(jnp.float32)          # (C, HW)

        # ---------------- Channel attention (no MXU for a 2x32 matmul) ---------------
        avg_v = jnp.sum(x, axis=1, keepdims=True) * (1.0 / HW)  # (C, 1)
        max_v = jnp.max(x, axis=1, keepdims=True)               # (C, 1)
        scale = jax.nn.sigmoid(mlp(avg_v) + mlp(max_v))         # (C, 1)
        y = x * scale                                           # (C, HW), stays in vregs

        # ---------------- Spatial attention ------------------------------------------
        # Zero-padded, lane-dense flat maps: row 0 = channel-avg, row 1 = channel-max.
        pad_ref[0:1, padl:padl + HW] = jnp.sum(y, axis=0, keepdims=True) * (1.0 / C)
        pad_ref[1:2, padl:padl + HW] = jnp.max(y, axis=0, keepdims=True)

        # 7x7 cross-correlation (== torch Conv2d) on the flattened HW axis.
        # A 2-D shift (di, dj) is a lane shift of di*W + dj; out-of-range rows land
        # in the zero pad, out-of-range columns are fixed by one mask per dj.
        acc2 = jnp.zeros((2, HW), dtype=jnp.float32)
        for dj in range(-R, R + 1):
            part = jnp.zeros((2, HW), dtype=jnp.float32)
            for di in range(-R, R + 1):
                off = padl + di * W + dj                        # static
                win = pad_ref[:, off:off + HW]                  # (2, HW): one fused read
                idx = (di + R) * K + (dj + R)
                wcol = wsp[:, idx:idx + 1]                      # (2, 1) tap weights
                part = part + win * wcol
            if dj != 0:
                part = part * cmask_ref[dj + R:dj + R + 1, :]   # column-wrap mask
            acc2 = acc2 + part

        attn = jax.nn.sigmoid(acc2[0:1, :] + acc2[1:2, :] + bsp)  # (1, HW)
        o_ref[b] = (y * attn).astype(o_ref.dtype)               # single output store


# ------------------------------------ Wrapper --------------------------------------------
def _pick_batch_block(N, C, HW):
    """Pick how many images to process per grid step."""
    per_img_bytes = C * HW * 4
    cap = max(1, (2 << 20) // per_img_bytes)      # keep blocks comfortably inside VMEM
    try:
        kind = jax.devices()[0].device_kind.lower()
    except Exception:
        kind = ""
    if "v7" in kind:
        # 2 TensorCores per chip: keep >= 2 grid steps (>= 2 per core when possible).
        want_steps = 4 if N >= 4 else 2
        blk = max(1, min(cap, N // want_steps))
    else:
        # Single TensorCore: fewest, fattest steps to amortize per-step overhead.
        blk = min(cap, N)
    blk = max(1, min(blk, N))
    while N % blk:                                # must divide N exactly
        blk -= 1
    return max(blk, 1)


def cbam_forward(x, params, batch_block=None):
    N, C, H, W = x.shape
    HW = H * W
    Cr = params["w1"].shape[0]
    K = params["wsp"].shape[-1]
    R = K // 2
    # lane-aligned zero pad on each side of the flattened map (>= R*W + R)
    padl = max(128, ((R * W + R + 127) // 128) * 128)

    if batch_block is None:
        batch_block = _pick_batch_block(N, C, HW)
    assert N % batch_block == 0
    grid_n = N // batch_block

    x_flat = x.reshape(N, C, HW)
    w1t = jnp.transpose(params["w1"]).astype(jnp.float32)        # (C, Cr)
    b1r = params["b1"].reshape(1, Cr).astype(jnp.float32)
    w2 = params["w2"].astype(jnp.float32)                        # (C, Cr)
    b2c = params["b2"].reshape(C, 1).astype(jnp.float32)
    wsp2 = params["wsp"].reshape(2, K * K).astype(jnp.float32)   # (2, 49)
    bsp = params["bsp"].reshape(1).astype(jnp.float32)

    # Precomputed column-wrap masks, one row per dj in [-R, R]:
    # valid(p, dj) = 0 <= (p % W) + dj < W  (row dj == 0 is all ones, unused).
    col = jnp.tile(jnp.arange(W, dtype=jnp.int32), H)            # (HW,)
    djs = jnp.arange(-R, R + 1, dtype=jnp.int32)[:, None]        # (K, 1)
    cmask = (((col[None, :] + djs) >= 0)
             & ((col[None, :] + djs) < W)).astype(jnp.float32)   # (K, HW)

    kernel = functools.partial(cbam_kernel, W=W, K=K, padl=padl)

    out_flat = pl.pallas_call(
        kernel,
        out_shape=jax.ShapeDtypeStruct((N, C, HW), x.dtype),
        grid=(grid_n,),
        in_specs=[
            pl.BlockSpec((batch_block, C, HW), lambda n: (n, 0, 0)),   # x
            pl.BlockSpec((C, Cr), lambda n: (0, 0)),                   # w1.T
            pl.BlockSpec((1, Cr), lambda n: (0, 0)),                   # b1
            pl.BlockSpec((C, Cr), lambda n: (0, 0)),                   # w2
            pl.BlockSpec((C, 1), lambda n: (0, 0)),                    # b2
            pl.BlockSpec((K, HW), lambda n: (0, 0)),                   # column masks
            pl.BlockSpec((2, K * K), lambda n: (0, 0)),                # conv weights
            pl.BlockSpec(memory_space=pltpu.MemorySpace.SMEM),         # conv bias (1,)
        ],
        out_specs=pl.BlockSpec((batch_block, C, HW), lambda n: (n, 0, 0)),
        scratch_shapes=[pltpu.VMEM((2, HW + 2 * padl), jnp.float32)],
        compiler_params=pltpu.CompilerParams(
            dimension_semantics=("parallel",),        # batch shards across TCs (v7x)
        ),
    )(x_flat, w1t, b1r, w2, b2c, cmask, wsp2, bsp)

    return out_flat.reshape(N, C, H, W)


# ------------------------------- Pure-JAX reference --------------------------------------
def cbam_ref(x, params):
    w1, b1, w2, b2 = params["w1"], params["b1"], params["w2"], params["b2"]
    wsp, bsp = params["wsp"], params["bsp"]
    hp = jax.lax.Precision.HIGHEST

    avg = jnp.mean(x, axis=(2, 3), keepdims=True)             # (N,C,1,1)
    mx = jnp.max(x, axis=(2, 3), keepdims=True)

    def mlp(v):
        h = jnp.einsum("rc,ncij->nrij", w1, v, precision=hp) + b1[None, :, None, None]
        h = jnp.maximum(h, 0.0)
        return jnp.einsum("cr,nrij->ncij", w2, h, precision=hp) + b2[None, :, None, None]

    scale = jax.nn.sigmoid(mlp(avg) + mlp(mx))
    y = x * scale

    avg_c = jnp.mean(y, axis=1, keepdims=True)
    max_c = jnp.max(y, axis=1, keepdims=True)
    pooled = jnp.concatenate([avg_c, max_c], axis=1)           # (N,2,H,W)
    attn = jax.lax.conv_general_dilated(
        pooled, wsp[None],                                     # (1,2,7,7) OIHW
        window_strides=(1, 1), padding=((3, 3), (3, 3)),
        dimension_numbers=("NCHW", "OIHW", "NCHW"), precision=hp,
    ) + bsp.reshape(1, 1, 1, 1)
    attn = jax.nn.sigmoid(attn)
    return y * attn


# --------------------------------------- Main --------------------------------------------
if __name__ == "__main__":
    N, C, H, W = 2, 32, 16, 16
    reduction = 16
    Cr = C // reduction  # 2

    key = jax.random.PRNGKey(0)
    k = jax.random.split(key, 7)
    x = jax.random.normal(k[0], (N, C, H, W), dtype=jnp.float32)

    params = {
        "w1": (jax.random.normal(k[1], (Cr, C), dtype=jnp.float32) * 0.2),
        "b1": (jax.random.normal(k[2], (Cr,), dtype=jnp.float32) * 0.1),
        "w2": (jax.random.normal(k[3], (C, Cr), dtype=jnp.float32) * 0.2),
        "b2": (jax.random.normal(k[4], (C,), dtype=jnp.float32) * 0.1),
        "wsp": (jax.random.normal(k[5], (2, 7, 7), dtype=jnp.float32) * 0.1),
        "bsp": (jax.random.normal(k[6], (1,), dtype=jnp.float32) * 0.1),
    }

    out = jax.block_until_ready(cbam_forward(x, params))

    ref = cbam_ref(x, params)
    assert out.shape == ref.shape and out.dtype == ref.dtype
    if not bool(jnp.allclose(out, ref, atol=1e-3, rtol=1e-3)):
        raise AssertionError("Pallas CBAM output mismatch vs JAX reference")

    print("KERNEL_OK")
</pallas_src>

<mosaic_0001>
module attributes {stable_mosaic.version = 11 : i64} {
  func.func @cbam_kernel(%arg0: i32, %arg1: memref<2x32x256xf32, #tpu.memory_space<vmem>>, %arg2: memref<32x2xf32, #tpu.memory_space<vmem>>, %arg3: memref<1x2xf32, #tpu.memory_space<vmem>>, %arg4: memref<32x2xf32, #tpu.memory_space<vmem>>, %arg5: memref<32x1xf32, #tpu.memory_space<vmem>>, %arg6: memref<7x256xf32, #tpu.memory_space<vmem>>, %arg7: memref<2x49xf32, #tpu.memory_space<vmem>>, %arg8: memref<1xf32, #tpu.memory_space<smem>>, %arg9: memref<2x32x256xf32, #tpu.memory_space<vmem>>, %arg10: memref<2x512xf32, #tpu.memory_space<vmem>>) attributes {dimension_semantics = [#tpu.dimension_semantics<parallel>], iteration_bounds = array<i64: 1>, scalar_prefetch = 0 : i64, scratch_operands = 1 : i64, tpu.core_type = #tpu.core_type<tc>, window_params = [{transform_indices = @transform_0, window_bounds = array<i64: 2, 32, 256>}, {pipeline_mode = #tpu.pipeline_mode<synchronous>, transform_indices = @transform_1, window_bounds = array<i64: 32, 2>}, {pipeline_mode = #tpu.pipeline_mode<synchronous>, transform_indices = @transform_2, window_bounds = array<i64: 1, 2>}, {pipeline_mode = #tpu.pipeline_mode<synchronous>, transform_indices = @transform_3, window_bounds = array<i64: 32, 2>}, {pipeline_mode = #tpu.pipeline_mode<synchronous>, transform_indices = @transform_4, window_bounds = array<i64: 32, 1>}, {pipeline_mode = #tpu.pipeline_mode<synchronous>, transform_indices = @transform_5, window_bounds = array<i64: 7, 256>}, {pipeline_mode = #tpu.pipeline_mode<synchronous>, transform_indices = @transform_6, window_bounds = array<i64: 2, 49>}, {transform_indices = @transform_7, window_bounds = array<i64: 1>}, {transform_indices = @transform_8, window_bounds = array<i64: 2, 32, 256>}]} {
    %cst = arith.constant 0.000000e+00 : f32
    %0 = vector.broadcast %cst : f32 to vector<2x128xf32>
    %c0 = arith.constant 0 : index
    %c0_0 = arith.constant 0 : index
    %1 = vector.load %arg10[%c0, %c0_0] : memref<2x512xf32, #tpu.memory_space<vmem>>, vector<2x128xf32>
    tpu.vector_store %arg10[%c0, %c0_0], %0 {strides = array<i32>} : memref<2x512xf32, #tpu.memory_space<vmem>>, vector<2x128xf32>,
    %cst_1 = arith.constant 0.000000e+00 : f32
    %2 = vector.broadcast %cst_1 : f32 to vector<2x128xf32>
    %c0_2 = arith.constant 0 : index
    %c384 = arith.constant 384 : index
    %3 = vector.load %arg10[%c0_2, %c384] : memref<2x512xf32, #tpu.memory_space<vmem>>, vector<2x128xf32>
    tpu.vector_store %arg10[%c0_2, %c384], %2 {strides = array<i32>} : memref<2x512xf32, #tpu.memory_space<vmem>>, vector<2x128xf32>,
    %c0_3 = arith.constant 0 : index
    %c0_4 = arith.constant 0 : index
    %4 = vector.load %arg2[%c0_3, %c0_4] : memref<32x2xf32, #tpu.memory_space<vmem>>, vector<32x2xf32>
    %c0_5 = arith.constant 0 : index
    %c0_6 = arith.constant 0 : index
    %5 = vector.load %arg3[%c0_5, %c0_6] : memref<1x2xf32, #tpu.memory_space<vmem>>, vector<1x2xf32>
    %c0_7 = arith.constant 0 : index
    %c0_8 = arith.constant 0 : index
    %6 = vector.load %arg4[%c0_7, %c0_8] : memref<32x2xf32, #tpu.memory_space<vmem>>, vector<32x2xf32>
    %c0_9 = arith.constant 0 : index
    %c0_10 = arith.constant 0 : index
    %7 = vector.load %arg5[%c0_9, %c0_10] : memref<32x1xf32, #tpu.memory_space<vmem>>, vector<32x1xf32>
    %c0_11 = arith.constant 0 : index
    %c0_12 = arith.constant 0 : index
    %8 = vector.load %arg7[%c0_11, %c0_12] : memref<2x49xf32, #tpu.memory_space<vmem>>, vector<2x49xf32>
    %c0_13 = arith.constant 0 : index
    %9 = memref.load %arg8[%c0_13] : memref<1xf32, #tpu.memory_space<smem>>
    %c0_14 = arith.constant 0 : index
    %c0_15 = arith.constant 0 : index
    %c0_16 = arith.constant 0 : index
    %10 = vector.load %arg1[%c0_14, %c0_15, %c0_16] : memref<2x32x256xf32, #tpu.memory_space<vmem>>, vector<1x32x256xf32>
    %11 = vector.shape_cast %10 : vector<1x32x256xf32> to vector<32x256xf32>
    %cst_17 = arith.constant dense<0.000000e+00> : vector<32xf32>
    %12 = vector.multi_reduction <add>, %11, %cst_17 [1] : vector<32x256xf32> to vector<32xf32>
    %13 = vector.shape_cast %12 : vector<32xf32> to vector<32x1xf32>
    %cst_18 = arith.constant 3.906250e-03 : f32
    %14 = vector.broadcast %cst_18 : f32 to vector<32x1xf32>
    %15 = arith.mulf %13, %14 : vector<32x1xf32>
    %cst_19 = arith.constant dense<0xFF800000> : vector<32xf32>
    %16 = vector.multi_reduction <maximumf>, %11, %cst_19 [1] : vector<32x256xf32> to vector<32xf32>
    %17 = vector.shape_cast %16 : vector<32xf32> to vector<32x1xf32>
    %18 = vector.broadcast %15 : vector<32x1xf32> to vector<32x2xf32>
    %19 = arith.mulf %4, %18 : vector<32x2xf32>
    %cst_20 = arith.constant dense<0.000000e+00> : vector<2xf32>
    %20 = vector.multi_reduction <add>, %19, %cst_20 [0] : vector<32x2xf32> to vector<2xf32>
    %21 = vector.shape_cast %20 : vector<2xf32> to vector<1x2xf32>
    %22 = arith.addf %21, %5 : vector<1x2xf32>
    %cst_21 = arith.constant 0.000000e+00 : f32
    %23 = vector.broadcast %cst_21 : f32 to vector<1x2xf32>
    %24 = arith.maximumf %22, %23 : vector<1x2xf32>
    %25 = vector.broadcast %24 : vector<1x2xf32> to vector<32x2xf32>
    %26 = arith.mulf %6, %25 : vector<32x2xf32>
    %cst_22 = arith.constant dense<0.000000e+00> : vector<32xf32>
    %27 = vector.multi_reduction <add>, %26, %cst_22 [1] : vector<32x2xf32> to vector<32xf32>
    %28 = vector.shape_cast %27 : vector<32xf32> to vector<32x1xf32>
    %29 = arith.addf %28, %7 : vector<32x1xf32>
    %30 = vector.broadcast %17 : vector<32x1xf32> to vector<32x2xf32>
    %31 = arith.mulf %4, %30 : vector<32x2xf32>
    %cst_23 = arith.constant dense<0.000000e+00> : vector<2xf32>
    %32 = vector.multi_reduction <add>, %31, %cst_23 [0] : vector<32x2xf32> to vector<2xf32>
    %33 = vector.shape_cast %32 : vector<2xf32> to vector<1x2xf32>
    %34 = arith.addf %33, %5 : vector<1x2xf32>
    %cst_24 = arith.constant 0.000000e+00 : f32
    %35 = vector.broadcast %cst_24 : f32 to vector<1x2xf32>
    %36 = arith.maximumf %34, %35 : vector<1x2xf32>
    %37 = vector.broadcast %36 : vector<1x2xf32> to vector<32x2xf32>
    %38 = arith.mulf %6, %37 : vector<32x2xf32>
    %cst_25 = arith.constant dense<0.000000e+00> : vector<32xf32>
    %39 = vector.multi_reduction <add>, %38, %cst_25 [1] : vector<32x2xf32> to vector<32xf32>
    %40 = vector.shape_cast %39 : vector<32xf32> to vector<32x1xf32>
    %41 = arith.addf %40, %7 : vector<32x1xf32>
    %42 = arith.addf %29, %41 : vector<32x1xf32>
    %43 = arith.negf %42 : vector<32x1xf32>
    %44 = math.exp %43 : vector<32x1xf32>
    %cst_26 = arith.constant 1.000000e+00 : f32
    %45 = vector.broadcast %cst_26 : f32 to vector<32x1xf32>
    %46 = arith.addf %45, %44 : vector<32x1xf32>
    %47 = arith.divf %45, %46 : vector<32x1xf32>
    %48 = vector.broadcast %47 : vector<32x1xf32> to vector<32x256xf32>
    %49 = arith.mulf %11, %48 : vector<32x256xf32>
    %cst_27 = arith.constant dense<0.000000e+00> : vector<256xf32>
    %50 = vector.multi_reduction <add>, %49, %cst_27 [0] : vector<32x256xf32> to vector<256xf32>
    %51 = vector.shape_cast %50 : vector<256xf32> to vector<1x256xf32>
    %cst_28 = arith.constant 3.125000e-02 : f32
    %52 = vector.broadcast %cst_28 : f32 to vector<1x256xf32>
    %53 = arith.mulf %51, %52 : vector<1x256xf32>
    %c0_29 = arith.constant 0 : index
    %c128 = arith.constant 128 : index
    %54 = vector.load %arg10[%c0_29, %c128] : memref<2x512xf32, #tpu.memory_space<vmem>>, vector<1x256xf32>
    tpu.vector_store %arg10[%c0_29, %c128], %53 {strides = array<i32>} : memref<2x512xf32, #tpu.memory_space<vmem>>, vector<1x256xf32>,
    %cst_30 = arith.constant dense<0xFF800000> : vector<256xf32>
    %55 = vector.multi_reduction <maximumf>, %49, %cst_30 [0] : vector<32x256xf32> to vector<256xf32>
    %56 = vector.shape_cast %55 : vector<256xf32> to vector<1x256xf32>
    %c1 = arith.constant 1 : index
    %c128_31 = arith.constant 128 : index
    %57 = vector.load %arg10[%c1, %c128_31] : memref<2x512xf32, #tpu.memory_space<vmem>>, vector<1x256xf32>
    tpu.vector_store %arg10[%c1, %c128_31], %56 {strides = array<i32>} : memref<2x512xf32, #tpu.memory_space<vmem>>, vector<1x256xf32>,
    %cst_32 = arith.constant 0.000000e+00 : f32
    %58 = vector.broadcast %cst_32 : f32 to vector<2x256xf32>
    %cst_33 = arith.constant 0.000000e+00 : f32
    %59 = vector.broadcast %cst_33 : f32 to vector<2x256xf32>
    %c0_34 = arith.constant 0 : index
    %c77 = arith.constant 77 : index
    %60 = vector.load %arg10[%c0_34, %c77] : memref<2x512xf32, #tpu.memory_space<vmem>>, vector<2x256xf32>
    %61 = vector.extract_strided_slice %8 {offsets = [0, 0], sizes = [2, 1], strides = [1, 1]} : vector<2x49xf32> to vector<2x1xf32>
    %62 = vector.broadcast %61 : vector<2x1xf32> to vector<2x256xf32>
    %63 = arith.mulf %60, %62 : vector<2x256xf32>
    %64 = arith.addf %59, %63 : vector<2x256xf32>
    %c0_35 = arith.constant 0 : index
    %c93 = arith.constant 93 : index
    %65 = vector.load %arg10[%c0_35, %c93] : memref<2x512xf32, #tpu.memory_space<vmem>>, vector<2x256xf32>
    %66 = vector.extract_strided_slice %8 {offsets = [0, 7], sizes = [2, 1], strides = [1, 1]} : vector<2x49xf32> to vector<2x1xf32>
    %67 = vector.broadcast %66 : vector<2x1xf32> to vector<2x256xf32>
    %68 = arith.mulf %65, %67 : vector<2x256xf32>
    %69 = arith.addf %64, %68 : vector<2x256xf32>
    %c0_36 = arith.constant 0 : index
    %c109 = arith.constant 109 : index
    %70 = vector.load %arg10[%c0_36, %c109] : memref<2x512xf32, #tpu.memory_space<vmem>>, vector<2x256xf32>
    %71 = vector.extract_strided_slice %8 {offsets = [0, 14], sizes = [2, 1], strides = [1, 1]} : vector<2x49xf32> to vector<2x1xf32>
    %72 = vector.broadcast %71 : vector<2x1xf32> to vector<2x256xf32>
    %73 = arith.mulf %70, %72 : vector<2x256xf32>
    %74 = arith.addf %69, %73 : vector<2x256xf32>
    %c0_37 = arith.constant 0 : index
    %c125 = arith.constant 125 : index
    %75 = vector.load %arg10[%c0_37, %c125] : memref<2x512xf32, #tpu.memory_space<vmem>>, vector<2x256xf32>
    %76 = vector.extract_strided_slice %8 {offsets = [0, 21], sizes = [2, 1], strides = [1, 1]} : vector<2x49xf32> to vector<2x1xf32>
    %77 = vector.broadcast %76 : vector<2x1xf32> to vector<2x256xf32>
    %78 = arith.mulf %75, %77 : vector<2x256xf32>
    %79 = arith.addf %74, %78 : vector<2x256xf32>
    %c0_38 = arith.constant 0 : index
    %c141 = arith.constant 141 : index
    %80 = vector.load %arg10[%c0_38, %c141] : memref<2x512xf32, #tpu.memory_space<vmem>>, vector<2x256xf32>
    %81 = vector.extract_strided_slice %8 {offsets = [0, 28], sizes = [2, 1], strides = [1, 1]} : vector<2x49xf32> to vector<2x1xf32>
    %82 = vector.broadcast %81 : vector<2x1xf32> to vector<2x256xf32>
    %83 = arith.mulf %80, %82 : vector<2x256xf32>
    %84 = arith.addf %79, %83 : vector<2x256xf32>
    %c0_39 = arith.constant 0 : index
    %c157 = arith.constant 157 : index
    %85 = vector.load %arg10[%c0_39, %c157] : memref<2x512xf32, #tpu.memory_space<vmem>>, vector<2x256xf32>
    %86 = vector.extract_strided_slice %8 {offsets = [0, 35], sizes = [2, 1], strides = [1, 1]} : vector<2x49xf32> to vector<2x1xf32>
    %87 = vector.broadcast %86 : vector<2x1xf32> to vector<2x256xf32>
    %88 = arith.mulf %85, %87 : vector<2x256xf32>
    %89 = arith.addf %84, %88 : vector<2x256xf32>
    %c0_40 = arith.constant 0 : index
    %c173 = arith.constant 173 : index
    %90 = vector.load %arg10[%c0_40, %c173] : memref<2x512xf32, #tpu.memory_space<vmem>>, vector<2x256xf32>
    %91 = vector.extract_strided_slice %8 {offsets = [0, 42], sizes = [2, 1], strides = [1, 1]} : vector<2x49xf32> to vector<2x1xf32>
    %92 = vector.broadcast %91 : vector<2x1xf32> to vector<2x256xf32>
    %93 = arith.mulf %90, %92 : vector<2x256xf32>
    %94 = arith.addf %89, %93 : vector<2x256xf32>
    %c0_41 = arith.constant 0 : index
    %c0_42 = arith.constant 0 : index
    %95 = vector.load %arg6[%c0_41, %c0_42] : memref<7x256xf32, #tpu.memory_space<vmem>>, vector<1x256xf32>
    %96 = vector.broadcast %95 : vector<1x256xf32> to vector<2x256xf32>
    %97 = arith.mulf %94, %96 : vector<2x256xf32>
    %98 = arith.addf %58, %97 : vector<2x256xf32>
    %cst_43 = arith.constant 0.000000e+00 : f32
    %99 = vector.broadcast %cst_43 : f32 to vector<2x256xf32>
    %c0_44 = arith.constant 0 : index
    %c78 = arith.constant 78 : index
    %100 = vector.load %arg10[%c0_44, %c78] : memref<2x512xf32, #tpu.memory_space<vmem>>, vector<2x256xf32>
    %101 = vector.extract_strided_slice %8 {offsets = [0, 1], sizes = [2, 1], strides = [1, 1]} : vector<2x49xf32> to vector<2x1xf32>
    %102 = vector.broadcast %101 : vector<2x1xf32> to vector<2x256xf32>
    %103 = arith.mulf %100, %102 : vector<2x256xf32>
    %104 = arith.addf %99, %103 : vector<2x256xf32>
    %c0_45 = arith.constant 0 : index
    %c94 = arith.constant 94 : index
    %105 = vector.load %arg10[%c0_45, %c94] : memref<2x512xf32, #tpu.memory_space<vmem>>, vector<2x256xf32>
    %106 = vector.extract_strided_slice %8 {offsets = [0, 8], sizes = [2, 1], strides = [1, 1]} : vector<2x49xf32> to vector<2x1xf32>
    %107 = vector.broadcast %106 : vector<2x1xf32> to vector<2x256xf32>
    %108 = arith.mulf %105, %107 : vector<2x256xf32>
    %109 = arith.addf %104, %108 : vector<2x256xf32>
    %c0_46 = arith.constant 0 : index
    %c110 = arith.constant 110 : index
    %110 = vector.load %arg10[%c0_46, %c110] : memref<2x512xf32, #tpu.memory_space<vmem>>, vector<2x256xf32>
    %111 = vector.extract_strided_slice %8 {offsets = [0, 15], sizes = [2, 1], strides = [1, 1]} : vector<2x49xf32> to vector<2x1xf32>
    %112 = vector.broadcast %111 : vector<2x1xf32> to vector<2x256xf32>
    %113 = arith.mulf %110, %112 : vector<2x256xf32>
    %114 = arith.addf %109, %113 : vector<2x256xf32>
    %c0_47 = arith.constant 0 : index
    %c126 = arith.constant 126 : index
    %115 = vector.load %arg10[%c0_47, %c126] : memref<2x512xf32, #tpu.memory_space<vmem>>, vector<2x256xf32>
    %116 = vector.extract_strided_slice %8 {offsets = [0, 22], sizes = [2, 1], strides = [1, 1]} : vector<2x49xf32> to vector<2x1xf32>
    %117 = vector.broadcast %116 : vector<2x1xf32> to vector<2x256xf32>
    %118 = arith.mulf %115, %117 : vector<2x256xf32>
    %119 = arith.addf %114, %118 : vector<2x256xf32>
    %c0_48 = arith.constant 0 : index
    %c142 = arith.constant 142 : index
    %120 = vector.load %arg10[%c0_48, %c142] : memref<2x512xf32, #tpu.memory_space<vmem>>, vector<2x256xf32>
    %121 = vector.extract_strided_slice %8 {offsets = [0, 29], sizes = [2, 1], strides = [1, 1]} : vector<2x49xf32> to vector<2x1xf32>
    %122 = vector.broadcast %121 : vector<2x1xf32> to vector<2x256xf32>
    %123 = arith.mulf %120, %122 : vector<2x256xf32>
    %124 = arith.addf %119, %123 : vector<2x256xf32>
    %c0_49 = arith.constant 0 : index
    %c158 = arith.constant 158 : index
    %125 = vector.load %arg10[%c0_49, %c158] : memref<2x512xf32, #tpu.memory_space<vmem>>, vector<2x256xf32>
    %126 = vector.extract_strided_slice %8 {offsets = [0, 36], sizes = [2, 1], strides = [1, 1]} : vector<2x49xf32> to vector<2x1xf32>
    %127 = vector.broadcast %126 : vector<2x1xf32> to vector<2x256xf32>
    %128 = arith.mulf %125, %127 : vector<2x256xf32>
    %129 = arith.addf %124, %128 : vector<2x256xf32>
    %c0_50 = arith.constant 0 : index
    %c174 = arith.constant 174 : index
    %130 = vector.load %arg10[%c0_50, %c174] : memref<2x512xf32, #tpu.memory_space<vmem>>, vector<2x256xf32>
    %131 = vector.extract_strided_slice %8 {offsets = [0, 43], sizes = [2, 1], strides = [1, 1]} : vector<2x49xf32> to vector<2x1xf32>
    %132 = vector.broadcast %131 : vector<2x1xf32> to vector<2x256xf32>
    %133 = arith.mulf %130, %132 : vector<2x256xf32>
    %134 = arith.addf %129, %133 : vector<2x256xf32>
    %c1_51 = arith.constant 1 : index
    %c0_52 = arith.constant 0 : index
    %135 = vector.load %arg6[%c1_51, %c0_52] : memref<7x256xf32, #tpu.memory_space<vmem>>, vector<1x256xf32>
    %136 = vector.broadcast %135 : vector<1x256xf32> to vector<2x256xf32>
    %137 = arith.mulf %134, %136 : vector<2x256xf32>
    %138 = arith.addf %98, %137 : vector<2x256xf32>
    %cst_53 = arith.constant 0.000000e+00 : f32
    %139 = vector.broadcast %cst_53 : f32 to vector<2x256xf32>
    %c0_54 = arith.constant 0 : index
    %c79 = arith.constant 79 : index
    %140 = vector.load %arg10[%c0_54, %c79] : memref<2x512xf32, #tpu.memory_space<vmem>>, vector<2x256xf32>
    %141 = vector.extract_strided_slice %8 {offsets = [0, 2], sizes = [2, 1], strides = [1, 1]} : vector<2x49xf32> to vector<2x1xf32>
    %142 = vector.broadcast %141 : vector<2x1xf32> to vector<2x256xf32>
    %143 = arith.mulf %140, %142 : vector<2x256xf32>
    %144 = arith.addf %139, %143 : vector<2x256xf32>
    %c0_55 = arith.constant 0 : index
    %c95 = arith.constant 95 : index
    %145 = vector.load %arg10[%c0_55, %c95] : memref<2x512xf32, #tpu.memory_space<vmem>>, vector<2x256xf32>
    %146 = vector.extract_strided_slice %8 {offsets = [0, 9], sizes = [2, 1], strides = [1, 1]} : vector<2x49xf32> to vector<2x1xf32>
    %147 = vector.broadcast %146 : vector<2x1xf32> to vector<2x256xf32>
    %148 = arith.mulf %145, %147 : vector<2x256xf32>
    %149 = arith.addf %144, %148 : vector<2x256xf32>
    %c0_56 = arith.constant 0 : index
    %c111 = arith.constant 111 : index
    %150 = vector.load %arg10[%c0_56, %c111] : memref<2x512xf32, #tpu.memory_space<vmem>>, vector<2x256xf32>
    %151 = vector.extract_strided_slice %8 {offsets = [0, 16], sizes = [2, 1], strides = [1, 1]} : vector<2x49xf32> to vector<2x1xf32>
    %152 = vector.broadcast %151 : vector<2x1xf32> to vector<2x256xf32>
    %153 = arith.mulf %150, %152 : vector<2x256xf32>
    %154 = arith.addf %149, %153 : vector<2x256xf32>
    %c0_57 = arith.constant 0 : index
    %c127 = arith.constant 127 : index
    %155 = vector.load %arg10[%c0_57, %c127] : memref<2x512xf32, #tpu.memory_space<vmem>>, vector<2x256xf32>
    %156 = vector.extract_strided_slice %8 {offsets = [0, 23], sizes = [2, 1], strides = [1, 1]} : vector<2x49xf32> to vector<2x1xf32>
    %157 = vector.broadcast %156 : vector<2x1xf32> to vector<2x256xf32>
    %158 = arith.mulf %155, %157 : vector<2x256xf32>
    %159 = arith.addf %154, %158 : vector<2x256xf32>
    %c0_58 = arith.constant 0 : index
    %c143 = arith.constant 143 : index
    %160 = vector.load %arg10[%c0_58, %c143] : memref<2x512xf32, #tpu.memory_space<vmem>>, vector<2x256xf32>
    %161 = vector.extract_strided_slice %8 {offsets = [0, 30], sizes = [2, 1], strides = [1, 1]} : vector<2x49xf32> to vector<2x1xf32>
    %162 = vector.broadcast %161 : vector<2x1xf32> to vector<2x256xf32>
    %163 = arith.mulf %160, %162 : vector<2x256xf32>
    %164 = arith.addf %159, %163 : vector<2x256xf32>
    %c0_59 = arith.constant 0 : index
    %c159 = arith.constant 159 : index
    %165 = vector.load %arg10[%c0_59, %c159] : memref<2x512xf32, #tpu.memory_space<vmem>>, vector<2x256xf32>
    %166 = vector.extract_strided_slice %8 {offsets = [0, 37], sizes = [2, 1], strides = [1, 1]} : vector<2x49xf32> to vector<2x1xf32>
    %167 = vector.broadcast %166 : vector<2x1xf32> to vector<2x256xf32>
    %168 = arith.mulf %165, %167 : vector<2x256xf32>
    %169 = arith.addf %164, %168 : vector<2x256xf32>
    %c0_60 = arith.constant 0 : index
    %c175 = arith.constant 175 : index
    %170 = vector.load %arg10[%c0_60, %c175] : memref<2x512xf32, #tpu.memory_space<vmem>>, vector<2x256xf32>
    %171 = vector.extract_strided_slice %8 {offsets = [0, 44], sizes = [2, 1], strides = [1, 1]} : vector<2x49xf32> to vector<2x1xf32>
    %172 = vector.broadcast %171 : vector<2x1xf32> to vector<2x256xf32>
    %173 = arith.mulf %170, %172 : vector<2x256xf32>
    %174 = arith.addf %169, %173 : vector<2x256xf32>
    %c2 = arith.constant 2 : index
    %c0_61 = arith.constant 0 : index
    %175 = vector.load %arg6[%c2, %c0_61] : memref<7x256xf32, #tpu.memory_space<vmem>>, vector<1x256xf32>
    %176 = vector.broadcast %175 : vector<1x256xf32> to vector<2x256xf32>
    %177 = arith.mulf %174, %176 : vector<2x256xf32>
    %178 = arith.addf %138, %177 : vector<2x256xf32>
    %cst_62 = arith.constant 0.000000e+00 : f32
    %179 = vector.broadcast %cst_62 : f32 to vector<2x256xf32>
    %c0_63 = arith.constant 0 : index
    %c80 = arith.constant 80 : index
    %180 = vector.load %arg10[%c0_63, %c80] : memref<2x512xf32, #tpu.memory_space<vmem>>, vector<2x256xf32>
    %181 = vector.extract_strided_slice %8 {offsets = [0, 3], sizes = [2, 1], strides = [1, 1]} : vector<2x49xf32> to vector<2x1xf32>
    %182 = vector.broadcast %181 : vector<2x1xf32> to vector<2x256xf32>
    %183 = arith.mulf %180, %182 : vector<2x256xf32>
    %184 = arith.addf %179, %183 : vector<2x256xf32>
    %c0_64 = arith.constant 0 : index
    %c96 = arith.constant 96 : index
    %185 = vector.load %arg10[%c0_64, %c96] : memref<2x512xf32, #tpu.memory_space<vmem>>, vector<2x256xf32>
    %186 = vector.extract_strided_slice %8 {offsets = [0, 10], sizes = [2, 1], strides = [1, 1]} : vector<2x49xf32> to vector<2x1xf32>
    %187 = vector.broadcast %186 : vector<2x1xf32> to vector<2x256xf32>
    %188 = arith.mulf %185, %187 : vector<2x256xf32>
    %189 = arith.addf %184, %188 : vector<2x256xf32>
    %c0_65 = arith.constant 0 : index
    %c112 = arith.constant 112 : index
    %190 = vector.load %arg10[%c0_65, %c112] : memref<2x512xf32, #tpu.memory_space<vmem>>, vector<2x256xf32>
    %191 = vector.extract_strided_slice %8 {offsets = [0, 17], sizes = [2, 1], strides = [1, 1]} : vector<2x49xf32> to vector<2x1xf32>
    %192 = vector.broadcast %191 : vector<2x1xf32> to vector<2x256xf32>
    %193 = arith.mulf %190, %192 : vector<2x256xf32>
    %194 = arith.addf %189, %193 : vector<2x256xf32>
    %c0_66 = arith.constant 0 : index
    %c128_67 = arith.constant 128 : index
    %195 = vector.load %arg10[%c0_66, %c128_67] : memref<2x512xf32, #tpu.memory_space<vmem>>, vector<2x256xf32>
    %196 = vector.extract_strided_slice %8 {offsets = [0, 24], sizes = [2, 1], strides = [1, 1]} : vector<2x49xf32> to vector<2x1xf32>
    %197 = vector.broadcast %196 : vector<2x1xf32> to vector<2x256xf32>
    %198 = arith.mulf %195, %197 : vector<2x256xf32>
    %199 = arith.addf %194, %198 : vector<2x256xf32>
    %c0_68 = arith.constant 0 : index
    %c144 = arith.constant 144 : index
    %200 = vector.load %arg10[%c0_68, %c144] : memref<2x512xf32, #tpu.memory_space<vmem>>, vector<2x256xf32>
    %201 = vector.extract_strided_slice %8 {offsets = [0, 31], sizes = [2, 1], strides = [1, 1]} : vector<2x49xf32> to vector<2x1xf32>
    %202 = vector.broadcast %201 : vector<2x1xf32> to vector<2x256xf32>
    %203 = arith.mulf %200, %202 : vector<2x256xf32>
    %204 = arith.addf %199, %203 : vector<2x256xf32>
    %c0_69 = arith.constant 0 : index
    %c160 = arith.constant 160 : index
    %205 = vector.load %arg10[%c0_69, %c160] : memref<2x512xf32, #tpu.memory_space<vmem>>, vector<2x256xf32>
    %206 = vector.extract_strided_slice %8 {offsets = [0, 38], sizes = [2, 1], strides = [1, 1]} : vector<2x49xf32> to vector<2x1xf32>
    %207 = vector.broadcast %206 : vector<2x1xf32> to vector<2x256xf32>
    %208 = arith.mulf %205, %207 : vector<2x256xf32>
    %209 = arith.addf %204, %208 : vector<2x256xf32>
    %c0_70 = arith.constant 0 : index
    %c176 = arith.constant 176 : index
    %210 = vector.load %arg10[%c0_70, %c176] : memref<2x512xf32, #tpu.memory_space<vmem>>, vector<2x256xf32>
    %211 = vector.extract_strided_slice %8 {offsets = [0, 45], sizes = [2, 1], strides = [1, 1]} : vector<2x49xf32> to vector<2x1xf32>
    %212 = vector.broadcast %211 : vector<2x1xf32> to vector<2x256xf32>
    %213 = arith.mulf %210, %212 : vector<2x256xf32>
    %214 = arith.addf %209, %213 : vector<2x256xf32>
    %215 = arith.addf %178, %214 : vector<2x256xf32>
    %cst_71 = arith.constant 0.000000e+00 : f32
    %216 = vector.broadcast %cst_71 : f32 to vector<2x256xf32>
    %c0_72 = arith.constant 0 : index
    %c81 = arith.constant 81 : index
    %217 = vector.load %arg10[%c0_72, %c81] : memref<2x512xf32, #tpu.memory_space<vmem>>, vector<2x256xf32>
    %218 = vector.extract_strided_slice %8 {offsets = [0, 4], sizes = [2, 1], strides = [1, 1]} : vector<2x49xf32> to vector<2x1xf32>
    %219 = vector.broadcast %218 : vector<2x1xf32> to vector<2x256xf32>
    %220 = arith.mulf %217, %219 : vector<2x256xf32>
    %221 = arith.addf %216, %220 : vector<2x256xf32>
    %c0_73 = arith.constant 0 : index
    %c97 = arith.constant 97 : index
    %222 = vector.load %arg10[%c0_73, %c97] : memref<2x512xf32, #tpu.memory_space<vmem>>, vector<2x256xf32>
    %223 = vector.extract_strided_slice %8 {offsets = [0, 11], sizes = [2, 1], strides = [1, 1]} : vector<2x49xf32> to vector<2x1xf32>
    %224 = vector.broadcast %223 : vector<2x1xf32> to vector<2x256xf32>
    %225 = arith.mulf %222, %224 : vector<2x256xf32>
    %226 = arith.addf %221, %225 : vector<2x256xf32>
    %c0_74 = arith.constant 0 : index
    %c113 = arith.constant 113 : index
    %227 = vector.load %arg10[%c0_74, %c113] : memref<2x512xf32, #tpu.memory_space<vmem>>, vector<2x256xf32>
    %228 = vector.extract_strided_slice %8 {offsets = [0, 18], sizes = [2, 1], strides = [1, 1]} : vector<2x49xf32> to vector<2x1xf32>
    %229 = vector.broadcast %228 : vector<2x1xf32> to vector<2x256xf32>
    %230 = arith.mulf %227, %229 : vector<2x256xf32>
    %231 = arith.addf %226, %230 : vector<2x256xf32>
    %c0_75 = arith.constant 0 : index
    %c129 = arith.constant 129 : index
    %232 = vector.load %arg10[%c0_75, %c129] : memref<2x512xf32, #tpu.memory_space<vmem>>, vector<2x256xf32>
    %233 = vector.extract_strided_slice %8 {offsets = [0, 25], sizes = [2, 1], strides = [1, 1]} : vector<2x49xf32> to vector<2x1xf32>
    %234 = vector.broadcast %233 : vector<2x1xf32> to vector<2x256xf32>
    %235 = arith.mulf %232, %234 : vector<2x256xf32>
    %236 = arith.addf %231, %235 : vector<2x256xf32>
    %c0_76 = arith.constant 0 : index
    %c145 = arith.constant 145 : index
    %237 = vector.load %arg10[%c0_76, %c145] : memref<2x512xf32, #tpu.memory_space<vmem>>, vector<2x256xf32>
    %238 = vector.extract_strided_slice %8 {offsets = [0, 32], sizes = [2, 1], strides = [1, 1]} : vector<2x49xf32> to vector<2x1xf32>
    %239 = vector.broadcast %238 : vector<2x1xf32> to vector<2x256xf32>
    %240 = arith.mulf %237, %239 : vector<2x256xf32>
    %241 = arith.addf %236, %240 : vector<2x256xf32>
    %c0_77 = arith.constant 0 : index
    %c161 = arith.constant 161 : index
    %242 = vector.load %arg10[%c0_77, %c161] : memref<2x512xf32, #tpu.memory_space<vmem>>, vector<2x256xf32>
    %243 = vector.extract_strided_slice %8 {offsets = [0, 39], sizes = [2, 1], strides = [1, 1]} : vector<2x49xf32> to vector<2x1xf32>
    %244 = vector.broadcast %243 : vector<2x1xf32> to vector<2x256xf32>
    %245 = arith.mulf %242, %244 : vector<2x256xf32>
    %246 = arith.addf %241, %245 : vector<2x256xf32>
    %c0_78 = arith.constant 0 : index
    %c177 = arith.constant 177 : index
    %247 = vector.load %arg10[%c0_78, %c177] : memref<2x512xf32, #tpu.memory_space<vmem>>, vector<2x256xf32>
    %248 = vector.extract_strided_slice %8 {offsets = [0, 46], sizes = [2, 1], strides = [1, 1]} : vector<2x49xf32> to vector<2x1xf32>
    %249 = vector.broadcast %248 : vector<2x1xf32> to vector<2x256xf32>
    %250 = arith.mulf %247, %249 : vector<2x256xf32>
    %251 = arith.addf %246, %250 : vector<2x256xf32>
    %c4 = arith.constant 4 : index
    %c0_79 = arith.constant 0 : index
    %252 = vector.load %arg6[%c4, %c0_79] : memref<7x256xf32, #tpu.memory_space<vmem>>, vector<1x256xf32>
    %253 = vector.broadcast %252 : vector<1x256xf32> to vector<2x256xf32>
    %254 = arith.mulf %251, %253 : vector<2x256xf32>
    %255 = arith.addf %215, %254 : vector<2x256xf32>
    %cst_80 = arith.constant 0.000000e+00 : f32
    %256 = vector.broadcast %cst_80 : f32 to vector<2x256xf32>
    %c0_81 = arith.constant 0 : index
    %c82 = arith.constant 82 : index
    %257 = vector.load %arg10[%c0_81, %c82] : memref<2x512xf32, #tpu.memory_space<vmem>>, vector<2x256xf32>
    %258 = vector.extract_strided_slice %8 {offsets = [0, 5], sizes = [2, 1], strides = [1, 1]} : vector<2x49xf32> to vector<2x1xf32>
    %259 = vector.broadcast %258 : vector<2x1xf32> to vector<2x256xf32>
    %260 = arith.mulf %257, %259 : vector<2x256xf32>
    %261 = arith.addf %256, %260 : vector<2x256xf32>
    %c0_82 = arith.constant 0 : index
    %c98 = arith.constant 98 : index
    %262 = vector.load %arg10[%c0_82, %c98] : memref<2x512xf32, #tpu.memory_space<vmem>>, vector<2x256xf32>
    %263 = vector.extract_strided_slice %8 {offsets = [0, 12], sizes = [2, 1], strides = [1, 1]} : vector<2x49xf32> to vector<2x1xf32>
    %264 = vector.broadcast %263 : vector<2x1xf32> to vector<2x256xf32>
    %265 = arith.mulf %262, %264 : vector<2x256xf32>
    %266 = arith.addf %261, %265 : vector<2x256xf32>
    %c0_83 = arith.constant 0 : index
    %c114 = arith.constant 114 : index
    %267 = vector.load %arg10[%c0_83, %c114] : memref<2x512xf32, #tpu.memory_space<vmem>>, vector<2x256xf32>
    %268 = vector.extract_strided_slice %8 {offsets = [0, 19], sizes = [2, 1], strides = [1, 1]} : vector<2x49xf32> to vector<2x1xf32>
    %269 = vector.broadcast %268 : vector<2x1xf32> to vector<2x256xf32>
    %270 = arith.mulf %267, %269 : vector<2x256xf32>
    %271 = arith.addf %266, %270 : vector<2x256xf32>
    %c0_84 = arith.constant 0 : index
    %c130 = arith.constant 130 : index
    %272 = vector.load %arg10[%c0_84, %c130] : memref<2x512xf32, #tpu.memory_space<vmem>>, vector<2x256xf32>
    %273 = vector.extract_strided_slice %8 {offsets = [0, 26], sizes = [2, 1], strides = [1, 1]} : vector<2x49xf32> to vector<2x1xf32>
    %274 = vector.broadcast %273 : vector<2x1xf32> to vector<2x256xf32>
    %275 = arith.mulf %272, %274 : vector<2x256xf32>
    %276 = arith.addf %271, %275 : vector<2x256xf32>
    %c0_85 = arith.constant 0 : index
    %c146 = arith.constant 146 : index
    %277 = vector.load %arg10[%c0_85, %c146] : memref<2x512xf32, #tpu.memory_space<vmem>>, vector<2x256xf32>
    %278 = vector.extract_strided_slice %8 {offsets = [0, 33], sizes = [2, 1], strides = [1, 1]} : vector<2x49xf32> to vector<2x1xf32>
    %279 = vector.broadcast %278 : vector<2x1xf32> to vector<2x256xf32>
    %280 = arith.mulf %277, %279 : vector<2x256xf32>
    %281 = arith.addf %276, %280 : vector<2x256xf32>
    %c0_86 = arith.constant 0 : index
    %c162 = arith.constant 162 : index
    %282 = vector.load %arg10[%c0_86, %c162] : memref<2x512xf32, #tpu.memory_space<vmem>>, vector<2x256xf32>
    %283 = vector.extract_strided_slice %8 {offsets = [0, 40], sizes = [2, 1], strides = [1, 1]} : vector<2x49xf32> to vector<2x1xf32>
    %284 = vector.broadcast %283 : vector<2x1xf32> to vector<2x256xf32>
    %285 = arith.mulf %282, %284 : vector<2x256xf32>
    %286 = arith.addf %281, %285 : vector<2x256xf32>
    %c0_87 = arith.constant 0 : index
    %c178 = arith.constant 178 : index
    %287 = vector.load %arg10[%c0_87, %c178] : memref<2x512xf32, #tpu.memory_space<vmem>>, vector<2x256xf32>
    %288 = vector.extract_strided_slice %8 {offsets = [0, 47], sizes = [2, 1], strides = [1, 1]} : vector<2x49xf32> to vector<2x1xf32>
    %289 = vector.broadcast %288 : vector<2x1xf32> to vector<2x256xf32>
    %290 = arith.mulf %287, %289 : vector<2x256xf32>
    %291 = arith.addf %286, %290 : vector<2x256xf32>
    %c5 = arith.constant 5 : index
    %c0_88 = arith.constant 0 : index
    %292 = vector.load %arg6[%c5, %c0_88] : memref<7x256xf32, #tpu.memory_space<vmem>>, vector<1x256xf32>
    %293 = vector.broadcast %292 : vector<1x256xf32> to vector<2x256xf32>
    %294 = arith.mulf %291, %293 : vector<2x256xf32>
    %295 = arith.addf %255, %294 : vector<2x256xf32>
    %cst_89 = arith.constant 0.000000e+00 : f32
    %296 = vector.broadcast %cst_89 : f32 to vector<2x256xf32>
    %c0_90 = arith.constant 0 : index
    %c83 = arith.constant 83 : index
    %297 = vector.load %arg10[%c0_90, %c83] : memref<2x512xf32, #tpu.memory_space<vmem>>, vector<2x256xf32>
    %298 = vector.extract_strided_slice %8 {offsets = [0, 6], sizes = [2, 1], strides = [1, 1]} : vector<2x49xf32> to vector<2x1xf32>
    %299 = vector.broadcast %298 : vector<2x1xf32> to vector<2x256xf32>
    %300 = arith.mulf %297, %299 : vector<2x256xf32>
    %301 = arith.addf %296, %300 : vector<2x256xf32>
    %c0_91 = arith.constant 0 : index
    %c99 = arith.constant 99 : index
    %302 = vector.load %arg10[%c0_91, %c99] : memref<2x512xf32, #tpu.memory_space<vmem>>, vector<2x256xf32>
    %303 = vector.extract_strided_slice %8 {offsets = [0, 13], sizes = [2, 1], strides = [1, 1]} : vector<2x49xf32> to vector<2x1xf32>
    %304 = vector.broadcast %303 : vector<2x1xf32> to vector<2x256xf32>
    %305 = arith.mulf %302, %304 : vector<2x256xf32>
    %306 = arith.addf %301, %305 : vector<2x256xf32>
    %c0_92 = arith.constant 0 : index
    %c115 = arith.constant 115 : index
    %307 = vector.load %arg10[%c0_92, %c115] : memref<2x512xf32, #tpu.memory_space<vmem>>, vector<2x256xf32>
    %308 = vector.extract_strided_slice %8 {offsets = [0, 20], sizes = [2, 1], strides = [1, 1]} : vector<2x49xf32> to vector<2x1xf32>
    %309 = vector.broadcast %308 : vector<2x1xf32> to vector<2x256xf32>
    %310 = arith.mulf %307, %309 : vector<2x256xf32>
    %311 = arith.addf %306, %310 : vector<2x256xf32>
    %c0_93 = arith.constant 0 : index
    %c131 = arith.constant 131 : index
    %312 = vector.load %arg10[%c0_93, %c131] : memref<2x512xf32, #tpu.memory_space<vmem>>, vector<2x256xf32>
    %313 = vector.extract_strided_slice %8 {offsets = [0, 27], sizes = [2, 1], strides = [1, 1]} : vector<2x49xf32> to vector<2x1xf32>
    %314 = vector.broadcast %313 : vector<2x1xf32> to vector<2x256xf32>
    %315 = arith.mulf %312, %314 : vector<2x256xf32>
    %316 = arith.addf %311, %315 : vector<2x256xf32>
    %c0_94 = arith.constant 0 : index
    %c147 = arith.constant 147 : index
    %317 = vector.load %arg10[%c0_94, %c147] : memref<2x512xf32, #tpu.memory_space<vmem>>, vector<2x256xf32>
    %318 = vector.extract_strided_slice %8 {offsets = [0, 34], sizes = [2, 1], strides = [1, 1]} : vector<2x49xf32> to vector<2x1xf32>
    %319 = vector.broadcast %318 : vector<2x1xf32> to vector<2x256xf32>
    %320 = arith.mulf %317, %319 : vector<2x256xf32>
    %321 = arith.addf %316, %320 : vector<2x256xf32>
    %c0_95 = arith.constant 0 : index
    %c163 = arith.constant 163 : index
    %322 = vector.load %arg10[%c0_95, %c163] : memref<2x512xf32, #tpu.memory_space<vmem>>, vector<2x256xf32>
    %323 = vector.extract_strided_slice %8 {offsets = [0, 41], sizes = [2, 1], strides = [1, 1]} : vector<2x49xf32> to vector<2x1xf32>
    %324 = vector.broadcast %323 : vector<2x1xf32> to vector<2x256xf32>
    %325 = arith.mulf %322, %324 : vector<2x256xf32>
    %326 = arith.addf %321, %325 : vector<2x256xf32>
    %c0_96 = arith.constant 0 : index
    %c179 = arith.constant 179 : index
    %327 = vector.load %arg10[%c0_96, %c179] : memref<2x512xf32, #tpu.memory_space<vmem>>, vector<2x256xf32>
    %328 = vector.extract_strided_slice %8 {offsets = [0, 48], sizes = [2, 1], strides = [1, 1]} : vector<2x49xf32> to vector<2x1xf32>
    %329 = vector.broadcast %328 : vector<2x1xf32> to vector<2x256xf32>
    %330 = arith.mulf %327, %329 : vector<2x256xf32>
    %331 = arith.addf %326, %330 : vector<2x256xf32>
    %c6 = arith.constant 6 : index
    %c0_97 = arith.constant 0 : index
    %332 = vector.load %arg6[%c6, %c0_97] : memref<7x256xf32, #tpu.memory_space<vmem>>, vector<1x256xf32>
    %333 = vector.broadcast %332 : vector<1x256xf32> to vector<2x256xf32>
    %334 = arith.mulf %331, %333 : vector<2x256xf32>
    %335 = arith.addf %295, %334 : vector<2x256xf32>
    %336 = vector.extract_strided_slice %335 {offsets = [0, 0], sizes = [1, 256], strides = [1, 1]} : vector<2x256xf32> to vector<1x256xf32>
    %337 = vector.extract_strided_slice %335 {offsets = [1, 0], sizes = [1, 256], strides = [1, 1]} : vector<2x256xf32> to vector<1x256xf32>
    %338 = arith.addf %336, %337 : vector<1x256xf32>
    %339 = vector.broadcast %9 : f32 to vector<1x256xf32>
    %340 = arith.addf %338, %339 : vector<1x256xf32>
    %341 = arith.negf %340 : vector<1x256xf32>
    %342 = math.exp %341 : vector<1x256xf32>
    %cst_98 = arith.constant 1.000000e+00 : f32
    %343 = vector.broadcast %cst_98 : f32 to vector<1x256xf32>
    %344 = arith.addf %343, %342 : vector<1x256xf32>
    %345 = arith.divf %343, %344 : vector<1x256xf32>
    %346 = vector.broadcast %345 : vector<1x256xf32> to vector<32x256xf32>
    %347 = arith.mulf %49, %346 : vector<32x256xf32>
    %c0_99 = arith.constant 0 : index
    %c0_100 = arith.constant 0 : index
    %c0_101 = arith.constant 0 : index
    %348 = vector.load %arg9[%c0_99, %c0_100, %c0_101] : memref<2x32x256xf32, #tpu.memory_space<vmem>>, vector<1x32x256xf32>
    %349 = vector.shape_cast %348 : vector<1x32x256xf32> to vector<32x256xf32>
    %350 = vector.shape_cast %347 : vector<32x256xf32> to vector<1x32x256xf32>
    tpu.vector_store %arg9[%c0_99, %c0_100, %c0_101], %350 {strides = array<i32>} : memref<2x32x256xf32, #tpu.memory_space<vmem>>, vector<1x32x256xf32>,
    %c1_102 = arith.constant 1 : index
    %c0_103 = arith.constant 0 : index
    %c0_104 = arith.constant 0 : index
    %351 = vector.load %arg1[%c1_102, %c0_103, %c0_104] : memref<2x32x256xf32, #tpu.memory_space<vmem>>, vector<1x32x256xf32>
    %352 = vector.shape_cast %351 : vector<1x32x256xf32> to vector<32x256xf32>
    %cst_105 = arith.constant dense<0.000000e+00> : vector<32xf32>
    %353 = vector.multi_reduction <add>, %352, %cst_105 [1] : vector<32x256xf32> to vector<32xf32>
    %354 = vector.shape_cast %353 : vector<32xf32> to vector<32x1xf32>
    %cst_106 = arith.constant 3.906250e-03 : f32
    %355 = vector.broadcast %cst_106 : f32 to vector<32x1xf32>
    %356 = arith.mulf %354, %355 : vector<32x1xf32>
    %cst_107 = arith.constant dense<0xFF800000> : vector<32xf32>
    %357 = vector.multi_reduction <maximumf>, %352, %cst_107 [1] : vector<32x256xf32> to vector<32xf32>
    %358 = vector.shape_cast %357 : vector<32xf32> to vector<32x1xf32>
    %359 = vector.broadcast %356 : vector<32x1xf32> to vector<32x2xf32>
    %360 = arith.mulf %4, %359 : vector<32x2xf32>
    %cst_108 = arith.constant dense<0.000000e+00> : vector<2xf32>
    %361 = vector.multi_reduction <add>, %360, %cst_108 [0] : vector<32x2xf32> to vector<2xf32>
    %362 = vector.shape_cast %361 : vector<2xf32> to vector<1x2xf32>
    %363 = arith.addf %362, %5 : vector<1x2xf32>
    %cst_109 = arith.constant 0.000000e+00 : f32
    %364 = vector.broadcast %cst_109 : f32 to vector<1x2xf32>
    %365 = arith.maximumf %363, %364 : vector<1x2xf32>
    %366 = vector.broadcast %365 : vector<1x2xf32> to vector<32x2xf32>
    %367 = arith.mulf %6, %366 : vector<32x2xf32>
    %cst_110 = arith.constant dense<0.000000e+00> : vector<32xf32>
    %368 = vector.multi_reduction <add>, %367, %cst_110 [1] : vector<32x2xf32> to vector<32xf32>
    %369 = vector.shape_cast %368 : vector<32xf32> to vector<32x1xf32>
    %370 = arith.addf %369, %7 : vector<32x1xf32>
    %371 = vector.broadcast %358 : vector<32x1xf32> to vector<32x2xf32>
    %372 = arith.mulf %4, %371 : vector<32x2xf32>
    %cst_111 = arith.constant dense<0.000000e+00> : vector<2xf32>
    %373 = vector.multi_reduction <add>, %372, %cst_111 [0] : vector<32x2xf32> to vector<2xf32>
    %374 = vector.shape_cast %373 : vector<2xf32> to vector<1x2xf32>
    %375 = arith.addf %374, %5 : vector<1x2xf32>
    %cst_112 = arith.constant 0.000000e+00 : f32
    %376 = vector.broadcast %cst_112 : f32 to vector<1x2xf32>
    %377 = arith.maximumf %375, %376 : vector<1x2xf32>
    %378 = vector.broadcast %377 : vector<1x2xf32> to vector<32x2xf32>
    %379 = arith.mulf %6, %378 : vector<32x2xf32>
    %cst_113 = arith.constant dense<0.000000e+00> : vector<32xf32>
    %380 = vector.multi_reduction <add>, %379, %cst_113 [1] : vector<32x2xf32> to vector<32xf32>
    %381 = vector.shape_cast %380 : vector<32xf32> to vector<32x1xf32>
    %382 = arith.addf %381, %7 : vector<32x1xf32>
    %383 = arith.addf %370, %382 : vector<32x1xf32>
    %384 = arith.negf %383 : vector<32x1xf32>
    %385 = math.exp %384 : vector<32x1xf32>
    %cst_114 = arith.constant 1.000000e+00 : f32
    %386 = vector.broadcast %cst_114 : f32 to vector<32x1xf32>
    %387 = arith.addf %386, %385 : vector<32x1xf32>
    %388 = arith.divf %386, %387 : vector<32x1xf32>
    %389 = vector.broadcast %388 : vector<32x1xf32> to vector<32x256xf32>
    %390 = arith.mulf %352, %389 : vector<32x256xf32>
    %cst_115 = arith.constant dense<0.000000e+00> : vector<256xf32>
    %391 = vector.multi_reduction <add>, %390, %cst_115 [0] : vector<32x256xf32> to vector<256xf32>
    %392 = vector.shape_cast %391 : vector<256xf32> to vector<1x256xf32>
    %cst_116 = arith.constant 3.125000e-02 : f32
    %393 = vector.broadcast %cst_116 : f32 to vector<1x256xf32>
    %394 = arith.mulf %392, %393 : vector<1x256xf32>
    %c0_117 = arith.constant 0 : index
    %c128_118 = arith.constant 128 : index
    %395 = vector.load %arg10[%c0_117, %c128_118] : memref<2x512xf32, #tpu.memory_space<vmem>>, vector<1x256xf32>
    tpu.vector_store %arg10[%c0_117, %c128_118], %394 {strides = array<i32>} : memref<2x512xf32, #tpu.memory_space<vmem>>, vector<1x256xf32>,
    %cst_119 = arith.constant dense<0xFF800000> : vector<256xf32>
    %396 = vector.multi_reduction <maximumf>, %390, %cst_119 [0] : vector<32x256xf32> to vector<256xf32>
    %397 = vector.shape_cast %396 : vector<256xf32> to vector<1x256xf32>
    %c1_120 = arith.constant 1 : index
    %c128_121 = arith.constant 128 : index
    %398 = vector.load %arg10[%c1_120, %c128_121] : memref<2x512xf32, #tpu.memory_space<vmem>>, vector<1x256xf32>
    tpu.vector_store %arg10[%c1_120, %c128_121], %397 {strides = array<i32>} : memref<2x512xf32, #tpu.memory_space<vmem>>, vector<1x256xf32>,
    %cst_122 = arith.constant 0.000000e+00 : f32
    %399 = vector.broadcast %cst_122 : f32 to vector<2x256xf32>
    %cst_123 = arith.constant 0.000000e+00 : f32
    %400 = vector.broadcast %cst_123 : f32 to vector<2x256xf32>
    %c0_124 = arith.constant 0 : index
    %c77_125 = arith.constant 77 : index
    %401 = vector.load %arg10[%c0_124, %c77_125] : memref<2x512xf32, #tpu.memory_space<vmem>>, vector<2x256xf32>
    %402 = vector.extract_strided_slice %8 {offsets = [0, 0], sizes = [2, 1], strides = [1, 1]} : vector<2x49xf32> to vector<2x1xf32>
    %403 = vector.broadcast %402 : vector<2x1xf32> to vector<2x256xf32>
    %404 = arith.mulf %401, %403 : vector<2x256xf32>
    %405 = arith.addf %400, %404 : vector<2x256xf32>
    %c0_126 = arith.constant 0 : index
    %c93_127 = arith.constant 93 : index
    %406 = vector.load %arg10[%c0_126, %c93_127] : memref<2x512xf32, #tpu.memory_space<vmem>>, vector<2x256xf32>
    %407 = vector.extract_strided_slice %8 {offsets = [0, 7], sizes = [2, 1], strides = [1, 1]} : vector<2x49xf32> to vector<2x1xf32>
    %408 = vector.broadcast %407 : vector<2x1xf32> to vector<2x256xf32>
    %409 = arith.mulf %406, %408 : vector<2x256xf32>
    %410 = arith.addf %405, %409 : vector<2x256xf32>
    %c0_128 = arith.constant 0 : index
    %c109_129 = arith.constant 109 : index
    %411 = vector.load %arg10[%c0_128, %c109_129] : memref<2x512xf32, #tpu.memory_space<vmem>>, vector<2x256xf32>
    %412 = vector.extract_strided_slice %8 {offsets = [0, 14], sizes = [2, 1], strides = [1, 1]} : vector<2x49xf32> to vector<2x1xf32>
    %413 = vector.broadcast %412 : vector<2x1xf32> to vector<2x256xf32>
    %414 = arith.mulf %411, %413 : vector<2x256xf32>
    %415 = arith.addf %410, %414 : vector<2x256xf32>
    %c0_130 = arith.constant 0 : index
    %c125_131 = arith.constant 125 : index
    %416 = vector.load %arg10[%c0_130, %c125_131] : memref<2x512xf32, #tpu.memory_space<vmem>>, vector<2x256xf32>
    %417 = vector.extract_strided_slice %8 {offsets = [0, 21], sizes = [2, 1], strides = [1, 1]} : vector<2x49xf32> to vector<2x1xf32>
    %418 = vector.broadcast %417 : vector<2x1xf32> to vector<2x256xf32>
    %419 = arith.mulf %416, %418 : vector<2x256xf32>
    %420 = arith.addf %415, %419 : vector<2x256xf32>
    %c0_132 = arith.constant 0 : index
    %c141_133 = arith.constant 141 : index
    %421 = vector.load %arg10[%c0_132, %c141_133] : memref<2x512xf32, #tpu.memory_space<vmem>>, vector<2x256xf32>
    %422 = vector.extract_strided_slice %8 {offsets = [0, 28], sizes = [2, 1], strides = [1, 1]} : vector<2x49xf32> to vector<2x1xf32>
    %423 = vector.broadcast %422 : vector<2x1xf32> to vector<2x256xf32>
    %424 = arith.mulf %421, %423 : vector<2x256xf32>
    %425 = arith.addf %420, %424 : vector<2x256xf32>
    %c0_134 = arith.constant 0 : index
    %c157_135 = arith.constant 157 : index
    %426 = vector.load %arg10[%c0_134, %c157_135] : memref<2x512xf32, #tpu.memory_space<vmem>>, vector<2x256xf32>
    %427 = vector.extract_strided_slice %8 {offsets = [0, 35], sizes = [2, 1], strides = [1, 1]} : vector<2x49xf32> to vector<2x1xf32>
    %428 = vector.broadcast %427 : vector<2x1xf32> to vector<2x256xf32>
    %429 = arith.mulf %426, %428 : vector<2x256xf32>
    %430 = arith.addf %425, %429 : vector<2x256xf32>
    %c0_136 = arith.constant 0 : index
    %c173_137 = arith.constant 173 : index
    %431 = vector.load %arg10[%c0_136, %c173_137] : memref<2x512xf32, #tpu.memory_space<vmem>>, vector<2x256xf32>
    %432 = vector.extract_strided_slice %8 {offsets = [0, 42], sizes = [2, 1], strides = [1, 1]} : vector<2x49xf32> to vector<2x1xf32>
    %433 = vector.broadcast %432 : vector<2x1xf32> to vector<2x256xf32>
    %434 = arith.mulf %431, %433 : vector<2x256xf32>
    %435 = arith.addf %430, %434 : vector<2x256xf32>
    %c0_138 = arith.constant 0 : index
    %c0_139 = arith.constant 0 : index
    %436 = vector.load %arg6[%c0_138, %c0_139] : memref<7x256xf32, #tpu.memory_space<vmem>>, vector<1x256xf32>
    %437 = vector.broadcast %436 : vector<1x256xf32> to vector<2x256xf32>
    %438 = arith.mulf %435, %437 : vector<2x256xf32>
    %439 = arith.addf %399, %438 : vector<2x256xf32>
    %cst_140 = arith.constant 0.000000e+00 : f32
    %440 = vector.broadcast %cst_140 : f32 to vector<2x256xf32>
    %c0_141 = arith.constant 0 : index
    %c78_142 = arith.constant 78 : index
    %441 = vector.load %arg10[%c0_141, %c78_142] : memref<2x512xf32, #tpu.memory_space<vmem>>, vector<2x256xf32>
    %442 = vector.extract_strided_slice %8 {offsets = [0, 1], sizes = [2, 1], strides = [1, 1]} : vector<2x49xf32> to vector<2x1xf32>
    %443 = vector.broadcast %442 : vector<2x1xf32> to vector<2x256xf32>
    %444 = arith.mulf %441, %443 : vector<2x256xf32>
    %445 = arith.addf %440, %444 : vector<2x256xf32>
    %c0_143 = arith.constant 0 : index
    %c94_144 = arith.constant 94 : index
    %446 = vector.load %arg10[%c0_143, %c94_144] : memref<2x512xf32, #tpu.memory_space<vmem>>, vector<2x256xf32>
    %447 = vector.extract_strided_slice %8 {offsets = [0, 8], sizes = [2, 1], strides = [1, 1]} : vector<2x49xf32> to vector<2x1xf32>
    %448 = vector.broadcast %447 : vector<2x1xf32> to vector<2x256xf32>
    %449 = arith.mulf %446, %448 : vector<2x256xf32>
    %450 = arith.addf %445, %449 : vector<2x256xf32>
    %c0_145 = arith.constant 0 : index
    %c110_146 = arith.constant 110 : index
    %451 = vector.load %arg10[%c0_145, %c110_146] : memref<2x512xf32, #tpu.memory_space<vmem>>, vector<2x256xf32>
    %452 = vector.extract_strided_slice %8 {offsets = [0, 15], sizes = [2, 1], strides = [1, 1]} : vector<2x49xf32> to vector<2x1xf32>
    %453 = vector.broadcast %452 : vector<2x1xf32> to vector<2x256xf32>
    %454 = arith.mulf %451, %453 : vector<2x256xf32>
    %455 = arith.addf %450, %454 : vector<2x256xf32>
    %c0_147 = arith.constant 0 : index
    %c126_148 = arith.constant 126 : index
    %456 = vector.load %arg10[%c0_147, %c126_148] : memref<2x512xf32, #tpu.memory_space<vmem>>, vector<2x256xf32>
    %457 = vector.extract_strided_slice %8 {offsets = [0, 22], sizes = [2, 1], strides = [1, 1]} : vector<2x49xf32> to vector<2x1xf32>
    %458 = vector.broadcast %457 : vector<2x1xf32> to vector<2x256xf32>
    %459 = arith.mulf %456, %458 : vector<2x256xf32>
    %460 = arith.addf %455, %459 : vector<2x256xf32>
    %c0_149 = arith.constant 0 : index
    %c142_150 = arith.constant 142 : index
    %461 = vector.load %arg10[%c0_149, %c142_150] : memref<2x512xf32, #tpu.memory_space<vmem>>, vector<2x256xf32>
    %462 = vector.extract_strided_slice %8 {offsets = [0, 29], sizes = [2, 1], strides = [1, 1]} : vector<2x49xf32> to vector<2x1xf32>
    %463 = vector.broadcast %462 : vector<2x1xf32> to vector<2x256xf32>
    %464 = arith.mulf %461, %463 : vector<2x256xf32>
    %465 = arith.addf %460, %464 : vector<2x256xf32>
    %c0_151 = arith.constant 0 : index
    %c158_152 = arith.constant 158 : index
    %466 = vector.load %arg10[%c0_151, %c158_152] : memref<2x512xf32, #tpu.memory_space<vmem>>, vector<2x256xf32>
    %467 = vector.extract_strided_slice %8 {offsets = [0, 36], sizes = [2, 1], strides = [1, 1]} : vector<2x49xf32> to vector<2x1xf32>
    %468 = vector.broadcast %467 : vector<2x1xf32> to vector<2x256xf32>
    %469 = arith.mulf %466, %468 : vector<2x256xf32>
    %470 = arith.addf %465, %469 : vector<2x256xf32>
    %c0_153 = arith.constant 0 : index
    %c174_154 = arith.constant 174 : index
    %471 = vector.load %arg10[%c0_153, %c174_154] : memref<2x512xf32, #tpu.memory_space<vmem>>, vector<2x256xf32>
    %472 = vector.extract_strided_slice %8 {offsets = [0, 43], sizes = [2, 1], strides = [1, 1]} : vector<2x49xf32> to vector<2x1xf32>
    %473 = vector.broadcast %472 : vector<2x1xf32> to vector<2x256xf32>
    %474 = arith.mulf %471, %473 : vector<2x256xf32>
    %475 = arith.addf %470, %474 : vector<2x256xf32>
    %c1_155 = arith.constant 1 : index
    %c0_156 = arith.constant 0 : index
    %476 = vector.load %arg6[%c1_155, %c0_156] : memref<7x256xf32, #tpu.memory_space<vmem>>, vector<1x256xf32>
    %477 = vector.broadcast %476 : vector<1x256xf32> to vector<2x256xf32>
    %478 = arith.mulf %475, %477 : vector<2x256xf32>
    %479 = arith.addf %439, %478 : vector<2x256xf32>
    %cst_157 = arith.constant 0.000000e+00 : f32
    %480 = vector.broadcast %cst_157 : f32 to vector<2x256xf32>
    %c0_158 = arith.constant 0 : index
    %c79_159 = arith.constant 79 : index
    %481 = vector.load %arg10[%c0_158, %c79_159] : memref<2x512xf32, #tpu.memory_space<vmem>>, vector<2x256xf32>
    %482 = vector.extract_strided_slice %8 {offsets = [0, 2], sizes = [2, 1], strides = [1, 1]} : vector<2x49xf32> to vector<2x1xf32>
    %483 = vector.broadcast %482 : vector<2x1xf32> to vector<2x256xf32>
    %484 = arith.mulf %481, %483 : vector<2x256xf32>
    %485 = arith.addf %480, %484 : vector<2x256xf32>
    %c0_160 = arith.constant 0 : index
    %c95_161 = arith.constant 95 : index
    %486 = vector.load %arg10[%c0_160, %c95_161] : memref<2x512xf32, #tpu.memory_space<vmem>>, vector<2x256xf32>
    %487 = vector.extract_strided_slice %8 {offsets = [0, 9], sizes = [2, 1], strides = [1, 1]} : vector<2x49xf32> to vector<2x1xf32>
    %488 = vector.broadcast %487 : vector<2x1xf32> to vector<2x256xf32>
    %489 = arith.mulf %486, %488 : vector<2x256xf32>
    %490 = arith.addf %485, %489 : vector<2x256xf32>
    %c0_162 = arith.constant 0 : index
    %c111_163 = arith.constant 111 : index
    %491 = vector.load %arg10[%c0_162, %c111_163] : memref<2x512xf32, #tpu.memory_space<vmem>>, vector<2x256xf32>
    %492 = vector.extract_strided_slice %8 {offsets = [0, 16], sizes = [2, 1], strides = [1, 1]} : vector<2x49xf32> to vector<2x1xf32>
    %493 = vector.broadcast %492 : vector<2x1xf32> to vector<2x256xf32>
    %494 = arith.mulf %491, %493 : vector<2x256xf32>
    %495 = arith.addf %490, %494 : vector<2x256xf32>
    %c0_164 = arith.constant 0 : index
    %c127_165 = arith.constant 127 : index
    %496 = vector.load %arg10[%c0_164, %c127_165] : memref<2x512xf32, #tpu.memory_space<vmem>>, vector<2x256xf32>
    %497 = vector.extract_strided_slice %8 {offsets = [0, 23], sizes = [2, 1], strides = [1, 1]} : vector<2x49xf32> to vector<2x1xf32>
    %498 = vector.broadcast %497 : vector<2x1xf32> to vector<2x256xf32>
    %499 = arith.mulf %496, %498 : vector<2x256xf32>
    %500 = arith.addf %495, %499 : vector<2x256xf32>
    %c0_166 = arith.constant 0 : index
    %c143_167 = arith.constant 143 : index
    %501 = vector.load %arg10[%c0_166, %c143_167] : memref<2x512xf32, #tpu.memory_space<vmem>>, vector<2x256xf32>
    %502 = vector.extract_strided_slice %8 {offsets = [0, 30], sizes = [2, 1], strides = [1, 1]} : vector<2x49xf32> to vector<2x1xf32>
    %503 = vector.broadcast %502 : vector<2x1xf32> to vector<2x256xf32>
    %504 = arith.mulf %501, %503 : vector<2x256xf32>
    %505 = arith.addf %500, %504 : vector<2x256xf32>
    %c0_168 = arith.constant 0 : index
    %c159_169 = arith.constant 159 : index
    %506 = vector.load %arg10[%c0_168, %c159_169] : memref<2x512xf32, #tpu.memory_space<vmem>>, vector<2x256xf32>
    %507 = vector.extract_strided_slice %8 {offsets = [0, 37], sizes = [2, 1], strides = [1, 1]} : vector<2x49xf32> to vector<2x1xf32>
    %508 = vector.broadcast %507 : vector<2x1xf32> to vector<2x256xf32>
    %509 = arith.mulf %506, %508 : vector<2x256xf32>
    %510 = arith.addf %505, %509 : vector<2x256xf32>
    %c0_170 = arith.constant 0 : index
    %c175_171 = arith.constant 175 : index
    %511 = vector.load %arg10[%c0_170, %c175_171] : memref<2x512xf32, #tpu.memory_space<vmem>>, vector<2x256xf32>
    %512 = vector.extract_strided_slice %8 {offsets = [0, 44], sizes = [2, 1], strides = [1, 1]} : vector<2x49xf32> to vector<2x1xf32>
    %513 = vector.broadcast %512 : vector<2x1xf32> to vector<2x256xf32>
    %514 = arith.mulf %511, %513 : vector<2x256xf32>
    %515 = arith.addf %510, %514 : vector<2x256xf32>
    %c2_172 = arith.constant 2 : index
    %c0_173 = arith.constant 0 : index
    %516 = vector.load %arg6[%c2_172, %c0_173] : memref<7x256xf32, #tpu.memory_space<vmem>>, vector<1x256xf32>
    %517 = vector.broadcast %516 : vector<1x256xf32> to vector<2x256xf32>
    %518 = arith.mulf %515, %517 : vector<2x256xf32>
    %519 = arith.addf %479, %518 : vector<2x256xf32>
    %cst_174 = arith.constant 0.000000e+00 : f32
    %520 = vector.broadcast %cst_174 : f32 to vector<2x256xf32>
    %c0_175 = arith.constant 0 : index
    %c80_176 = arith.constant 80 : index
    %521 = vector.load %arg10[%c0_175, %c80_176] : memref<2x512xf32, #tpu.memory_space<vmem>>, vector<2x256xf32>
    %522 = vector.extract_strided_slice %8 {offsets = [0, 3], sizes = [2, 1], strides = [1, 1]} : vector<2x49xf32> to vector<2x1xf32>
    %523 = vector.broadcast %522 : vector<2x1xf32> to vector<2x256xf32>
    %524 = arith.mulf %521, %523 : vector<2x256xf32>
    %525 = arith.addf %520, %524 : vector<2x256xf32>
    %c0_177 = arith.constant 0 : index
    %c96_178 = arith.constant 96 : index
    %526 = vector.load %arg10[%c0_177, %c96_178] : memref<2x512xf32, #tpu.memory_space<vmem>>, vector<2x256xf32>
    %527 = vector.extract_strided_slice %8 {offsets = [0, 10], sizes = [2, 1], strides = [1, 1]} : vector<2x49xf32> to vector<2x1xf32>
    %528 = vector.broadcast %527 : vector<2x1xf32> to vector<2x256xf32>
    %529 = arith.mulf %526, %528 : vector<2x256xf32>
    %530 = arith.addf %525, %529 : vector<2x256xf32>
    %c0_179 = arith.constant 0 : index
    %c112_180 = arith.constant 112 : index
    %531 = vector.load %arg10[%c0_179, %c112_180] : memref<2x512xf32, #tpu.memory_space<vmem>>, vector<2x256xf32>
    %532 = vector.extract_strided_slice %8 {offsets = [0, 17], sizes = [2, 1], strides = [1, 1]} : vector<2x49xf32> to vector<2x1xf32>
    %533 = vector.broadcast %532 : vector<2x1xf32> to vector<2x256xf32>
    %534 = arith.mulf %531, %533 : vector<2x256xf32>
    %535 = arith.addf %530, %534 : vector<2x256xf32>
    %c0_181 = arith.constant 0 : index
    %c128_182 = arith.constant 128 : index
    %536 = vector.load %arg10[%c0_181, %c128_182] : memref<2x512xf32, #tpu.memory_space<vmem>>, vector<2x256xf32>
    %537 = vector.extract_strided_slice %8 {offsets = [0, 24], sizes = [2, 1], strides = [1, 1]} : vector<2x49xf32> to vector<2x1xf32>
    %538 = vector.broadcast %537 : vector<2x1xf32> to vector<2x256xf32>
    %539 = arith.mulf %536, %538 : vector<2x256xf32>
    %540 = arith.addf %535, %539 : vector<2x256xf32>
    %c0_183 = arith.constant 0 : index
    %c144_184 = arith.constant 144 : index
    %541 = vector.load %arg10[%c0_183, %c144_184] : memref<2x512xf32, #tpu.memory_space<vmem>>, vector<2x256xf32>
    %542 = vector.extract_strided_slice %8 {offsets = [0, 31], sizes = [2, 1], strides = [1, 1]} : vector<2x49xf32> to vector<2x1xf32>
    %543 = vector.broadcast %542 : vector<2x1xf32> to vector<2x256xf32>
    %544 = arith.mulf %541, %543 : vector<2x256xf32>
    %545 = arith.addf %540, %544 : vector<2x256xf32>
    %c0_185 = arith.constant 0 : index
    %c160_186 = arith.constant 160 : index
    %546 = vector.load %arg10[%c0_185, %c160_186] : memref<2x512xf32, #tpu.memory_space<vmem>>, vector<2x256xf32>
    %547 = vector.extract_strided_slice %8 {offsets = [0, 38], sizes = [2, 1], strides = [1, 1]} : vector<2x49xf32> to vector<2x1xf32>
    %548 = vector.broadcast %547 : vector<2x1xf32> to vector<2x256xf32>
    %549 = arith.mulf %546, %548 : vector<2x256xf32>
    %550 = arith.addf %545, %549 : vector<2x256xf32>
    %c0_187 = arith.constant 0 : index
    %c176_188 = arith.constant 176 : index
    %551 = vector.load %arg10[%c0_187, %c176_188] : memref<2x512xf32, #tpu.memory_space<vmem>>, vector<2x256xf32>
    %552 = vector.extract_strided_slice %8 {offsets = [0, 45], sizes = [2, 1], strides = [1, 1]} : vector<2x49xf32> to vector<2x1xf32>
    %553 = vector.broadcast %552 : vector<2x1xf32> to vector<2x256xf32>
    %554 = arith.mulf %551, %553 : vector<2x256xf32>
    %555 = arith.addf %550, %554 : vector<2x256xf32>
    %556 = arith.addf %519, %555 : vector<2x256xf32>
    %cst_189 = arith.constant 0.000000e+00 : f32
    %557 = vector.broadcast %cst_189 : f32 to vector<2x256xf32>
    %c0_190 = arith.constant 0 : index
    %c81_191 = arith.constant 81 : index
    %558 = vector.load %arg10[%c0_190, %c81_191] : memref<2x512xf32, #tpu.memory_space<vmem>>, vector<2x256xf32>
    %559 = vector.extract_strided_slice %8 {offsets = [0, 4], sizes = [2, 1], strides = [1, 1]} : vector<2x49xf32> to vector<2x1xf32>
    %560 = vector.broadcast %559 : vector<2x1xf32> to vector<2x256xf32>
    %561 = arith.mulf %558, %560 : vector<2x256xf32>
    %562 = arith.addf %557, %561 : vector<2x256xf32>
    %c0_192 = arith.constant 0 : index
    %c97_193 = arith.constant 97 : index
    %563 = vector.load %arg10[%c0_192, %c97_193] : memref<2x512xf32, #tpu.memory_space<vmem>>, vector<2x256xf32>
    %564 = vector.extract_strided_slice %8 {offsets = [0, 11], sizes = [2, 1], strides = [1, 1]} : vector<2x49xf32> to vector<2x1xf32>
    %565 = vector.broadcast %564 : vector<2x1xf32> to vector<2x256xf32>
    %566 = arith.mulf %563, %565 : vector<2x256xf32>
    %567 = arith.addf %562, %566 : vector<2x256xf32>
    %c0_194 = arith.constant 0 : index
    %c113_195 = arith.constant 113 : index
    %568 = vector.load %arg10[%c0_194, %c113_195] : memref<2x512xf32, #tpu.memory_space<vmem>>, vector<2x256xf32>
    %569 = vector.extract_strided_slice %8 {offsets = [0, 18], sizes = [2, 1], strides = [1, 1]} : vector<2x49xf32> to vector<2x1xf32>
    %570 = vector.broadcast %569 : vector<2x1xf32> to vector<2x256xf32>
    %571 = arith.mulf %568, %570 : vector<2x256xf32>
    %572 = arith.addf %567, %571 : vector<2x256xf32>
    %c0_196 = arith.constant 0 : index
    %c129_197 = arith.constant 129 : index
    %573 = vector.load %arg10[%c0_196, %c129_197] : memref<2x512xf32, #tpu.memory_space<vmem>>, vector<2x256xf32>
    %574 = vector.extract_strided_slice %8 {offsets = [0, 25], sizes = [2, 1], strides = [1, 1]} : vector<2x49xf32> to vector<2x1xf32>
    %575 = vector.broadcast %574 : vector<2x1xf32> to vector<2x256xf32>
    %576 = arith.mulf %573, %575 : vector<2x256xf32>
    %577 = arith.addf %572, %576 : vector<2x256xf32>
    %c0_198 = arith.constant 0 : index
    %c145_199 = arith.constant 145 : index
    %578 = vector.load %arg10[%c0_198, %c145_199] : memref<2x512xf32, #tpu.memory_space<vmem>>, vector<2x256xf32>
    %579 = vector.extract_strided_slice %8 {offsets = [0, 32], sizes = [2, 1], strides = [1, 1]} : vector<2x49xf32> to vector<2x1xf32>
    %580 = vector.broadcast %579 : vector<2x1xf32> to vector<2x256xf32>
    %581 = arith.mulf %578, %580 : vector<2x256xf32>
    %582 = arith.addf %577, %581 : vector<2x256xf32>
    %c0_200 = arith.constant 0 : index
    %c161_201 = arith.constant 161 : index
    %583 = vector.load %arg10[%c0_200, %c161_201] : memref<2x512xf32, #tpu.memory_space<vmem>>, vector<2x256xf32>
    %584 = vector.extract_strided_slice %8 {offsets = [0, 39], sizes = [2, 1], strides = [1, 1]} : vector<2x49xf32> to vector<2x1xf32>
    %585 = vector.broadcast %584 : vector<2x1xf32> to vector<2x256xf32>
    %586 = arith.mulf %583, %585 : vector<2x256xf32>
    %587 = arith.addf %582, %586 : vector<2x256xf32>
    %c0_202 = arith.constant 0 : index
    %c177_203 = arith.constant 177 : index
    %588 = vector.load %arg10[%c0_202, %c177_203] : memref<2x512xf32, #tpu.memory_space<vmem>>, vector<2x256xf32>
    %589 = vector.extract_strided_slice %8 {offsets = [0, 46], sizes = [2, 1], strides = [1, 1]} : vector<2x49xf32> to vector<2x1xf32>
    %590 = vector.broadcast %589 : vector<2x1xf32> to vector<2x256xf32>
    %591 = arith.mulf %588, %590 : vector<2x256xf32>
    %592 = arith.addf %587, %591 : vector<2x256xf32>
    %c4_204 = arith.constant 4 : index
    %c0_205 = arith.constant 0 : index
    %593 = vector.load %arg6[%c4_204, %c0_205] : memref<7x256xf32, #tpu.memory_space<vmem>>, vector<1x256xf32>
    %594 = vector.broadcast %593 : vector<1x256xf32> to vector<2x256xf32>
    %595 = arith.mulf %592, %594 : vector<2x256xf32>
    %596 = arith.addf %556, %595 : vector<2x256xf32>
    %cst_206 = arith.constant 0.000000e+00 : f32
    %597 = vector.broadcast %cst_206 : f32 to vector<2x256xf32>
    %c0_207 = arith.constant 0 : index
    %c82_208 = arith.constant 82 : index
    %598 = vector.load %arg10[%c0_207, %c82_208] : memref<2x512xf32, #tpu.memory_space<vmem>>, vector<2x256xf32>
    %599 = vector.extract_strided_slice %8 {offsets = [0, 5], sizes = [2, 1], strides = [1, 1]} : vector<2x49xf32> to vector<2x1xf32>
    %600 = vector.broadcast %599 : vector<2x1xf32> to vector<2x256xf32>
    %601 = arith.mulf %598, %600 : vector<2x256xf32>
    %602 = arith.addf %597, %601 : vector<2x256xf32>
    %c0_209 = arith.constant 0 : index
    %c98_210 = arith.constant 98 : index
    %603 = vector.load %arg10[%c0_209, %c98_210] : memref<2x512xf32, #tpu.memory_space<vmem>>, vector<2x256xf32>
    %604 = vector.extract_strided_slice %8 {offsets = [0, 12], sizes = [2, 1], strides = [1, 1]} : vector<2x49xf32> to vector<2x1xf32>
    %605 = vector.broadcast %604 : vector<2x1xf32> to vector<2x256xf32>
    %606 = arith.mulf %603, %605 : vector<2x256xf32>
    %607 = arith.addf %602, %606 : vector<2x256xf32>
    %c0_211 = arith.constant 0 : index
    %c114_212 = arith.constant 114 : index
    %608 = vector.load %arg10[%c0_211, %c114_212] : memref<2x512xf32, #tpu.memory_space<vmem>>, vector<2x256xf32>
    %609 = vector.extract_strided_slice %8 {offsets = [0, 19], sizes = [2, 1], strides = [1, 1]} : vector<2x49xf32> to vector<2x1xf32>
    %610 = vector.broadcast %609 : vector<2x1xf32> to vector<2x256xf32>
    %611 = arith.mulf %608, %610 : vector<2x256xf32>
    %612 = arith.addf %607, %611 : vector<2x256xf32>
    %c0_213 = arith.constant 0 : index
    %c130_214 = arith.constant 130 : index
    %613 = vector.load %arg10[%c0_213, %c130_214] : memref<2x512xf32, #tpu.memory_space<vmem>>, vector<2x256xf32>
    %614 = vector.extract_strided_slice %8 {offsets = [0, 26], sizes = [2, 1], strides = [1, 1]} : vector<2x49xf32> to vector<2x1xf32>
    %615 = vector.broadcast %614 : vector<2x1xf32> to vector<2x256xf32>
    %616 = arith.mulf %613, %615 : vector<2x256xf32>
    %617 = arith.addf %612, %616 : vector<2x256xf32>
    %c0_215 = arith.constant 0 : index
    %c146_216 = arith.constant 146 : index
    %618 = vector.load %arg10[%c0_215, %c146_216] : memref<2x512xf32, #tpu.memory_space<vmem>>, vector<2x256xf32>
    %619 = vector.extract_strided_slice %8 {offsets = [0, 33], sizes = [2, 1], strides = [1, 1]} : vector<2x49xf32> to vector<2x1xf32>
    %620 = vector.broadcast %619 : vector<2x1xf32> to vector<2x256xf32>
    %621 = arith.mulf %618, %620 : vector<2x256xf32>
    %622 = arith.addf %617, %621 : vector<2x256xf32>
    %c0_217 = arith.constant 0 : index
    %c162_218 = arith.constant 162 : index
    %623 = vector.load %arg10[%c0_217, %c162_218] : memref<2x512xf32, #tpu.memory_space<vmem>>, vector<2x256xf32>
    %624 = vector.extract_strided_slice %8 {offsets = [0, 40], sizes = [2, 1], strides = [1, 1]} : vector<2x49xf32> to vector<2x1xf32>
    %625 = vector.broadcast %624 : vector<2x1xf32> to vector<2x256xf32>
    %626 = arith.mulf %623, %625 : vector<2x256xf32>
    %627 = arith.addf %622, %626 : vector<2x256xf32>
    %c0_219 = arith.constant 0 : index
    %c178_220 = arith.constant 178 : index
    %628 = vector.load %arg10[%c0_219, %c178_220] : memref<2x512xf32, #tpu.memory_space<vmem>>, vector<2x256xf32>
    %629 = vector.extract_strided_slice %8 {offsets = [0, 47], sizes = [2, 1], strides = [1, 1]} : vector<2x49xf32> to vector<2x1xf32>
    %630 = vector.broadcast %629 : vector<2x1xf32> to vector<2x256xf32>
    %631 = arith.mulf %628, %630 : vector<2x256xf32>
    %632 = arith.addf %627, %631 : vector<2x256xf32>
    %c5_221 = arith.constant 5 : index
    %c0_222 = arith.constant 0 : index
    %633 = vector.load %arg6[%c5_221, %c0_222] : memref<7x256xf32, #tpu.memory_space<vmem>>, vector<1x256xf32>
    %634 = vector.broadcast %633 : vector<1x256xf32> to vector<2x256xf32>
    %635 = arith.mulf %632, %634 : vector<2x256xf32>
    %636 = arith.addf %596, %635 : vector<2x256xf32>
    %cst_223 = arith.constant 0.000000e+00 : f32
    %637 = vector.broadcast %cst_223 : f32 to vector<2x256xf32>
    %c0_224 = arith.constant 0 : index
    %c83_225 = arith.constant 83 : index
    %638 = vector.load %arg10[%c0_224, %c83_225] : memref<2x512xf32, #tpu.memory_space<vmem>>, vector<2x256xf32>
    %639 = vector.extract_strided_slice %8 {offsets = [0, 6], sizes = [2, 1], strides = [1, 1]} : vector<2x49xf32> to vector<2x1xf32>
    %640 = vector.broadcast %639 : vector<2x1xf32> to vector<2x256xf32>
    %641 = arith.mulf %638, %640 : vector<2x256xf32>
    %642 = arith.addf %637, %641 : vector<2x256xf32>
    %c0_226 = arith.constant 0 : index
    %c99_227 = arith.constant 99 : index
    %643 = vector.load %arg10[%c0_226, %c99_227] : memref<2x512xf32, #tpu.memory_space<vmem>>, vector<2x256xf32>
    %644 = vector.extract_strided_slice %8 {offsets = [0, 13], sizes = [2, 1], strides = [1, 1]} : vector<2x49xf32> to vector<2x1xf32>
    %645 = vector.broadcast %644 : vector<2x1xf32> to vector<2x256xf32>
    %646 = arith.mulf %643, %645 : vector<2x256xf32>
    %647 = arith.addf %642, %646 : vector<2x256xf32>
    %c0_228 = arith.constant 0 : index
    %c115_229 = arith.constant 115 : index
    %648 = vector.load %arg10[%c0_228, %c115_229] : memref<2x512xf32, #tpu.memory_space<vmem>>, vector<2x256xf32>
    %649 = vector.extract_strided_slice %8 {offsets = [0, 20], sizes = [2, 1], strides = [1, 1]} : vector<2x49xf32> to vector<2x1xf32>
    %650 = vector.broadcast %649 : vector<2x1xf32> to vector<2x256xf32>
    %651 = arith.mulf %648, %650 : vector<2x256xf32>
    %652 = arith.addf %647, %651 : vector<2x256xf32>
    %c0_230 = arith.constant 0 : index
    %c131_231 = arith.constant 131 : index
    %653 = vector.load %arg10[%c0_230, %c131_231] : memref<2x512xf32, #tpu.memory_space<vmem>>, vector<2x256xf32>
    %654 = vector.extract_strided_slice %8 {offsets = [0, 27], sizes = [2, 1], strides = [1, 1]} : vector<2x49xf32> to vector<2x1xf32>
    %655 = vector.broadcast %654 : vector<2x1xf32> to vector<2x256xf32>
    %656 = arith.mulf %653, %655 : vector<2x256xf32>
    %657 = arith.addf %652, %656 : vector<2x256xf32>
    %c0_232 = arith.constant 0 : index
    %c147_233 = arith.constant 147 : index
    %658 = vector.load %arg10[%c0_232, %c147_233] : memref<2x512xf32, #tpu.memory_space<vmem>>, vector<2x256xf32>
    %659 = vector.extract_strided_slice %8 {offsets = [0, 34], sizes = [2, 1], strides = [1, 1]} : vector<2x49xf32> to vector<2x1xf32>
    %660 = vector.broadcast %659 : vector<2x1xf32> to vector<2x256xf32>
    %661 = arith.mulf %658, %660 : vector<2x256xf32>
    %662 = arith.addf %657, %661 : vector<2x256xf32>
    %c0_234 = arith.constant 0 : index
    %c163_235 = arith.constant 163 : index
    %663 = vector.load %arg10[%c0_234, %c163_235] : memref<2x512xf32, #tpu.memory_space<vmem>>, vector<2x256xf32>
    %664 = vector.extract_strided_slice %8 {offsets = [0, 41], sizes = [2, 1], strides = [1, 1]} : vector<2x49xf32> to vector<2x1xf32>
    %665 = vector.broadcast %664 : vector<2x1xf32> to vector<2x256xf32>
    %666 = arith.mulf %663, %665 : vector<2x256xf32>
    %667 = arith.addf %662, %666 : vector<2x256xf32>
    %c0_236 = arith.constant 0 : index
    %c179_237 = arith.constant 179 : index
    %668 = vector.load %arg10[%c0_236, %c179_237] : memref<2x512xf32, #tpu.memory_space<vmem>>, vector<2x256xf32>
    %669 = vector.extract_strided_slice %8 {offsets = [0, 48], sizes = [2, 1], strides = [1, 1]} : vector<2x49xf32> to vector<2x1xf32>
    %670 = vector.broadcast %669 : vector<2x1xf32> to vector<2x256xf32>
    %671 = arith.mulf %668, %670 : vector<2x256xf32>
    %672 = arith.addf %667, %671 : vector<2x256xf32>
    %c6_238 = arith.constant 6 : index
    %c0_239 = arith.constant 0 : index
    %673 = vector.load %arg6[%c6_238, %c0_239] : memref<7x256xf32, #tpu.memory_space<vmem>>, vector<1x256xf32>
    %674 = vector.broadcast %673 : vector<1x256xf32> to vector<2x256xf32>
    %675 = arith.mulf %672, %674 : vector<2x256xf32>
    %676 = arith.addf %636, %675 : vector<2x256xf32>
    %677 = vector.extract_strided_slice %676 {offsets = [0, 0], sizes = [1, 256], strides = [1, 1]} : vector<2x256xf32> to vector<1x256xf32>
    %678 = vector.extract_strided_slice %676 {offsets = [1, 0], sizes = [1, 256], strides = [1, 1]} : vector<2x256xf32> to vector<1x256xf32>
    %679 = arith.addf %677, %678 : vector<1x256xf32>
    %680 = vector.broadcast %9 : f32 to vector<1x256xf32>
    %681 = arith.addf %679, %680 : vector<1x256xf32>
    %682 = arith.negf %681 : vector<1x256xf32>
    %683 = math.exp %682 : vector<1x256xf32>
    %cst_240 = arith.constant 1.000000e+00 : f32
    %684 = vector.broadcast %cst_240 : f32 to vector<1x256xf32>
    %685 = arith.addf %684, %683 : vector<1x256xf32>
    %686 = arith.divf %684, %685 : vector<1x256xf32>
    %687 = vector.broadcast %686 : vector<1x256xf32> to vector<32x256xf32>
    %688 = arith.mulf %390, %687 : vector<32x256xf32>
    %c1_241 = arith.constant 1 : index
    %c0_242 = arith.constant 0 : index
    %c0_243 = arith.constant 0 : index
    %689 = vector.load %arg9[%c1_241, %c0_242, %c0_243] : memref<2x32x256xf32, #tpu.memory_space<vmem>>, vector<1x32x256xf32>
    %690 = vector.shape_cast %689 : vector<1x32x256xf32> to vector<32x256xf32>
    %691 = vector.shape_cast %688 : vector<32x256xf32> to vector<1x32x256xf32>
    tpu.vector_store %arg9[%c1_241, %c0_242, %c0_243], %691 {strides = array<i32>} : memref<2x32x256xf32, #tpu.memory_space<vmem>>, vector<1x32x256xf32>,
    return
  }
  func.func @transform_0(%arg0: i32) -> (i32, i32, i32) {
    %c0_i32 = arith.constant 0 : i32
    %c0_i32_0 = arith.constant 0 : i32
    %c0_i32_1 = arith.constant 0 : i32
    return %arg0, %c0_i32, %c0_i32_0 : i32, i32, i32
  }
  func.func @transform_1(%arg0: i32) -> (i32, i32) {
    %c0_i32 = arith.constant 0 : i32
    %c0_i32_0 = arith.constant 0 : i32
    %c0_i32_1 = arith.constant 0 : i32
    return %c0_i32, %c0_i32_0 : i32, i32
  }
  func.func @transform_2(%arg0: i32) -> (i32, i32) {
    %c0_i32 = arith.constant 0 : i32
    %c0_i32_0 = arith.constant 0 : i32
    %c0_i32_1 = arith.constant 0 : i32
    return %c0_i32, %c0_i32_0 : i32, i32
  }
  func.func @transform_3(%arg0: i32) -> (i32, i32) {
    %c0_i32 = arith.constant 0 : i32
    %c0_i32_0 = arith.constant 0 : i32
    %c0_i32_1 = arith.constant 0 : i32
    return %c0_i32, %c0_i32_0 : i32, i32
  }
  func.func @transform_4(%arg0: i32) -> (i32, i32) {
    %c0_i32 = arith.constant 0 : i32
    %c0_i32_0 = arith.constant 0 : i32
    %c0_i32_1 = arith.constant 0 : i32
    return %c0_i32, %c0_i32_0 : i32, i32
  }
  func.func @transform_5(%arg0: i32) -> (i32, i32) {
    %c0_i32 = arith.constant 0 : i32
    %c0_i32_0 = arith.constant 0 : i32
    %c0_i32_1 = arith.constant 0 : i32
    return %c0_i32, %c0_i32_0 : i32, i32
  }
  func.func @transform_6(%arg0: i32) -> (i32, i32) {
    %c0_i32 = arith.constant 0 : i32
    %c0_i32_0 = arith.constant 0 : i32
    %c0_i32_1 = arith.constant 0 : i32
    return %c0_i32, %c0_i32_0 : i32, i32
  }
  func.func @transform_7(%arg0: i32) -> i32 {
    %c0_i32 = arith.constant 0 : i32
    %c0_i32_0 = arith.constant 0 : i32
    return %c0_i32 : i32
  }
  func.func @transform_8(%arg0: i32) -> (i32, i32, i32) {
    %c0_i32 = arith.constant 0 : i32
    %c0_i32_0 = arith.constant 0 : i32
    %c0_i32_1 = arith.constant 0 : i32
    return %arg0, %c0_i32, %c0_i32_0 : i32, i32, i32
  }
}

</mosaic_0001>

<bundles_post_ra>
// kernel: tpu_custom_call.1
= control target key start
LH: loop header
LB: loop body
LE: loop exit
PB: predicated region body
PF: predicated region fallthrough
CT: control target
= control target key end

     0   :  { %14 = vsyncpa [#allocation5], 0  ;;  %s3737_s0 = inlined_call_operand.hbm [shape: f32[2,32,256], index: 0, kind: input, shape index: {}]   ;;  %s3738_s1 = inlined_call_operand.vmem [shape: f32[32,2], index: 1, kind: input, shape index: {}]   ;;  %s3739_s2 = inlined_call_operand.vmem [shape: f32[1,2], index: 2, kind: input, shape index: {}]   ;;  %s3740_s3 = inlined_call_operand.vmem [shape: f32[32,2], index: 3, kind: input, shape index: {}]   ;;  %s3741_s4 = inlined_call_operand.vmem [shape: f32[32,1], index: 4, kind: input, shape index: {}]   ;;  %s3742_s5 = inlined_call_operand.vmem [shape: f32[7,256], index: 5, kind: input, shape index: {}]   ;;  %s3743_s6 = inlined_call_operand.vmem [shape: f32[2,49], index: 6, kind: input, shape index: {}]   ;;  %s3744_s7 = inlined_call_operand.<no memory space> [shape: f32[1], index: 7, kind: input, shape index: {}]   ;;  %s3745_s8 = inlined_call_operand.hbm [shape: f32[2,32,256], index: 8, kind: output, shape index: {}]  }
   0x1   :  { %15 = vsyncpa [#allocation6], 0  ;;  %s20_s29 = sshll.u32 %s3737_s0, 4  ;;  %s2385_s30 = smov [#allocation4]   ;;  %s21_s29 = int_to_ptr.hbm [resolvable:$true] %s20_s29 }
   0x2   :  { %s22_s9 = sshll.u32 %s2385_s30, 4  ;;  %s2386_s10 = smov 256   ;;  %s23_s9 = int_to_ptr.vmem [resolvable:$true] %s22_s9 }
   0x3   :  { %s2387_s11 = smov 16  }
   0x4   :  { %28 = dma.hbm_to_vmem [thread:$0]  %s21_s29, 2048, %s23_s9, [#allocation5], %s2386_s10, %s2386_s10, %s2387_s11  }
   0x5   :  { %2381 = dma.done.wait [#allocation5], 2048  }
   0x6   :  { %2382 = vsyncadd [#allocation5], 4294965248  ;;  %v2388_v0 = vmov 7   ;;  %v68_v1 = vld [vmem:[#allocation4 + $0x20] sm:$0xff]  ;;  %v69_v2 = vld [vmem:[#allocation4 + $0x28] sm:$0xff]  ;;  %v3747_v12 = vmov 0  }
   0x7   :  { %2221 = vset.pattern.permute.xlu2 %v2388_v0  ;;  %v64_v3 = vld [vmem:[#allocation4] sm:$0xff]  ;;  %v78_v4 = vadd.f32 %v69_v2, %v68_v1  ;;  %v65_v5 = vld [vmem:[#allocation4 + $0x8] sm:$0xff]  ;;  %v70_v8 = vld [vmem:[#allocation4 + $0x30] sm:$0xff]  ;;  %2220 = vset.pattern.permute.xlu1 %v3747_v12  ;;  %v94_v17 = vmax.f32 %v68_v1, %v69_v2  ;;  %v2390_v18 = vmov 21   ;;  %vm466_vm0 = vcmask 1041408   ;;  %s2392_s15 = smov 77  }
   0x8   :  { %v88_v6 = vmax.f32 %v64_v3, %v65_v5  ;;  %v72_v7 = vadd.f32 %v65_v5, %v64_v3  ;;  %v71_v9 = vld [vmem:[#allocation4 + $0x38] sm:$0xff]  ;;  %v66_v10 = vld [vmem:[#allocation4 + $0x10] sm:$0xff]  ;;  %2223 = vset.pattern.permute.xlu0 %v2390_v18  ;;  %v2391_v24 = vmov 14   ;;  %v2393_v26 = vmov 22   ;;  %s2398_s18 = smov 78   ;;  %v2565_v2 = vld [vmem:[%s3738_s1 + $0x10] sm:$0xff] }
   0x9   :  { %79 = vadd.xlane.f32.xlu1 %v78_v4  ;;  %v67_v11 = vld [vmem:[#allocation4 + $0x18] sm:$0xff]  ;;  %v81_v13 = vadd.f32 %v71_v9, %v70_v8  ;;  %v97_v16 = vmax.f32 %v70_v8, %v71_v9  ;;  %v2394_v28 = vmov 28   ;;  %v2395_v29 = vmov 42   ;;  %v2570_v4 = vld [vmem:[%s3738_s1 + $0x8] sm:$0xff]  ;;  %s2417_s29 = smov 79   ;;  %s2427_s22 = smov 81  }
   0xa   :  { %89 = vmax.xlane.f32.xlu2 %v88_v6  ;;  %73 = vadd.xlane.f32.xlu0 %v72_v7  ;;  %v91_v14 = vmax.f32 %v66_v10, %v67_v11  ;;  %v75_v15 = vadd.f32 %v67_v11, %v66_v10  ;;  %v2514_v19 = vld [vmem:[%s3743_s6] sm:$0x3]  ;;  %v2396_v33 = vmov 35   ;;  %v2397_v35 = vmov 1   ;;  %v2577_v10 = vld [vmem:[%s3738_s1 + $0x18] sm:$0xff]  ;;  %s2438_s30 = smov 112  }
   0xb   :  { %v461_v20 = vld [vmem:[%s3742_s5] ss:$8 sm:$0x3]  ;;  %v2128_v27 = vld [vmem:[%s3742_s5 + $0x1] ss:$8 sm:$0x3] }
   0xc   :  { %v464_v21 = vperm.slane %v461_v20, 1  ;;  %v463_v22 = vperm.slane %v461_v20, 0  ;;  %v586_v30 = vperm.slane %v2128_v27, 1  ;;  %v585_v31 = vperm.slane %v2128_v27, 0  ;;  %v2557_v58 = vld [vmem:[%s3738_s1] sm:$0xff]  ;;  %s2437_s1 = smov 80  }
   0xd   :  { %v2399_v36 = vmov 9   ;;  %v2400_v37 = vmov 8   ;;  %v2401_v38 = vmov 15   ;;  %v2402_v39 = vmov 29   ;;  %s2439_s9 = smov 64   ;;  %s2440_s0 = smov 96  }
   0xe   :  { %v465_v23 = vrot.slane %v464_v21, 6  ;;  %v587_v32 = vrot.slane %v586_v30, 6  ;;  %v2403_v40 = vmov 43   ;;  %v2404_v41 = vmov 37   ;;  %s2442_s14 = smov 82   ;;  %s2452_s21 = smov 126  }
   0xf   :  { %v2405_v42 = vmov 36   ;;  %v2406_v43 = vmov 30   ;;  %v2407_v44 = vmov 24   ;;  %v2408_v45 = vmov 2   ;;  %s2453_s23 = smov 124   ;;  %s2454_s24 = smov 123  }
  0x10   :  { %v467_v25 = vsel %vm466_vm0, %v463_v22, %v465_v23  ;;  %v588_v34 = vsel %vm466_vm0, %v585_v31, %v587_v32  ;;  %v2409_v46 = vmov 3   ;;  %v2410_v47 = vmov 25   ;;  %v2129_v55 = vld [vmem:[%s3742_s5 + $0x2] ss:$8 sm:$0x3] }
  0x11   :  { %82 = vadd.xlane.f32.xlu1 %v81_v13  ;;  %v2411_v48 = vmov 16   ;;  %v2412_v49 = vmov 17   ;;  %v2413_v50 = vmov 23   ;;  %v2414_v51 = vmov 45  }
  0x12   :  { %92 = vmax.xlane.f32.xlu2 %v91_v14  ;;  %76 = vadd.xlane.f32.xlu0 %v75_v15  ;;  %v714_v57 = vperm.slane %v2129_v55, 1  ;;  %v2415_v59 = vmov 44   ;;  %v2416_v60 = vmov 4   ;;  %v713_v0 = vperm.slane %v2129_v55, 0  ;;  %v2607_v55 = vld [vmem:[%s3740_s3] sm:$0xff] }
  0x13   :  { %vm104_vm1 = vcmask 15360   ;;  %v2418_v23 = vmov 18  }
  0x14   :  { %v715_v1 = vrot.slane %v714_v57, 6 }
  0x16   :  { %v716_v15 = vsel %vm466_vm0, %v713_v0, %v715_v1  ;;  %v2622_v0 = vld [vmem:[%s3740_s3 + $0x10] sm:$0xff] }
  0x19   :  { %98 = vmax.xlane.f32.xlu1 %v97_v16 }
  0x1a   :  { %95 = vmax.xlane.f32.xlu0 %v94_v17 }
  0x2a   :  { %359 = vperm.xlu2 %2221, %v2514_v19  }
  0x2e   :  { %393 = vperm.xlu0 %2223, %v2514_v19  }
  0x32   :  { %2222 = vset.pattern.permute.xlu2 %v2391_v24  ;;  %349 = vperm.xlu1 %2220, %v2514_v19  }
  0x33   :  { %376 = vperm.xlu2 %2222, %v2514_v19  }
  0x36   :  { %468 = vrot.lane.b32.xlu0 %v467_v25, %s2392_s15  ;;  %v2419_v25 = vmov 10  }
  0x37   :  { %2230 = vset.pattern.permute.xlu0 %v2393_v26 }
  0x3a   :  { %2224 = vset.pattern.permute.xlu1 %v2394_v28 }
  0x3b   :  { %2226 = vset.pattern.permute.xlu2 %v2395_v29  ;;  %411 = vperm.xlu1 %2224, %v2514_v19  }
  0x3c   :  { %445 = vperm.xlu2 %2226, %v2514_v19  }
  0x3e   :  { %519 = vperm.xlu0 %2230, %v2514_v19  }
  0x43   :  { %2225 = vset.pattern.permute.xlu1 %v2396_v33 }
  0x44   :  { %2227 = vset.pattern.permute.xlu2 %v2397_v35  ;;  %428 = vperm.xlu1 %2225, %v2514_v19  }
  0x45   :  { %477 = vperm.xlu2 %2227, %v2514_v19  }
  0x46   :  { %589 = vrot.lane.b32.xlu0 %v588_v34, %s2398_s18 }
  0x47   :  { %2235 = vset.pattern.permute.xlu0 %v2399_v36 }
  0x4c   :  { %2228 = vset.pattern.permute.xlu1 %v2400_v37 }
  0x4d   :  { %2229 = vset.pattern.permute.xlu2 %v2401_v38  ;;  %487 = vperm.xlu1 %2228, %v2514_v19  }
  0x4e   :  { %503 = vperm.xlu2 %2229, %v2514_v19   ;;  %615 = vperm.xlu0 %2235, %v2514_v19  }
  0x55   :  { %2231 = vset.pattern.permute.xlu1 %v2402_v39 }
  0x56   :  { %2233 = vset.pattern.permute.xlu2 %v2403_v40  ;;  %535 = vperm.xlu1 %2231, %v2514_v19  }
  0x57   :  { %567 = vperm.xlu2 %2233, %v2514_v19   ;;  %2239 = vset.pattern.permute.xlu0 %v2404_v41 }
  0x58   :  { %679 = vperm.xlu0 %2239, %v2514_v19  }
  0x5e   :  { %2232 = vset.pattern.permute.xlu1 %v2405_v42 }
  0x5f   :  { %2238 = vset.pattern.permute.xlu2 %v2406_v43  ;;  %551 = vperm.xlu1 %2232, %v2514_v19  }
  0x60   :  { %663 = vperm.xlu2 %2238, %v2514_v19   ;;  %2244 = vset.pattern.permute.xlu0 %v2407_v44  ;;  %v2420_v44 = vmov 31  }
  0x61   :  { %776 = vperm.xlu0 %2244, %v2514_v19  }
  0x67   :  { %2234 = vset.pattern.permute.xlu1 %v2408_v45 }
  0x68   :  { %2241 = vset.pattern.permute.xlu2 %v2409_v46  ;;  %605 = vperm.xlu1 %2234, %v2514_v19  }
  0x69   :  { %733 = vperm.xlu2 %2241, %v2514_v19   ;;  %2251 = vset.pattern.permute.xlu0 %v2410_v47 }
  0x6a   :  { %890 = vperm.xlu0 %2251, %v2514_v19  }
  0x70   :  { %2236 = vset.pattern.permute.xlu1 %v2411_v48  ;;  %v2600_v48 = vld [vmem:[%s3739_s2] sm:$0x1]  ;;  %s2441_s2 = smov 32  }
  0x71   :  { %2243 = vset.pattern.permute.xlu2 %v2412_v49  ;;  %631 = vperm.xlu1 %2236, %v2514_v19  }
  0x72   :  { %759 = vperm.xlu2 %2243, %v2514_v19  }
  0x79   :  { %2237 = vset.pattern.permute.xlu1 %v2413_v50 }
  0x7a   :  { %2247 = vset.pattern.permute.xlu2 %v2414_v51  ;;  %647 = vperm.xlu1 %2237, %v2514_v19  }
  0x7b   :  { %824 = vperm.xlu2 %2247, %v2514_v19  }
  0x7c   :  { %v80_v52 = vpop.xlane.xlu1 %79 }
  0x7d   :  { %v74_v53 = vpop.xlane.xlu0 %73  ;;  %v90_v54 = vpop.xlane.xlu2 %89  ;;  %v86_v61 = vmul.f32 0.00390625, %v80_v52  ;;  %v2421_v52 = vmov 38  }
  0x7e   :  { %v84_v56 = vmul.f32 0.00390625, %v74_v53  ;;  %v141_v6 = vmul.f32 %v90_v54, %v2557_v58 }
  0x7f   :  { %v102_v11 = vmul.f32 %v86_v61, %v2565_v2  ;;  %v2422_v61 = vmov 11  }
  0x80   :  { %v100_v62 = vmul.f32 %v84_v56, %v2557_v58  ;;  %v145_v16 = vsel %vm104_vm1, %v141_v6, 0.0  ;;  %v2629_v6 = vld [vmem:[%s3740_s3 + $0x8] sm:$0xff] }
  0x81   :  { %v108_v22 = vsel %vm104_vm1, %v102_v11, 0.0 }
  0x82   :  { %2240 = vset.pattern.permute.xlu1 %v2415_v59  ;;  %v105_v13 = vsel %vm104_vm1, %v100_v62, 0.0 }
  0x83   :  { %2248 = vset.pattern.permute.xlu2 %v2416_v60  ;;  %695 = vperm.xlu1 %2240, %v2514_v19   ;;  %v2615_v60 = vld [vmem:[%s3740_s3 + $0x18] sm:$0xff] }
  0x84   :  { %848 = vperm.xlu2 %2248, %v2514_v19   ;;  %v83_v63 = vpop.xlane.xlu1 %82 }
  0x85   :  { %v77_v3 = vpop.xlane.xlu0 %76  ;;  %v93_v5 = vpop.xlane.xlu2 %92  ;;  %v87_v7 = vmul.f32 0.00390625, %v83_v63 }
  0x86   :  { %v85_v8 = vmul.f32 0.00390625, %v77_v3  ;;  %v142_v9 = vmul.f32 %v93_v5, %v2570_v4 }
  0x87   :  { %v103_v17 = vmul.f32 %v87_v7, %v2577_v10  ;;  %v2423_v7 = vmov 46  }
  0x88   :  { %v101_v14 = vmul.f32 %v85_v8, %v2570_v4  ;;  %v146_v20 = vsel %vm104_vm1, %v142_v9, 0.0 }
  0x89   :  { %v147_v27 = vadd.f32 %v146_v20, %v145_v16  ;;  %v110_v29 = vsel %vm104_vm1, %v103_v17, 0.0 }
  0x8a   :  { %v106_v18 = vsel %vm104_vm1, %v101_v14, 0.0 }
  0x8b   :  { %v107_v21 = vadd.f32 %v106_v18, %v105_v13  ;;  %717 = vrot.lane.b32.xlu1 %v716_v15, %s2417_s29 }
  0x8c   :  { %2250 = vset.pattern.permute.xlu2 %v2418_v23  ;;  %v99_v24 = vpop.xlane.xlu1 %98  ;;  %2242 = vset.pattern.permute.xlu1 %v2419_v25 }
  0x8d   :  { %v109_v26 = vadd.f32 %v108_v22, %v107_v21  ;;  %v96_v28 = vpop.xlane.xlu0 %95  ;;  %874 = vperm.xlu2 %2250, %v2514_v19   ;;  %v144_v30 = vmul.f32 %v99_v24, %v2577_v10  ;;  %v2633_v11 = vpop.permute.xlu2 %359  ;;  %v2424_v22 = vmov 32  }
  0x8e   :  { %v143_v31 = vmul.f32 %v96_v28, %v2565_v2 }
  0x8f   :  { %v111_v32 = vadd.f32 %v110_v29, %v109_v26  ;;  %v150_v36 = vsel %vm104_vm1, %v144_v30, 0.0 }
  0x90   :  { %v148_v33 = vsel %vm104_vm1, %v143_v31, 0.0 }
  0x91   :  { %v112_v34 = vrot.slane %v111_v32, 4  ;;  %v149_v35 = vadd.f32 %v148_v33, %v147_v27  ;;  %v1299_v33 = vld [vmem:[#allocation4 + $0x48] sm:$0xff] }
  0x93   :  { %v151_v37 = vadd.f32 %v150_v36, %v149_v35  ;;  %743 = vperm.xlu1 %2242, %v2514_v19   ;;  %v113_v38 = vadd.f32 %v112_v34, %v111_v32  ;;  %v1298_v32 = vld [vmem:[#allocation4 + $0x40] sm:$0xff] }
  0x94   :  { %v1306_v34 = vadd.f32 %v1299_v33, %v1298_v32 }
  0x95   :  { %v152_v39 = vrot.slane %v151_v37, 4  ;;  %v114_v41 = vrot.slane %v113_v38, 2  ;;  %2254 = vset.pattern.permute.xlu2 %v2423_v7  ;;  %v2638_v16 = vpop.permute.xlu2 %376 }
  0x97   :  { %v153_v40 = vadd.f32 %v152_v39, %v151_v37  ;;  %v115_v45 = vadd.f32 %v114_v41, %v113_v38  ;;  %v1301_v41 = vld [vmem:[#allocation4 + $0x58] sm:$0xff] }
  0x99   :  { %v154_v42 = vrot.slane %v153_v40, 2  ;;  %v116_v50 = vrot.slane %v115_v45, 1 }
  0x9b   :  { %v155_v43 = vadd.f32 %v154_v42, %v153_v40  ;;  %2245 = vset.pattern.permute.xlu1 %v2420_v44  ;;  %v117_v54 = vadd.f32 %v116_v50, %v115_v45  ;;  %v1300_v40 = vld [vmem:[#allocation4 + $0x50] sm:$0xff]  ;;  %v2425_v42 = vmov 39   ;;  %v1305_v50 = vld [vmem:[#allocation4 + $0x78] sm:$0xff] }
  0x9c   :  { %792 = vperm.xlu1 %2245, %v2514_v19   ;;  %v1309_v44 = vadd.f32 %v1301_v41, %v1300_v40 }
  0x9d   :  { %v156_v46 = vrot.slane %v155_v43, 1  ;;  %v118_v59 = vadd.f32 %v117_v54, %v2600_v48  ;;  %v2640_v17 = vpop.permute.xlu2 %445  ;;  %v1302_v54 = vld [vmem:[#allocation4 + $0x60] sm:$0xff] }
  0x9f   :  { %v157_v47 = vadd.f32 %v156_v46, %v155_v43  ;;  %v119_v63 = vmax.f32 %v118_v59, 0.0  ;;  %v1325_v43 = vmax.f32 %v1300_v40, %v1301_v41 }
  0xa0   :  { %v2656_v28 = vpop.permute.xlu0 %393 }
  0xa1   :  { %v158_v49 = vadd.f32 %v157_v47, %v2600_v48  ;;  %v120_v5 = vperm.slane %v119_v63, 0 }
  0xa3   :  { %v159_v51 = vmax.f32 %v158_v49, 0.0  ;;  %v122_v9 = vmul.f32 %v120_v5, %v2629_v6  ;;  %v121_v14 = vmul.f32 %v120_v5, %v2607_v55  ;;  %v123_v23 = vmul.f32 %v120_v5, %v2622_v0  ;;  %v1304_v49 = vld [vmem:[#allocation4 + $0x70] sm:$0xff] }
  0xa4   :  { %2246 = vset.pattern.permute.xlu1 %v2421_v52  ;;  %v2652_v26 = vpop.permute.xlu1 %349  ;;  %v124_v35 = vmul.f32 %v120_v5, %v2615_v60  ;;  %v1322_v52 = vmax.f32 %v1298_v32, %v1299_v33 }
  0xa5   :  { %808 = vperm.xlu1 %2246, %v2514_v19   ;;  %v160_v53 = vperm.slane %v159_v51, 0  ;;  %v128_v13 = vsel %vm104_vm1, %v122_v9, 0.0  ;;  %v125_v15 = vsel %vm104_vm1, %v121_v14, 0.0  ;;  %v2643_v20 = vpop.permute.xlu2 %477  ;;  %v131_v25 = vsel %vm104_vm1, %v123_v23, 0.0  ;;  %3785 = vst [vmem:[#allocation11_spill] sm:$0xff] %v2652_v26  ;;  %v2709_v23 = vld [vmem:[%s3741_s4] sm:$0xff] }
  0xa6   :  { %3784 = vst [vmem:[#allocation10_spill] sm:$0xff] %v2643_v20  ;;  %v134_v39 = vsel %vm104_vm1, %v124_v35, 0.0  ;;  %v1331_v51 = vmax.f32 %v1304_v49, %v1305_v50  ;;  %v2130_v35 = vld [vmem:[%s3742_s5 + $0x4] ss:$8 sm:$0x3] }
  0xa7   :  { %v161_v56 = vmul.f32 %v160_v53, %v2607_v55  ;;  %v164_v62 = vmul.f32 %v160_v53, %v2615_v60  ;;  %v163_v3 = vmul.f32 %v160_v53, %v2622_v0  ;;  %v162_v18 = vmul.f32 %v160_v53, %v2629_v6 }
  0xa8   :  { %v2662_v31 = vpop.permute.xlu0 %468  ;;  %v957_v41 = vperm.slane %v2130_v35, 1 }
  0xa9   :  { %v165_v57 = vsel %vm104_vm1, %v161_v56, 0.0  ;;  %v174_v1 = vsel %vm104_vm1, %v164_v62, 0.0  ;;  %v171_v8 = vsel %vm104_vm1, %v163_v3, 0.0  ;;  %v168_v21 = vsel %vm104_vm1, %v162_v18, 0.0  ;;  %3786 = vst [vmem:[#allocation12_spill] sm:$0xff] %v2662_v31  ;;  %v1303_v56 = vld [vmem:[#allocation4 + $0x68] sm:$0xff] }
  0xaa   :  { %166 = vadd.xlane.f32.xlu0 %v165_v57  ;;  %v2426_v18 = vmov 12  }
  0xad   :  { %2249 = vset.pattern.permute.xlu1 %v2422_v61  ;;  %v2649_v24 = vpop.permute.xlu2 %503  ;;  %v2658_v29 = vpop.permute.xlu1 %411  ;;  %v1328_v61 = vmax.f32 %v1302_v54, %v1303_v56 }
  0xae   :  { %858 = vperm.xlu1 %2249, %v2514_v19  }
  0xb0   :  { %v2670_v38 = vpop.permute.xlu0 %519 }
  0xb2   :  { %175 = vadd.xlane.f32.xlu0 %v174_v1 }
  0xb5   :  { %v2654_v27 = vpop.permute.xlu2 %567 }
  0xb6   :  { %172 = vadd.xlane.f32.xlu2 %v171_v8  ;;  %2252 = vset.pattern.permute.xlu1 %v2424_v22  ;;  %v2666_v36 = vpop.permute.xlu1 %428  ;;  %v1312_v8 = vadd.f32 %v1303_v56, %v1302_v54 }
  0xb8   :  { %v2678_v47 = vpop.permute.xlu0 %589 }
  0xb9   :  { %3788 = vst [vmem:[#allocation14_spill] sm:$0xff] %v2678_v47 }
  0xba   :  { %129 = vadd.xlane.f32.xlu0 %v128_v13 }
  0xbd   :  { %v2660_v30 = vpop.permute.xlu2 %663 }
  0xbe   :  { %126 = vadd.xlane.f32.xlu2 %v125_v15  ;;  %v1315_v15 = vadd.f32 %v1305_v50, %v1304_v49 }
  0xbf   :  { %v2674_v45 = vpop.permute.xlu1 %487 }
  0xc0   :  { %v2684_v59 = vpop.permute.xlu0 %615 }
  0xc2   :  { %1307 = vadd.xlane.f32.xlu0 %v1306_v34 }
  0xc5   :  { %v2668_v37 = vpop.permute.xlu2 %733 }
  0xc6   :  { %3787 = vst [vmem:[#allocation13_spill] sm:$0xff] %v2668_v37 }
  0xc8   :  { %v2680_v53 = vpop.permute.xlu1 %535 }
  0xca   :  { %1326 = vmax.xlane.f32.xlu0 %v1325_v43  ;;  %v2690_v1 = vpop.permute.xlu0 %679  ;;  %v958_v43 = vrot.slane %v957_v41, 6 }
  0xcd   :  { %v2676_v46 = vpop.permute.xlu2 %759 }
  0xd1   :  { %v2686_v62 = vpop.permute.xlu1 %551 }
  0xd2   :  { %1332 = vmax.xlane.f32.xlu0 %v1331_v51 }
  0xd3   :  { %v2694_v5 = vpop.permute.xlu0 %776 }
  0xd5   :  { %v2682_v57 = vpop.permute.xlu2 %824 }
  0xd6   :  { %938 = vperm.xlu2 %2254, %v2514_v19  }
  0xd8   :  { %169 = vadd.xlane.f32.xlu1 %v168_v21 }
  0xda   :  { %v2692_v3 = vpop.permute.xlu1 %605 }
  0xdb   :  { %3790 = vst [vmem:[#allocation16_spill] sm:$0xff] %v2692_v3 }
  0xdc   :  { %v2702_v14 = vpop.permute.xlu0 %890 }
  0xdd   :  { %3791 = vst [vmem:[#allocation17_spill] sm:$0xff] %v2702_v14 }
  0xde   :  { %2260 = vset.pattern.permute.xlu2 %v3747_v12  ;;  %v2688_v63 = vpop.permute.xlu2 %848 }
  0xdf   :  { %3789 = vst [vmem:[#allocation15_spill] sm:$0xff] %v2688_v63 }
  0xe0   :  { %132 = vadd.xlane.f32.xlu1 %v131_v25 }
  0xe3   :  { %v2698_v9 = vpop.permute.xlu1 %631 }
  0xe7   :  { %v2696_v7 = vpop.permute.xlu2 %874 }
  0xec   :  { %v2704_v21 = vpop.permute.xlu1 %647 }
  0xf9   :  { %906 = vperm.xlu1 %2252, %v2514_v19  }
  0xff   :  { %135 = vadd.xlane.f32.xlu2 %v134_v39  ;;  %v2716_v39 = vpop.permute.xlu1 %695 }
 0x101   :  { %2253 = vset.pattern.permute.xlu1 %v2425_v42  ;;  %v956_v42 = vperm.slane %v2130_v35, 0 }
 0x102   :  { %922 = vperm.xlu1 %2253, %v2514_v19  }
 0x107   :  { %1310 = vadd.xlane.f32.xlu2 %v1309_v44  ;;  %v959_v44 = vsel %vm466_vm0, %v956_v42, %v958_v43  ;;  %v2719_v49 = vpop.permute.xlu1 %717 }
 0x108   :  { %3792 = vst [vmem:[#allocation18_spill] sm:$0xff] %v2719_v49 }
 0x10a   :  { %2256 = vset.pattern.permute.xlu1 %v2426_v18 }
 0x10f   :  { %1323 = vmax.xlane.f32.xlu2 %v1322_v52  ;;  %v2722_v52 = vpop.permute.xlu1 %743 }
 0x117   :  { %1329 = vmax.xlane.f32.xlu2 %v1328_v61  ;;  %v2428_v61 = vmov 19  }
 0x11d   :  { %v167_v25 = vpop.xlane.xlu0 %166 }
 0x11e   :  { %v177_v33 = vadd.f32 %v167_v25, %v2709_v23  ;;  %v2429_v25 = vmov 26  }
 0x129   :  { %v2700_v13 = vpop.xlane.xlu2 %172 }
 0x12c   :  { %1313 = vadd.xlane.f32.xlu1 %v1312_v8  ;;  %v2726_v8 = vpop.permute.xlu1 %792 }
 0x131   :  { %v127_v22 = vpop.xlane.xlu2 %126 }
 0x132   :  { %v137_v32 = vadd.f32 %v127_v22, %v2709_v23 }
 0x134   :  { %1316 = vadd.xlane.f32.xlu1 %v1315_v15  ;;  %v181_v34 = vadd.f32 %v177_v33, %v137_v32  ;;  %v2728_v15 = vpop.xlane.xlu0 %175  ;;  %v2430_v32 = vmov 5  }
 0x135   :  { %2255 = vset.pattern.permute.xlu0 %v2430_v32 }
 0x136   :  { %v2124_v40 = vmul.f32 -1.442695, %v181_v34  ;;  %976 = vperm.xlu0 %2255, %v2514_v19   ;;  %v2732_v34 = vpop.permute.xlu1 %808 }
 0x138   :  { %2276 = vpow2.f32 %v2124_v40 }
 0x139   :  { %v2736_v41 = vpop.permute.xlu2 %938 }
 0x13a   :  { %3793 = vst [vmem:[#allocation19_spill] sm:$0xff] %v2736_v41 }
 0x13c   :  { %v2734_v40 = vpop.xlane.xlu0 %129 }
 0x13e   :  { %v2277_v50 = vpop.eup %2276  ;;  %2261 = vset.pattern.permute.xlu0 %v3747_v12 }
 0x13f   :  { %v197_v51 = vadd.f32 1.0, %v2277_v50 }
 0x141   :  { %2278 = vrcp.f32 %v197_v51  ;;  %v212_v35 = vand.u32 2147483648, %v197_v51  ;;  %vm206_vm3 = vweird.f32 %v197_v51  ;;  %v210_v42 = vand.u32 2147483647, %v197_v51 }
 0x143   :  { %vm211_vm5 = vcmp.eq.f32.partialorder %v210_v42, 8.507059e+37 }
 0x147   :  { %v2279_v54 = vpop.eup %2278 }
 0x148   :  { %v202_v56 = vmul.f32 %v2279_v54, %v197_v51  ;;  %vm207_vm2 = vweird.f32 %v2279_v54 }
 0x149   :  { %vm208_vm4 = vmor %vm206_vm3, %vm207_vm2  ;;  %vm312_vm3 = vcmask 1040384  }
 0x14a   :  { %v203_v18 = vsub.f32 1.0, %v202_v56 }
 0x14c   :  { %v204_v22 = vmul.f32 %v2279_v54, %v203_v18  ;;  %v2742_v18 = vpop.permute.xlu1 %858 }
 0x14d   :  { %960 = vrot.lane.b32.xlu1 %v959_v44, %s2427_s22  ;;  %v213_v44 = vor.u32 1.1754944e-38, %v212_v35 }
 0x14e   :  { %v205_v33 = vadd.f32 %v2279_v54, %v204_v22 }
 0x150   :  { %v209_v43 = vsel %vm208_vm4, %v2279_v54, %v205_v33 }
 0x151   :  { %v214_v50 = vsel %vm211_vm5, %v213_v44, %v209_v43 }
 0x155   :  { %986 = vperm.xlu1 %2256, %v2514_v19  }
 0x15d   :  { %2257 = vset.pattern.permute.xlu1 %v2428_v61  ;;  %v1308_v61 = vpop.xlane.xlu0 %1307 }
 0x15e   :  { %1002 = vperm.xlu1 %2257, %v2514_v19  }
 0x165   :  { %v1327_v32 = vpop.xlane.xlu0 %1326 }
 0x166   :  { %2258 = vset.pattern.permute.xlu1 %v2429_v25  ;;  %v170_v25 = vpop.xlane.xlu1 %169  ;;  %v1375_v54 = vmul.f32 %v1327_v32, %v2570_v4 }
 0x167   :  { %1018 = vperm.xlu1 %2258, %v2514_v19  }
 0x168   :  { %v1379_v43 = vsel %vm104_vm1, %v1375_v54, 0.0 }
 0x16d   :  { %v1333_v35 = vpop.xlane.xlu0 %1332 }
 0x16e   :  { %v133_v33 = vpop.xlane.xlu1 %132  ;;  %v1377_v44 = vmul.f32 %v1333_v35, %v2577_v10 }
 0x16f   :  { %2259 = vset.pattern.permute.xlu1 %v3747_v12 }
 0x170   :  { %263 = vperm.xlu1 %2259, %v214_v50  }
 0x172   :  { %v2740_v56 = vpop.xlane.xlu2 %135 }
 0x176   :  { %v2750_v47 = vpop.permute.xlu1 %906 }
 0x177   :  { %3794 = vst [vmem:[#allocation20_spill] sm:$0xff] %v2750_v47 }
 0x17a   :  { %v1311_v22 = vpop.xlane.xlu2 %1310 }
 0x17b   :  { %v1319_v35 = vmul.f32 0.00390625, %v1311_v22 }
 0x17d   :  { %v1335_v47 = vmul.f32 %v1319_v35, %v2570_v4 }
 0x182   :  { %v1324_v31 = vpop.xlane.xlu2 %1323 }
 0x183   :  { %v1374_v51 = vmul.f32 %v1324_v31, %v2557_v58  ;;  %v1383_v31 = vsel %vm104_vm1, %v1377_v44, 0.0 }
 0x185   :  { %v1378_v42 = vsel %vm104_vm1, %v1374_v51, 0.0  ;;  %v2754_v51 = vpop.permute.xlu1 %922 }
 0x186   :  { %v1380_v50 = vadd.f32 %v1379_v43, %v1378_v42  ;;  %v1318_v42 = vmul.f32 0.00390625, %v1308_v61 }
 0x18a   :  { %v1330_v12 = vpop.xlane.xlu2 %1329 }
 0x18b   :  { %v1376_v49 = vmul.f32 %v1330_v12, %v2565_v2 }
 0x18d   :  { %v1381_v63 = vsel %vm104_vm1, %v1376_v49, 0.0  ;;  %v1334_v49 = vmul.f32 %v1318_v42, %v2557_v58  ;;  %v2772_v42 = vld [vmem:[%s3741_s4 + $0x10] sm:$0xff] }
 0x18e   :  { %v1382_v37 = vadd.f32 %v1381_v63, %v1380_v50 }
 0x18f   :  { %v1338_v50 = vsel %vm104_vm1, %v1334_v49, 0.0 }
 0x190   :  { %v1384_v32 = vadd.f32 %v1383_v31, %v1382_v37 }
 0x192   :  { %v1385_v20 = vrot.slane %v1384_v32, 4 }
 0x194   :  { %v1386_v3 = vadd.f32 %v1385_v20, %v1384_v32  ;;  %v1339_v20 = vsel %vm104_vm1, %v1335_v47, 0.0 }
 0x195   :  { %v1340_v61 = vadd.f32 %v1339_v20, %v1338_v50 }
 0x196   :  { %v1387_v26 = vrot.slane %v1386_v3, 2 }
 0x198   :  { %v1388_v54 = vadd.f32 %v1387_v26, %v1386_v3 }
 0x19a   :  { %v1389_v14 = vrot.slane %v1388_v54, 1 }
 0x19c   :  { %v1390_v43 = vadd.f32 %v1389_v14, %v1388_v54 }
 0x19e   :  { %v1391_v12 = vadd.f32 %v1390_v43, %v2600_v48 }
 0x19f   :  { %v1314_v41 = vpop.xlane.xlu1 %1313 }
 0x1a0   :  { %v1320_v44 = vmul.f32 0.00390625, %v1314_v41  ;;  %v1392_v63 = vmax.f32 %v1391_v12, 0.0  ;;  %v139_v12 = vadd.f32 %v133_v33, %v2772_v42 }
 0x1a2   :  { %v1393_v37 = vperm.slane %v1392_v63, 0  ;;  %v1336_v26 = vmul.f32 %v1320_v44, %v2565_v2  ;;  %v2780_v44 = vld [vmem:[%s3741_s4 + $0x8] sm:$0xff] }
 0x1a3   :  { %v178_v20 = vadd.f32 %v170_v25, %v2780_v44 }
 0x1a4   :  { %v1394_v3 = vmul.f32 %v1393_v37, %v2607_v55  ;;  %v1341_v4 = vsel %vm104_vm1, %v1336_v26, 0.0  ;;  %v1396_v58 = vmul.f32 %v1393_v37, %v2622_v0 }
 0x1a5   :  { %v1342_v32 = vadd.f32 %v1341_v4, %v1340_v61 }
 0x1a6   :  { %v1398_v14 = vsel %vm104_vm1, %v1394_v3, 0.0  ;;  %v1404_v54 = vsel %vm104_vm1, %v1396_v58, 0.0  ;;  %v138_v3 = vadd.f32 %v2734_v40, %v2780_v44 }
 0x1a7   :  { %v1317_v22 = vpop.xlane.xlu1 %1316  ;;  %1399 = vadd.xlane.f32.xlu1 %v1398_v14 }
 0x1a8   :  { %v1321_v31 = vmul.f32 0.00390625, %v1317_v22  ;;  %v182_v61 = vadd.f32 %v178_v20, %v138_v3 }
 0x1aa   :  { %v1337_v41 = vmul.f32 %v1321_v31, %v2577_v10  ;;  %v179_v10 = vadd.f32 %v2700_v13, %v2772_v42  ;;  %v2125_v13 = vmul.f32 -1.442695, %v182_v61 }
 0x1ac   :  { %v1343_v47 = vsel %vm104_vm1, %v1337_v41, 0.0  ;;  %v183_v50 = vadd.f32 %v179_v10, %v139_v12 }
 0x1ad   :  { %v1344_v2 = vadd.f32 %v1343_v47, %v1342_v32 }
 0x1ae   :  { %v2126_v33 = vmul.f32 -1.442695, %v183_v50 }
 0x1af   :  { %v1345_v35 = vrot.slane %v1344_v2, 4  ;;  %1405 = vadd.xlane.f32.xlu1 %v1404_v54 }
 0x1b0   :  { %2280 = vpow2.f32 %v2126_v33 }
 0x1b1   :  { %v1346_v43 = vadd.f32 %v1345_v35, %v1344_v2  ;;  %2282 = vpow2.f32 %v2125_v13  ;;  %v1395_v2 = vmul.f32 %v1393_v37, %v2629_v6 }
 0x1b3   :  { %v1347_v49 = vrot.slane %v1346_v43, 2  ;;  %v1401_v10 = vsel %vm104_vm1, %v1395_v2, 0.0 }
 0x1b5   :  { %v1348_v63 = vadd.f32 %v1347_v49, %v1346_v43 }
 0x1b6   :  { %v2281_v47 = vpop.eup %2280 }
 0x1b7   :  { %v1349_v26 = vrot.slane %v1348_v63, 1  ;;  %v199_v40 = vadd.f32 1.0, %v2281_v47  ;;  %v2283_v35 = vpop.eup %2282 }
 0x1b8   :  { %v198_v12 = vadd.f32 1.0, %v2283_v35 }
 0x1b9   :  { %v1350_v14 = vadd.f32 %v1349_v26, %v1348_v63  ;;  %2284 = vrcp.f32 %v199_v40  ;;  %vm236_vm7 = vweird.f32 %v199_v40 }
 0x1ba   :  { %2286 = vrcp.f32 %v198_v12  ;;  %vm221_vm11 = vweird.f32 %v198_v12  ;;  %v225_v2 = vand.u32 2147483647, %v198_v12 }
 0x1bb   :  { %v1351_v22 = vadd.f32 %v1350_v14, %v2600_v48  ;;  %v2793_v48 = vld [vmem:[%s3741_s4 + $0x18] sm:$0xff]  ;;  %s2436_s4 = smov 48  }
 0x1bc   :  { %v180_v43 = vadd.f32 %v2728_v15, %v2793_v48  ;;  %vm226_vm13 = vcmp.eq.f32.partialorder %v225_v2, 8.507059e+37 }
 0x1bd   :  { %v1352_v4 = vmax.f32 %v1351_v22, 0.0 }
 0x1bf   :  { %v1353_v31 = vperm.slane %v1352_v4, 0  ;;  %v2285_v50 = vpop.eup %2284 }
 0x1c0   :  { %v232_v26 = vmul.f32 %v2285_v50, %v199_v40  ;;  %v2287_v3 = vpop.eup %2286  ;;  %vm237_vm6 = vweird.f32 %v2285_v50 }
 0x1c1   :  { %v1355_v58 = vmul.f32 %v1353_v31, %v2629_v6  ;;  %v1354_v41 = vmul.f32 %v1353_v31, %v2607_v55  ;;  %v1356_v54 = vmul.f32 %v1353_v31, %v2622_v0  ;;  %v140_v55 = vadd.f32 %v2740_v56, %v2793_v48  ;;  %vm238_vm8 = vmor %vm236_vm7, %vm237_vm6 }
 0x1c2   :  { %v1397_v0 = vmul.f32 %v1393_v37, %v2615_v60  ;;  %v1357_v6 = vmul.f32 %v1353_v31, %v2615_v60  ;;  %v233_v14 = vsub.f32 1.0, %v232_v26  ;;  %v217_v61 = vmul.f32 %v2287_v3, %v198_v12 }
 0x1c3   :  { %v1361_v25 = vsel %vm104_vm1, %v1355_v58, 0.0  ;;  %v1358_v32 = vsel %vm104_vm1, %v1354_v41, 0.0  ;;  %v1364_v49 = vsel %vm104_vm1, %v1356_v54, 0.0  ;;  %v184_v63 = vadd.f32 %v180_v43, %v140_v55 }
 0x1c4   :  { %1362 = vadd.xlane.f32.xlu0 %v1361_v25  ;;  %1359 = vadd.xlane.f32.xlu2 %v1358_v32  ;;  %v1407_v56 = vsel %vm104_vm1, %v1397_v0, 0.0  ;;  %v1367_v15 = vsel %vm104_vm1, %v1357_v6, 0.0  ;;  %v234_v22 = vmul.f32 %v2285_v50, %v233_v14  ;;  %v218_v4 = vsub.f32 1.0, %v217_v61  ;;  %v2813_v61 = vpop.permute.xlu0 %976 }
 0x1c5   :  { %v2127_v20 = vmul.f32 -1.442695, %v184_v63  ;;  %v2431_v37 = vmov 40   ;;  %v242_v58 = vand.u32 2147483648, %v199_v40  ;;  %v240_v41 = vand.u32 2147483647, %v199_v40 }
 0x1c6   :  { %2263 = vset.pattern.permute.xlu1 %v2431_v37  ;;  %v235_v60 = vadd.f32 %v2285_v50, %v234_v22  ;;  %v219_v31 = vmul.f32 %v2287_v3, %v218_v4  ;;  %vm222_vm9 = vweird.f32 %v2287_v3  ;;  %v227_v54 = vand.u32 2147483648, %v198_v12  ;;  %3796 = vst [vmem:[#allocation21_spill] sm:$0xff] %v2813_v61 }
 0x1c7   :  { %2288 = vpow2.f32 %v2127_v20  ;;  %v243_v47 = vor.u32 1.1754944e-38, %v242_v58  ;;  %vm241_vm10 = vcmp.eq.f32.partialorder %v240_v41, 8.507059e+37  ;;  %vm223_vm12 = vmor %vm221_vm11, %vm222_vm9  ;;  %v2432_v20 = vmov 33  }
 0x1c8   :  { %1050 = vperm.xlu1 %2263, %v2514_v19   ;;  %v239_v25 = vsel %vm238_vm8, %v2285_v50, %v235_v60  ;;  %v220_v32 = vadd.f32 %v2287_v3, %v219_v31  ;;  %v2433_v14 = vmov 47   ;;  %v2434_v37 = vmov 0.0  }
 0x1c9   :  { %v244_v55 = vsel %vm241_vm10, %v243_v47, %v239_v25  ;;  %47 = vst [vmem:[#allocation2] sm:$0x3] %v2434_v37 }
 0x1ca   :  { %v224_v43 = vsel %vm223_vm12, %v2287_v3, %v220_v32  ;;  %48 = vst [vmem:[#allocation2 + $0x6] sm:$0x3] %v2434_v37 }
 0x1cc   :  { %1365 = vadd.xlane.f32.xlu0 %v1364_v49  ;;  %1402 = vadd.xlane.f32.xlu2 %v1401_v10  ;;  %v3795_v49 = vmov 0   ;;  %v228_v10 = vor.u32 1.1754944e-38, %v227_v54 }
 0x1cd   :  { %v2289_v33 = vpop.eup %2288 }
 0x1ce   :  { %v200_v13 = vadd.f32 1.0, %v2289_v33  ;;  %v229_v40 = vsel %vm226_vm13, %v228_v10, %v224_v43  ;;  %v2815_v33 = vpop.permute.xlu1 %960  ;;  %v2316_v43 = vld [vmem:[#allocation4 + $0x10] sm:$0xff] }
 0x1cf   :  { %3797 = vst [vmem:[#allocation22_spill] sm:$0xff] %v2815_v33 }
 0x1d0   :  { %2290 = vrcp.f32 %v200_v13  ;;  %2267 = vset.pattern.permute.xlu1 %v3795_v49  ;;  %v257_v12 = vand.u32 2147483648, %v200_v13  ;;  %vm251_vm15 = vweird.f32 %v200_v13 }
 0x1d2   :  { %v258_v26 = vor.u32 1.1754944e-38, %v257_v12  ;;  %v2320_v12 = vld [vmem:[#allocation4 + $0x20] sm:$0xff] }
 0x1d4   :  { %1408 = vadd.xlane.f32.xlu0 %v1407_v56  ;;  %1368 = vadd.xlane.f32.xlu2 %v1367_v15  ;;  %v255_v56 = vand.u32 2147483647, %v200_v13 }
 0x1d6   :  { %v2291_v35 = vpop.eup %2290  ;;  %vm256_vm2 = vcmp.eq.f32.partialorder %v255_v56, 8.507059e+37 }
 0x1d7   :  { %v247_v63 = vmul.f32 %v2291_v35, %v200_v13  ;;  %vm252_vm14 = vweird.f32 %v2291_v35  ;;  %v2821_v13 = vpop.permute.xlu1 %986 }
 0x1d8   :  { %vm253_vm1 = vmor %vm251_vm15, %vm252_vm14  ;;  %3798 = vst [vmem:[#allocation23_spill] sm:$0xff] %v2821_v13 }
 0x1d9   :  { %v248_v0 = vsub.f32 1.0, %v247_v63  ;;  %v2317_v63 = vld [vmem:[#allocation4 + $0x18] sm:$0xff] }
 0x1db   :  { %v249_v6 = vmul.f32 %v2291_v35, %v248_v0 }
 0x1dd   :  { %v250_v50 = vadd.f32 %v2291_v35, %v249_v6  ;;  %v2318_v6 = vld [vmem:[#allocation4] sm:$0xff] }
 0x1df   :  { %v254_v15 = vsel %vm253_vm1, %v2291_v35, %v250_v50  ;;  %v2319_v50 = vld [vmem:[#allocation4 + $0x8] sm:$0xff] }
 0x1e0   :  { %v259_v3 = vsel %vm256_vm2, %v258_v26, %v254_v15  ;;  %v2321_v15 = vld [vmem:[#allocation4 + $0x28] sm:$0xff] }
 0x1e8   :  { %273 = vperm.xlu0 %2261, %v244_v55  }
 0x1ec   :  { %268 = vperm.xlu2 %2260, %v229_v40  }
 0x1f4   :  { %2262 = vset.pattern.permute.xlu2 %v2432_v20 }
 0x1f5   :  { %1034 = vperm.xlu2 %2262, %v2514_v19  }
 0x1fd   :  { %2264 = vset.pattern.permute.xlu2 %v3795_v49 }
 0x1fe   :  { %278 = vperm.xlu2 %2264, %v259_v3  }
 0x206   :  { %2265 = vset.pattern.permute.xlu2 %v2433_v14 }
 0x207   :  { %1066 = vperm.xlu2 %2265, %v2514_v19   ;;  %v2827_v19 = vpop.permute.xlu1 %1002 }
 0x208   :  { %3799 = vst [vmem:[#allocation24_spill] sm:$0xff] %v2827_v19 }
 0x20f   :  { %2266 = vset.pattern.permute.xlu2 %v3795_v49  ;;  %v2833_v54 = vpop.permute.xlu1 %1018 }
 0x210   :  { %3800 = vst [vmem:[#allocation25_spill] sm:$0xff] %v2833_v54 }
 0x217   :  { %v264_v55 = vpop.permute.xlu1 %263 }
 0x218   :  { %v2841_v20 = vmul.f32 %v2318_v6, %v264_v55 }
 0x21a   :  { %3803 = vst [vmem:[#allocation28_spill] sm:$0xff] %v2841_v20 }
 0x237   :  { %v2817_v22 = vpop.xlane.xlu0 %1362  ;;  %v2819_v4 = vpop.xlane.xlu2 %1359 }
 0x23f   :  { %v2823_v60 = vpop.xlane.xlu0 %1365  ;;  %v2825_v31 = vpop.xlane.xlu2 %1402 }
 0x247   :  { %v1409_v58 = vpop.xlane.xlu0 %1408  ;;  %v1369_v41 = vpop.xlane.xlu2 %1368 }
 0x248   :  { %v1413_v25 = vadd.f32 %v1409_v58, %v2793_v48  ;;  %v1373_v32 = vadd.f32 %v1369_v41, %v2793_v48  ;;  %v2843_v48 = vmul.f32 %v2319_v50, %v264_v55 }
 0x24a   :  { %v2831_v47 = vadd.f32 %v1413_v25, %v1373_v32  ;;  %3804 = vst [vmem:[#allocation29_spill] sm:$0xff] %v2843_v48  ;;  %v2322_v25 = vld [vmem:[#allocation4 + $0x30] sm:$0xff] }
 0x24f   :  { %v269_v2 = vpop.permute.xlu2 %268 }
 0x250   :  { %v2837_v10 = vmul.f32 %v2316_v43, %v269_v2  ;;  %v2839_v40 = vmul.f32 %v2317_v63, %v269_v2  ;;  %v2323_v2 = vld [vmem:[#allocation4 + $0x38] sm:$0xff] }
 0x252   :  { %3801 = vst [vmem:[#allocation26_spill] sm:$0xff] %v2837_v10  ;;  %v289_v3 = vadd.f32 %v2837_v10, %v2841_v20  ;;  %v298_v14 = vadd.f32 %v2839_v40, %v2843_v48 }
 0x253   :  { %3802 = vst [vmem:[#allocation27_spill] sm:$0xff] %v2839_v40 }
 0x257   :  { %v2835_v35 = vpop.permute.xlu2 %1034 }
 0x25a   :  { %v274_v0 = vpop.permute.xlu0 %273 }
 0x25b   :  { %v2845_v56 = vmul.f32 %v2320_v12, %v274_v0  ;;  %v2847_v26 = vmul.f32 %v2321_v15, %v274_v0 }
 0x25d   :  { %3805 = vst [vmem:[#allocation30_spill] sm:$0xff] %v2845_v56  ;;  %v290_v58 = vadd.f32 %v289_v3, %v2845_v56  ;;  %v299_v41 = vadd.f32 %v298_v14, %v2847_v26  ;;  %v321_v43 = vmax.f32 %v2841_v20, %v2845_v56  ;;  %v330_v63 = vmax.f32 %v2843_v48, %v2847_v26 }
 0x25e   :  { %3806 = vst [vmem:[#allocation31_spill] sm:$0xff] %v2847_v26 }
 0x25f   :  { %v279_v37 = vpop.permute.xlu2 %278 }
 0x260   :  { %v2855_v32 = vmul.f32 %v2322_v25, %v279_v37  ;;  %v2857_v55 = vmul.f32 %v2323_v2, %v279_v37 }
 0x262   :  { %3807 = vst [vmem:[#allocation32_spill] sm:$0xff] %v2855_v32  ;;  %v291_v0 = vadd.f32 %v290_v58, %v2855_v32  ;;  %v300_v6 = vadd.f32 %v299_v41, %v2857_v55  ;;  %v322_v50 = vmax.f32 %v2837_v10, %v2855_v32  ;;  %v331_v12 = vmax.f32 %v2839_v40, %v2857_v55 }
 0x263   :  { %3808 = vst [vmem:[#allocation33_spill] sm:$0xff] %v2857_v55  ;;  %v315_v40 = vlaneseq }
 0x264   :  { %v292_v15 = vrot.slane %v291_v0, 4  ;;  %v301_v3 = vrot.slane %v300_v6, 4  ;;  %v323_v14 = vmax.f32 %v321_v43, %v322_v50  ;;  %v332_v37 = vmax.f32 %v330_v63, %v331_v12 }
 0x265   :  { %vm2869_vm4 = vcmp.lt.s32.totalorder %v315_v40, 256 }
 0x266   :  { %v293_v25 = vadd.f32 %v292_v15, %v291_v0  ;;  %v302_v2 = vadd.f32 %v301_v3, %v300_v6  ;;  %v324_v56 = vrot.slane %v323_v14, 4  ;;  %v333_v20 = vrot.slane %v332_v37, 4 }
 0x268   :  { %v294_v49 = vrot.slane %v293_v25, 2  ;;  %v303_v26 = vrot.slane %v302_v2, 2  ;;  %v325_v48 = vmax.f32 %v323_v14, %v324_v56  ;;  %v334_v58 = vmax.f32 %v332_v37, %v333_v20 }
 0x26a   :  { %v295_v61 = vadd.f32 %v294_v49, %v293_v25  ;;  %v304_v41 = vadd.f32 %v303_v26, %v302_v2  ;;  %v326_v33 = vrot.slane %v325_v48, 2  ;;  %v335_v19 = vrot.slane %v334_v58, 2 }
 0x26c   :  { %v296_v32 = vrot.slane %v295_v61, 1  ;;  %v305_v10 = vrot.slane %v304_v41, 1  ;;  %v327_v13 = vmax.f32 %v325_v48, %v326_v33  ;;  %v336_v55 = vmax.f32 %v334_v58, %v335_v19 }
 0x26e   :  { %v297_v54 = vadd.f32 %v296_v32, %v295_v61  ;;  %v306_v43 = vadd.f32 %v305_v10, %v304_v41  ;;  %v328_v63 = vrot.slane %v327_v13, 1  ;;  %v337_v0 = vrot.slane %v336_v55, 1 }
 0x26f   :  { %v2435_v61 = vmov 269488144  }
 0x270   :  { %v308_v6 = vmul.f32 0.03125, %v306_v43  ;;  %v338_v50 = vmax.f32 %v336_v55, %v337_v0  ;;  %v307_v49 = vmul.f32 0.03125, %v297_v54  ;;  %v329_v56 = vmax.f32 %v327_v13, %v328_v63 }
 0x271   :  { %v352_v19 = vunpack.c.l.s4 %v2435_v61 }
 0x272   :  { %v311_v20 = vrot.slane %v308_v6, 7  ;;  %v341_v26 = vrot.slane %v338_v50, 7 }
 0x273   :  { %v2879_v10 = vunpack.c.0.s8 %v352_v19 }
 0x274   :  { %v313_v15 = vsel %vm312_vm3, %v307_v49, %v311_v20  ;;  %v342_v33 = vsel %vm312_vm3, %v329_v56, %v341_v26 }
 0x275   :  { %320 = vst.msk [vmem:[#allocation2 + $0x2] ss:$2 sm:$0x3] %vm2869_vm4, %v313_v15  ;;  %v2883_v54 = vperm.slane %v2666_v36, %v2879_v10  ;;  %v2887_v13 = vperm.slane %v2656_v28, %v2879_v10  ;;  %v2891_v40 = vperm.slane %v2633_v11, %v2879_v10  ;;  %v2908_v11 = vperm.slane %v2658_v29, %v2879_v10 }
 0x276   :  { %345 = vst.msk [vmem:[#allocation2 + $0x3] ss:$2 sm:$0x3] %vm2869_vm4, %v342_v33  ;;  %v2912_v28 = vperm.slane %v2674_v45, %v2879_v10  ;;  %v2916_v14 = vperm.slane %v2638_v16, %v2879_v10  ;;  %v2929_v16 = vperm.slane %v2686_v62, %v2879_v10  ;;  %v2933_v29 = vperm.slane %v2670_v38, %v2879_v10 }
 0x277   :  { %3811 = vst [vmem:[#allocation34_spill] sm:$0xff] %v2883_v54  ;;  %v2937_v45 = vperm.slane %v2640_v17, %v2879_v10  ;;  %v2950_v17 = vperm.slane %v2680_v53, %v2879_v10  ;;  %v2954_v38 = vperm.slane %v2704_v21, %v2879_v10  ;;  %v2958_v62 = vperm.slane %v2649_v24, %v2879_v10  ;;  %v1400_v24 = vpop.xlane.xlu1 %1399 }
 0x278   :  { %3812 = vst [vmem:[#allocation35_spill] sm:$0xff] %v2887_v13  ;;  %v1370_v53 = vadd.f32 %v2819_v4, %v2709_v23  ;;  %v2973_v21 = vperm.slane %v2684_v59, %v2879_v10  ;;  %v2977_v50 = vperm.slane %v2722_v52, %v2879_v10  ;;  %v1410_v49 = vadd.f32 %v1400_v24, %v2709_v23 }
 0x279   :  { %3813 = vst [vmem:[#allocation36_spill] sm:$0xff] %v2891_v40  ;;  %v2982_v20 = vperm.slane %v2654_v27, %v2879_v10  ;;  %v2995_v27 = vperm.slane %v2698_v9, %v2879_v10  ;;  %v2999_v52 = vperm.slane %v2732_v34, %v2879_v10  ;;  %v3003_v15 = vperm.slane %v2660_v30, %v2879_v10 }
 0x27a   :  { %3814 = vst [vmem:[#allocation37_spill] sm:$0xff] %v2908_v11  ;;  %v1414_v56 = vadd.f32 %v1410_v49, %v1370_v53  ;;  %v1372_v30 = vadd.f32 %v2823_v60, %v2772_v42  ;;  %v1371_v53 = vadd.f32 %v2817_v22, %v2780_v44  ;;  %v3072_v24 = vperm.slane %v2835_v35, %v2879_v10 }
 0x27b   :  { %3815 = vst [vmem:[#allocation38_spill] sm:$0xff] %v2916_v14 }
 0x27c   :  { %3816 = vst [vmem:[#allocation39_spill] sm:$0xff] %v2937_v45  ;;  %v2135_v23 = vmul.f32 -1.442695, %v1414_v56 }
 0x27d   :  { %v2893_v48 = vld [vmem:[#allocation2] sm:$0x3f] }
 0x27e   :  { %v2895_v32 = vld [vmem:[#allocation2 + $0x2] sm:$0x3f]  ;;  %v400_v3 = vmul.f32 %v2887_v13, %v2893_v48  ;;  %v366_v36 = vmul.f32 %v2891_v40, %v2893_v48  ;;  %v494_v37 = vmul.f32 %v2912_v28, %v2893_v48  ;;  %v383_v2 = vmul.f32 %v2916_v14, %v2893_v48 }
 0x27f   :  { %v435_v55 = vmul.f32 %v2883_v54, %v2895_v32  ;;  %v418_v25 = vmul.f32 %v2908_v11, %v2895_v32  ;;  %v558_v58 = vmul.f32 %v2929_v16, %v2895_v32  ;;  %v526_v41 = vmul.f32 %v2933_v29, %v2893_v48  ;;  %v1406_v9 = vpop.xlane.xlu1 %1405  ;;  %v3831_v54 = vld [vmem:[#allocation10_spill] sm:$0xff] }
 0x280   :  { %402 = vrot.lane.b32.xlu2 %v400_v3, %s2437_s1  ;;  %368 = vrot.lane.b32.xlu1 %v366_v36, %s2438_s30  ;;  %v452_v43 = vmul.f32 %v2937_v45, %v2895_v32  ;;  %v654_v63 = vmul.f32 %v2954_v38, %v2893_v48  ;;  %v542_v0 = vmul.f32 %v2950_v17, %v2895_v32  ;;  %2292 = vpow2.f32 %v2135_v23 }
 0x281   :  { %437 = vrot.lane.b32.xlu0 %v435_v55, %s2436_s4  ;;  %v510_v6 = vmul.f32 %v2958_v62, %v2893_v48  ;;  %v750_v26 = vmul.f32 %v2977_v50, %v2893_v48  ;;  %v622_v4 = vmul.f32 %v2973_v21, %v2893_v48  ;;  %v574_v59 = vmul.f32 %v2982_v20, %v2895_v32 }
 0x282   :  { %v815_v33 = vmul.f32 %v2999_v52, %v2895_v32  ;;  %v638_v61 = vmul.f32 %v2995_v27, %v2893_v48  ;;  %v670_v19 = vmul.f32 %v3003_v15, %v2895_v32  ;;  %v3018_v55 = vperm.slane %v2690_v1, %v2879_v10 }
 0x283   :  { %v3022_v3 = vperm.slane %v2742_v18, %v2879_v10  ;;  %v3026_v36 = vperm.slane %v2676_v46, %v2879_v10  ;;  %v3043_v18 = vperm.slane %v2716_v39, %v2879_v10  ;;  %v3223_v11 = vperm.slane %v3831_v54, %v2879_v10 }
 0x284   :  { %v686_v60 = vmul.f32 %v3018_v55, %v2895_v32  ;;  %v2447_v14 = vmov 20  }
 0x286   :  { %v2293_v34 = vpop.eup %2292 }
 0x288   :  { %420 = vrot.lane.b32.xlu2 %v418_v25, %s2439_s9  ;;  %385 = vrot.lane.b32.xlu1 %v383_v2, %s2440_s0  ;;  %v865_v25 = vmul.f32 %v3022_v3, %v2893_v48  ;;  %v3033_v2 = vadd.f32 1.0, %v2293_v34 }
 0x289   :  { %496 = vrot.lane.b32.xlu0 %v494_v37, %s2438_s30  ;;  %v1412_v37 = vadd.f32 %v1406_v9, %v2772_v42  ;;  %v3047_v42 = vperm.slane %v2754_v51, %v2879_v10  ;;  %v774_v51 = vld [vmem:[#allocation2 + $0x2] sm:$0xf] }
 0x28a   :  { %2294 = vrcp.f32 %v3033_v2  ;;  %vm1439_vm6 = vweird.f32 %v3033_v2 }
 0x28b   :  { %v1416_v1 = vadd.f32 %v1412_v37, %v1372_v30 }
 0x28d   :  { %v2137_v46 = vmul.f32 -1.442695, %v1416_v1  ;;  %v2138_v1 = vmul.f32 -1.442695, %v2831_v47 }
 0x28f   :  { %2296 = vpow2.f32 %v2137_v46 }
 0x290   :  { %528 = vrot.lane.b32.xlu2 %v526_v41, %s2437_s1  ;;  %454 = vrot.lane.b32.xlu1 %v452_v43, %s2441_s2  ;;  %v3051_v41 = vperm.slane %v2682_v57, %v2879_v10  ;;  %v929_v43 = vmul.f32 %v3047_v42, %v2895_v32  ;;  %v2295_v39 = vpop.eup %2294  ;;  %v1411_v57 = vadd.f32 %v2825_v31, %v2780_v44 }
 0x291   :  { %560 = vrot.lane.b32.xlu0 %v558_v58, %s2436_s4  ;;  %v766_v58 = vmul.f32 %v3026_v36, %v2893_v48  ;;  %v1435_v49 = vmul.f32 %v2295_v39, %v3033_v2  ;;  %vm1440_vm5 = vweird.f32 %v2295_v39 }
 0x292   :  { %v1415_v31 = vadd.f32 %v1411_v57, %v1371_v53  ;;  %vm1441_vm7 = vmor %vm1439_vm6, %vm1440_vm5  ;;  %v3821_v57 = vld [vmem:[#allocation25_spill] sm:$0xff] }
 0x293   :  { %v1436_v35 = vsub.f32 1.0, %v1435_v49 }
 0x295   :  { %v2297_v56 = vpop.eup %2296 }
 0x296   :  { %v3084_v22 = vadd.f32 1.0, %v2297_v56 }
 0x298   :  { %544 = vrot.lane.b32.xlu2 %v542_v0, %s2439_s9  ;;  %512 = vrot.lane.b32.xlu1 %v510_v6, %s2440_s0  ;;  %v831_v0 = vmul.f32 %v3051_v41, %v2895_v32  ;;  %v3066_v6 = vperm.slane %v2694_v5, %v2879_v10  ;;  %2298 = vrcp.f32 %v3084_v22  ;;  %vm1469_vm10 = vweird.f32 %v3084_v22 }
 0x299   :  { %656 = vrot.lane.b32.xlu0 %v654_v63, %s2437_s1  ;;  %v702_v63 = vmul.f32 %v3043_v18, %v2895_v32 }
 0x29a   :  { %v783_v5 = vmul.f32 %v3066_v6, %v774_v51  ;;  %v3120_v51 = vperm.slane %v3821_v57, %v2879_v10 }
 0x2a0   :  { %624 = vrot.lane.b32.xlu2 %v622_v4, %s2438_s30  ;;  %576 = vrot.lane.b32.xlu1 %v574_v59, %s2441_s2  ;;  %v1041_v4 = vmul.f32 %v3072_v24, %v2895_v32  ;;  %v1051_v59 = vpop.permute.xlu1 %1050 }
 0x2a1   :  { %752 = vrot.lane.b32.xlu0 %v750_v26, %s2438_s30  ;;  %v3077_v26 = vperm.slane %v2696_v7, %v2879_v10  ;;  %v2136_v7 = vmul.f32 -1.442695, %v1415_v31  ;;  %v3090_v23 = vperm.slane %v1051_v59, %v2879_v10  ;;  %v1025_v31 = vmul.f32 %v3120_v51, %v2895_v32 }
 0x2a3   :  { %v881_v44 = vmul.f32 %v3077_v26, %v2893_v48  ;;  %3817 = vst [vmem:[#allocation40_spill] sm:$0xff] %v3090_v23  ;;  %2300 = vpow2.f32 %v2136_v7  ;;  %v1057_v30 = vmul.f32 %v3090_v23, %v2895_v32 }
 0x2a4   :  { %2302 = vpow2.f32 %v2138_v1  ;;  %v1473_v1 = vand.u32 2147483647, %v3084_v22 }
 0x2a6   :  { %vm1474_vm12 = vcmp.eq.f32.partialorder %v1473_v1, 8.507059e+37 }
 0x2a8   :  { %640 = vrot.lane.b32.xlu2 %v638_v61, %s2440_s0  ;;  %672 = vrot.lane.b32.xlu1 %v670_v19, %s2439_s9  ;;  %v1437_v61 = vmul.f32 %v2295_v39, %v1436_v35  ;;  %v3818_v19 = vld [vmem:[#allocation19_spill] sm:$0xff] }
 0x2a9   :  { %817 = vrot.lane.b32.xlu0 %v815_v33, %s2436_s4  ;;  %v3094_v33 = vperm.slane %v2726_v8, %v2879_v10  ;;  %v3099_v9 = vperm.slane %v3818_v19, %v2879_v10 }
 0x2aa   :  { %v1438_v8 = vadd.f32 %v2295_v39, %v1437_v61 }
 0x2ab   :  { %3819 = vst [vmem:[#allocation19_spill] sm:$0xff] %v3099_v9  ;;  %v799_v34 = vmul.f32 %v3094_v33, %v2895_v32  ;;  %v945_v37 = vmul.f32 %v3099_v9, %v2895_v32 }
 0x2b0   :  { %688 = vrot.lane.b32.xlu2 %v686_v60, %s2436_s4  ;;  %768 = vrot.lane.b32.xlu1 %v766_v58, %s2440_s0  ;;  %v2299_v60 = vpop.eup %2298  ;;  %v1443_v58 = vand.u32 2147483647, %v3033_v2 }
 0x2b1   :  { %867 = vrot.lane.b32.xlu0 %v865_v25, %s2438_s30  ;;  %v1445_v25 = vand.u32 2147483648, %v3033_v2  ;;  %v2301_v46 = vpop.eup %2300  ;;  %v1465_v49 = vmul.f32 %v2299_v60, %v3084_v22  ;;  %vm1470_vm9 = vweird.f32 %v2299_v60 }
 0x2b2   :  { %vm1444_vm8 = vcmp.eq.f32.partialorder %v1443_v58, 8.507059e+37  ;;  %v3125_v2 = vadd.f32 1.0, %v2301_v46  ;;  %v2303_v59 = vpop.eup %2302  ;;  %v2131_v58 = vld [vmem:[%s3742_s5 + $0x5] ss:$8 sm:$0x3]  ;;  %v3824_v46 = vld [vmem:[#allocation23_spill] sm:$0xff]  ;;  %vm1471_vm11 = vmor %vm1469_vm10, %vm1470_vm9 }
 0x2b3   :  { %v1446_v53 = vor.u32 1.1754944e-38, %v1445_v25  ;;  %v3141_v19 = vadd.f32 1.0, %v2303_v59  ;;  %v1475_v25 = vand.u32 2147483648, %v3084_v22  ;;  %vm388_vm9 = vcmask 785408  }
 0x2b4   :  { %2304 = vrcp.f32 %v3125_v2  ;;  %vm1454_vm14 = vweird.f32 %v3125_v2  ;;  %vm405_vm10 = vcmask 654336  }
 0x2b5   :  { %2306 = vrcp.f32 %v3141_v19  ;;  %vm1484_vm5 = vweird.f32 %v3141_v19 }
 0x2b8   :  { %704 = vrot.lane.b32.xlu2 %v702_v63, %s2441_s2  ;;  %833 = vrot.lane.b32.xlu1 %v831_v0, %s2441_s2  ;;  %v1442_v0 = vsel %vm1441_vm7, %v2295_v39, %v1438_v8  ;;  %v1466_v39 = vsub.f32 1.0, %v1465_v49  ;;  %v1476_v49 = vor.u32 1.1754944e-38, %v1475_v25 }
 0x2b9   :  { %931 = vrot.lane.b32.xlu0 %v929_v43, %s2436_s4  ;;  %v3820_v43 = vld [vmem:[#allocation17_spill] sm:$0xff]  ;;  %v1447_v56 = vsel %vm1444_vm8, %v1446_v53, %v1442_v0  ;;  %vm371_vm8 = vcmask 916480  }
 0x2ba   :  { %v3116_v63 = vperm.slane %v3820_v43, %v2879_v10  ;;  %v1467_v7 = vmul.f32 %v2299_v60, %v1466_v39  ;;  %v3158_v43 = vperm.slane %v3824_v46, %v2879_v10  ;;  %v1084_v39 = vperm.slane %v2131_v58, 0 }
 0x2bc   :  { %v897_v47 = vmul.f32 %v3116_v63, %v2895_v32  ;;  %v993_v53 = vmul.f32 %v3158_v43, %v2893_v48 }
 0x2c0   :  { %785 = vrot.lane.b32.xlu2 %v783_v5, %s2437_s1  ;;  %883 = vrot.lane.b32.xlu1 %v881_v44, %s2440_s0  ;;  %v3823_v44 = vld [vmem:[#allocation20_spill] sm:$0xff] }
 0x2c1   :  { %1043 = vrot.lane.b32.xlu0 %v1041_v4, %s2439_s9  ;;  %v1067_v4 = vpop.permute.xlu2 %1066  ;;  %v3137_v35 = vperm.slane %v3823_v44, %v2879_v10  ;;  %v3825_v44 = vld [vmem:[#allocation24_spill] sm:$0xff] }
 0x2c2   :  { %v3133_v5 = vperm.slane %v1067_v4, %v2879_v10  ;;  %3832 = vst [vmem:[#allocation24_spill] sm:$0xff] %v3223_v11 }
 0x2c3   :  { %v913_v61 = vmul.f32 %v3137_v35, %v2895_v32 }
 0x2c4   :  { %3822 = vst [vmem:[#allocation17_spill] sm:$0xff] %v3133_v5 }
 0x2c8   :  { %801 = vrot.lane.b32.xlu2 %v799_v34, %s2439_s9  ;;  %947 = vrot.lane.b32.xlu1 %v945_v37, %s2441_s2  ;;  %v2305_v34 = vpop.eup %2304  ;;  %v1468_v37 = vadd.f32 %v2299_v60, %v1467_v7  ;;  %v3168_v7 = vperm.slane %v3825_v44, %v2879_v10 }
 0x2c9   :  { %1059 = vrot.lane.b32.xlu0 %v1057_v30, %s2436_s4  ;;  %v1073_v30 = vmul.f32 %v3133_v5, %v2895_v32  ;;  %v1450_v0 = vmul.f32 %v2305_v34, %v3125_v2  ;;  %vm1455_vm13 = vweird.f32 %v2305_v34 }
 0x2ca   :  { %v1472_v57 = vsel %vm1471_vm11, %v2299_v60, %v1468_v37  ;;  %vm1456_vm15 = vmor %vm1454_vm14, %vm1455_vm13  ;;  %vm423_vm11 = vcmask 523264   ;;  %vm457_vm13 = vcmask 261120   ;;  %vm963_vm14 = vcmask 662528  }
 0x2cb   :  { %v1477_v22 = vsel %vm1474_vm12, %v1476_v49, %v1472_v57  ;;  %v1458_v57 = vand.u32 2147483647, %v3125_v2  ;;  %vm440_vm12 = vcmask 392192  }
 0x2cd   :  { %vm1459_vm1 = vcmp.eq.f32.partialorder %v1458_v57, 8.507059e+37 }
 0x2d0   :  { %899 = vrot.lane.b32.xlu2 %v897_v47, %s2437_s1  ;;  %1027 = vrot.lane.b32.xlu1 %v1025_v31, %s2437_s1  ;;  %v1085_v47 = vperm.slane %v2131_v58, 1  ;;  %v2307_v31 = vpop.eup %2306  ;;  %v1460_v58 = vand.u32 2147483648, %v3125_v2 }
 0x2d1   :  { %1496 = vperm.xlu0 %2261, %v1447_v56   ;;  %v1451_v56 = vsub.f32 1.0, %v1450_v0  ;;  %v2443_v0 = vmov 13   ;;  %vm1485_vm2 = vweird.f32 %v2307_v31 }
 0x2d2   :  { %v1086_v59 = vrot.slane %v1085_v47, 6  ;;  %v1461_v47 = vor.u32 1.1754944e-38, %v1460_v58  ;;  %vm1486_vm6 = vmor %vm1484_vm5, %vm1485_vm2  ;;  %vm728_vm2 = vcmask 1031168   ;;  %vm843_vm5 = vcmask 1022976  }
 0x2d3   :  { %v1452_v60 = vmul.f32 %v2305_v34, %v1451_v56 }
 0x2d4   :  { %v1087_v37 = vsel %vm466_vm0, %v1084_v39, %v1086_v59  ;;  %v3184_v39 = vld [vmem:[%s3743_s6] sm:$0x3]  ;;  %v1490_v59 = vand.u32 2147483648, %v3141_v19  ;;  %s2111_s6 = sshll.u32 %s3745_s8, 4  ;;  %s2112_s6 = int_to_ptr.hbm [resolvable:$true] %s2111_s6 }
 0x2d5   :  { %v1453_v25 = vadd.f32 %v2305_v34, %v1452_v60 }
 0x2d8   :  { %915 = vrot.lane.b32.xlu2 %v913_v61, %s2439_s9  ;;  %1075 = vrot.lane.b32.xlu1 %v1073_v30, %s2441_s2  ;;  %v1480_v61 = vmul.f32 %v2307_v31, %v3141_v19  ;;  %v1009_v30 = vmul.f32 %v3168_v7, %v2893_v48 }
 0x2da   :  { %v3147_v8 = vpop.permute.xlu2 %402  ;;  %v1481_v1 = vsub.f32 1.0, %v1480_v61 }
 0x2dc   :  { %v1482_v49 = vmul.f32 %v2307_v31, %v1481_v1  ;;  %v3826_v1 = vld [vmem:[#allocation11_spill] sm:$0xff] }
 0x2dd   :  { %v3194_v58 = vperm.slane %v3826_v1, %v2879_v10 }
 0x2de   :  { %v1483_v56 = vadd.f32 %v2307_v31, %v1482_v49 }
 0x2df   :  { %3827 = vst [vmem:[#allocation25_spill] sm:$0xff] %v3194_v58 }
 0x2e0   :  { %995 = vrot.lane.b32.xlu2 %v993_v53, %s2438_s30  ;;  %1506 = vperm.xlu1 %2267, %v1477_v22   ;;  %v1457_v53 = vsel %vm1456_vm15, %v2305_v34, %v1453_v25  ;;  %v1488_v34 = vand.u32 2147483647, %v3141_v19  ;;  %v1487_v61 = vsel %vm1486_vm6, %v2307_v31, %v1483_v56  ;;  %v356_v31 = vmul.f32 %v3194_v58, %v2893_v48 }
 0x2e1   :  { %v1462_v22 = vsel %vm1459_vm1, %v1461_v47, %v1457_v53  ;;  %v404_v47 = vrot.slane %v3147_v8, 2  ;;  %vm1091_vm15 = vcmask 670720   ;;  %vm600_vm1 = vcmask 1039360  }
 0x2e2   :  { %v3164_v4 = vpop.permute.xlu2 %420  ;;  %vm1489_vm7 = vcmp.eq.f32.partialorder %v1488_v34, 8.507059e+37  ;;  %vm971_vm6 = vcmask 1014784  }
 0x2e3   :  { %v422_v34 = vrot.slane %v3164_v4, 6 }
 0x2e8   :  { %1011 = vrot.lane.b32.xlu2 %v1009_v30, %s2440_s0  ;;  %1088 = vrot.lane.b32.xlu1 %v1087_v37, %s2442_s14  ;;  %v1491_v30 = vor.u32 1.1754944e-38, %v1490_v59 }
 0x2e9   :  { %2269 = vset.pattern.permute.xlu1 %v2443_v0  ;;  %v2444_v0 = vmov 27  }
 0x2ea   :  { %v3177_v46 = vpop.permute.xlu2 %528  ;;  %v1492_v25 = vsel %vm1489_vm7, %v1491_v30, %v1487_v61  ;;  %v3828_v30 = vld [vmem:[#allocation16_spill] sm:$0xff]  ;;  %vm1099_vm7 = vcmask 1006592  }
 0x2f0   :  { %1501 = vperm.xlu2 %2266, %v1462_v22   ;;  %1114 = vperm.xlu1 %2269, %v3184_v39  }
 0x2f2   :  { %v3188_v2 = vpop.permute.xlu2 %544  ;;  %v369_v60 = vpop.permute.xlu1 %368 }
 0x2f3   :  { %v438_v44 = vpop.permute.xlu0 %437  ;;  %v370_v37 = vrot.slane %v369_v60, 2 }
 0x2f4   :  { %v439_v1 = vrot.slane %v438_v44, 6 }
 0x2f5   :  { %v372_v57 = vsel %vm371_vm8, %v369_v60, %v370_v37  ;;  %v3205_v37 = vperm.slane %v3828_v30, %v2879_v10 }
 0x2f6   :  { %v374_v56 = vadd.f32 %v372_v57, %v356_v31 }
 0x2f7   :  { %3829 = vst [vmem:[#allocation20_spill] sm:$0xff] %v3205_v37 }
 0x2f8   :  { %1511 = vperm.xlu2 %2266, %v1492_v25   ;;  %2271 = vset.pattern.permute.xlu1 %v2444_v0  ;;  %v406_v25 = vsel %vm405_vm10, %v3147_v8, %v404_v47  ;;  %v2445_v0 = vmov 6  }
 0x2f9   :  { %1146 = vperm.xlu1 %2271, %v3184_v39  }
 0x2fa   :  { %v625_v53 = vpop.permute.xlu2 %624  ;;  %v386_v49 = vpop.permute.xlu1 %385 }
 0x2fb   :  { %v497_v19 = vpop.permute.xlu0 %496  ;;  %v387_v22 = vrot.slane %v386_v49, 2  ;;  %v626_v59 = vrot.slane %v625_v53, 2 }
 0x2fd   :  { %v389_v61 = vsel %vm388_vm9, %v386_v49, %v387_v22  ;;  %v627_v57 = vsel %vm371_vm8, %v625_v53, %v626_v59  ;;  %v424_v49 = vsel %vm423_vm11, %v422_v34, %v3164_v4  ;;  %v612_v22 = vmul.f32 %v3205_v37, %v2893_v48 }
 0x2fe   :  { %v391_v60 = vadd.f32 %v389_v61, %v374_v56  ;;  %v2446_v56 = vmov 48   ;;  %v441_v53 = vsel %vm440_vm12, %v439_v1, %v438_v44  ;;  %v498_v34 = vrot.slane %v497_v19, 2 }
 0x2ff   :  { %v629_v59 = vadd.f32 %v627_v57, %v612_v22  ;;  %v484_v57 = vmul.f32 %v3223_v11, %v2893_v48 }
 0x300   :  { %2268 = vset.pattern.permute.xlu2 %v2445_v0  ;;  %v408_v31 = vadd.f32 %v406_v25, %v391_v60 }
 0x301   :  { %1104 = vperm.xlu2 %2268, %v3184_v39   ;;  %2274 = vset.pattern.permute.xlu1 %v2446_v56 }
 0x302   :  { %v641_v30 = vpop.permute.xlu2 %640  ;;  %1194 = vperm.xlu1 %2274, %v3184_v39   ;;  %v455_v47 = vpop.permute.xlu1 %454  ;;  %v426_v0 = vadd.f32 %v424_v49, %v408_v31  ;;  %v499_v31 = vsel %vm371_vm8, %v497_v19, %v498_v34  ;;  %v2448_v34 = vmov 41  }
 0x303   :  { %v561_v61 = vpop.permute.xlu0 %560  ;;  %v642_v8 = vrot.slane %v641_v30, 2  ;;  %v456_v60 = vrot.slane %v455_v47, 6 }
 0x304   :  { %v443_v4 = vadd.f32 %v441_v53, %v426_v0 }
 0x305   :  { %v643_v25 = vsel %vm388_vm9, %v641_v30, %v642_v8  ;;  %v458_v37 = vsel %vm457_vm13, %v456_v60, %v455_v47  ;;  %v501_v8 = vadd.f32 %v499_v31, %v484_v57  ;;  %v546_v47 = vrot.slane %v3188_v2, 6 }
 0x306   :  { %v645_v58 = vadd.f32 %v643_v25, %v629_v59  ;;  %v3219_v56 = vadd.f32 %v458_v37, %v443_v4  ;;  %v530_v37 = vrot.slane %v3177_v46, 2  ;;  %v562_v59 = vrot.slane %v561_v61, 6 }
 0x307   :  { %v547_v25 = vsel %vm423_vm11, %v546_v47, %v3188_v2 }
 0x308   :  { %3830 = vst [vmem:[#allocation23_spill] sm:$0xff] %v3219_v56  ;;  %v531_v53 = vsel %vm405_vm10, %v3177_v46, %v530_v37 }
 0x309   :  { %2270 = vset.pattern.permute.xlu2 %v2447_v14 }
 0x30a   :  { %1130 = vperm.xlu2 %2270, %v3184_v39   ;;  %v689_v1 = vpop.permute.xlu2 %688  ;;  %v513_v22 = vpop.permute.xlu1 %512 }
 0x30b   :  { %v657_v44 = vpop.permute.xlu0 %656  ;;  %v514_v30 = vrot.slane %v513_v22, 2 }
 0x30c   :  { %v658_v49 = vrot.slane %v657_v44, 2 }
 0x30d   :  { %v515_v19 = vsel %vm388_vm9, %v513_v22, %v514_v30 }
 0x30e   :  { %v659_v54 = vsel %vm405_vm10, %v657_v44, %v658_v49  ;;  %v517_v0 = vadd.f32 %v515_v19, %v501_v8 }
 0x30f   :  { %v661_v14 = vadd.f32 %v659_v54, %v645_v58  ;;  %v563_v58 = vsel %vm440_vm12, %v562_v59, %v561_v61  ;;  %v690_v54 = vrot.slane %v689_v1, 6  ;;  %v3833_v61 = vld [vmem:[#allocation13_spill] sm:$0xff] }
 0x310   :  { %v533_v60 = vadd.f32 %v531_v53, %v517_v0  ;;  %v3246_v59 = vperm.slane %v3833_v61, %v2879_v10 }
 0x312   :  { %2273 = vset.pattern.permute.xlu2 %v2448_v34  ;;  %v705_v31 = vpop.permute.xlu2 %704  ;;  %v549_v57 = vadd.f32 %v547_v25, %v533_v60  ;;  %v577_v44 = vpop.permute.xlu1 %576  ;;  %v691_v25 = vsel %vm440_vm12, %v690_v54, %v689_v1  ;;  %3834 = vst [vmem:[#allocation11_spill] sm:$0xff] %v3246_v59 }
 0x313   :  { %v753_v4 = vpop.permute.xlu0 %752  ;;  %1178 = vperm.xlu2 %2273, %v3184_v39   ;;  %v578_v49 = vrot.slane %v577_v44, 6  ;;  %v706_v0 = vrot.slane %v705_v31, 6 }
 0x314   :  { %v565_v22 = vadd.f32 %v563_v58, %v549_v57  ;;  %v754_v19 = vrot.slane %v753_v4, 2 }
 0x315   :  { %v579_v30 = vsel %vm457_vm13, %v578_v49, %v577_v44  ;;  %v707_v44 = vsel %vm457_vm13, %v706_v0, %v705_v31  ;;  %v740_v49 = vmul.f32 %v3246_v59, %v2893_v48 }
 0x316   :  { %v3240_v46 = vadd.f32 %v579_v30, %v565_v22  ;;  %v755_v57 = vsel %vm371_vm8, %v753_v4, %v754_v19 }
 0x31a   :  { %v786_v37 = vpop.permute.xlu2 %785  ;;  %v673_v8 = vpop.permute.xlu1 %672 }
 0x31b   :  { %v818_v2 = vpop.permute.xlu0 %817  ;;  %v674_v47 = vrot.slane %v673_v8, 6 }
 0x31d   :  { %v675_v53 = vsel %vm423_vm11, %v674_v47, %v673_v8  ;;  %v787_v8 = vrot.slane %v786_v37, 6  ;;  %v757_v47 = vadd.f32 %v755_v57, %v740_v49 }
 0x31e   :  { %v677_v60 = vadd.f32 %v675_v53, %v661_v14 }
 0x31f   :  { %v788_v4 = vsel %vm405_vm10, %v787_v8, %v786_v37 }
 0x320   :  { %v693_v34 = vadd.f32 %v691_v25, %v677_v60  ;;  %v819_v60 = vrot.slane %v818_v2, 6 }
 0x322   :  { %v802_v58 = vpop.permute.xlu2 %801  ;;  %v769_v22 = vpop.permute.xlu1 %768  ;;  %v3252_v30 = vadd.f32 %v707_v44, %v693_v34  ;;  %v820_v34 = vsel %vm440_vm12, %v819_v60, %v818_v2 }
 0x323   :  { %v770_v14 = vrot.slane %v769_v22, 2  ;;  %v868_v1 = vpop.permute.xlu0 %867  ;;  %v803_v54 = vrot.slane %v802_v58, 6 }
 0x324   :  { %v869_v11 = vrot.slane %v868_v1, 2 }
 0x325   :  { %v771_v53 = vsel %vm388_vm9, %v769_v22, %v770_v14  ;;  %v804_v31 = vsel %vm423_vm11, %v803_v54, %v802_v58  ;;  %v3835_v14 = vld [vmem:[#allocation15_spill] sm:$0xff] }
 0x326   :  { %v773_v61 = vadd.f32 %v771_v53, %v757_v47  ;;  %v3263_v47 = vperm.slane %v3835_v14, %v2879_v10  ;;  %v870_v37 = vsel %vm371_vm8, %v868_v1, %v869_v11 }
 0x328   :  { %v790_v19 = vadd.f32 %v788_v4, %v773_v61  ;;  %3836 = vst [vmem:[#allocation16_spill] sm:$0xff] %v3263_v47  ;;  %v855_v8 = vmul.f32 %v3263_v47, %v2893_v48 }
 0x32a   :  { %v900_v0 = vpop.permute.xlu2 %899  ;;  %v806_v25 = vadd.f32 %v804_v31, %v790_v19  ;;  %v834_v56 = vpop.permute.xlu1 %833  ;;  %v872_v61 = vadd.f32 %v870_v37, %v855_v8 }
 0x32b   :  { %v835_v44 = vrot.slane %v834_v56, 6  ;;  %v932_v22 = vpop.permute.xlu0 %931  ;;  %v901_v2 = vrot.slane %v900_v0, 6 }
 0x32c   :  { %v822_v45 = vadd.f32 %v820_v34, %v806_v25  ;;  %v933_v4 = vrot.slane %v932_v22, 6 }
 0x32d   :  { %v836_v57 = vsel %vm457_vm13, %v835_v44, %v834_v56  ;;  %v902_v19 = vsel %vm405_vm10, %v901_v2, %v900_v0  ;;  %v3838_v2 = vld [vmem:[#allocation21_spill] sm:$0xff] }
 0x32e   :  { %v3259_v49 = vadd.f32 %v836_v57, %v822_v45  ;;  %v3837_v57 = vld [vmem:[#allocation22_spill] sm:$0xff]  ;;  %v934_v40 = vsel %vm440_vm12, %v933_v4, %v932_v22 }
 0x32f   :  { %v962_v14 = vrot.slane %v3837_v57, 6 }
 0x331   :  { %v964_v0 = vsel %vm963_vm14, %v962_v14, %v3837_v57 }
 0x332   :  { %v916_v58 = vpop.permute.xlu2 %915  ;;  %v884_v54 = vpop.permute.xlu1 %883 }
 0x333   :  { %v885_v53 = vrot.slane %v884_v54, 2  ;;  %v917_v60 = vrot.slane %v916_v58, 6  ;;  %v1044_v25 = vpop.permute.xlu0 %1043 }
 0x335   :  { %v886_v56 = vsel %vm388_vm9, %v884_v54, %v885_v53  ;;  %v918_v34 = vsel %vm423_vm11, %v917_v60, %v916_v58  ;;  %v3278_v58 = vperm.slane %v3838_v2, %v2879_v10 }
 0x336   :  { %v888_v45 = vadd.f32 %v886_v56, %v872_v61 }
 0x337   :  { %3839 = vst [vmem:[#allocation10_spill] sm:$0xff] %v3278_v58  ;;  %v983_v22 = vmul.f32 %v3278_v58, %v2893_v48 }
 0x338   :  { %v904_v31 = vadd.f32 %v902_v19, %v888_v45 }
 0x33a   :  { %v996_v11 = vpop.permute.xlu2 %995  ;;  %v920_v1 = vadd.f32 %v918_v34, %v904_v31  ;;  %v948_v44 = vpop.permute.xlu1 %947  ;;  %v1045_v31 = vrot.slane %v1044_v25, 6 }
 0x33b   :  { %v949_v13 = vrot.slane %v948_v44, 6  ;;  %v997_v37 = vrot.slane %v996_v11, 2  ;;  %v1060_v4 = vpop.permute.xlu0 %1059 }
 0x33c   :  { %v936_v8 = vadd.f32 %v934_v40, %v920_v1 }
 0x33d   :  { %v950_v54 = vsel %vm457_vm13, %v949_v13, %v948_v44  ;;  %v998_v61 = vsel %vm371_vm8, %v996_v11, %v997_v37  ;;  %v1061_v44 = vrot.slane %v1060_v4, 6  ;;  %v1046_v11 = vsel %vm423_vm11, %v1045_v31, %v1044_v25  ;;  %v2328_v25 = vld [vmem:[#allocation4 + $0x48] sm:$0xff] }
 0x33e   :  { %v952_v53 = vadd.f32 %v950_v54, %v936_v8  ;;  %v1000_v13 = vadd.f32 %v998_v61, %v983_v22  ;;  %v2325_v22 = vld [vmem:[#allocation4 + $0x50] sm:$0xff] }
 0x33f   :  { %v1062_v54 = vsel %vm440_vm12, %v1061_v44, %v1060_v4 }
 0x340   :  { %v3281_v60 = vmul.f32 %v964_v0, %v952_v53 }
 0x342   :  { %3840 = vst [vmem:[#allocation13_spill] sm:$0xff] %v3281_v60  ;;  %v1012_v56 = vpop.permute.xlu2 %1011  ;;  %v1028_v40 = vpop.permute.xlu1 %1027 }
 0x343   :  { %v1013_v45 = vrot.slane %v1012_v56, 2  ;;  %v1029_v19 = vrot.slane %v1028_v40, 6  ;;  %v1497_v58 = vpop.permute.xlu0 %1496 }
 0x344   :  { %v3296_v31 = vmul.f32 %v2328_v25, %v1497_v58 }
 0x345   :  { %v1014_v34 = vsel %vm388_vm9, %v1012_v56, %v1013_v45  ;;  %v1030_v57 = vsel %vm405_vm10, %v1029_v19, %v1028_v40  ;;  %v2326_v45 = vld [vmem:[#allocation4 + $0x58] sm:$0xff]  ;;  %v2327_v40 = vld [vmem:[#allocation4 + $0x40] sm:$0xff] }
 0x346   :  { %v1016_v1 = vadd.f32 %v1014_v34, %v1000_v13  ;;  %v3294_v19 = vmul.f32 %v2327_v40, %v1497_v58  ;;  %3844 = vst [vmem:[#allocation41_spill] sm:$0xff] %v3296_v31 }
 0x348   :  { %v1032_v14 = vadd.f32 %v1030_v57, %v1016_v1  ;;  %3843 = vst [vmem:[#allocation21_spill] sm:$0xff] %v3294_v19  ;;  %v2329_v1 = vld [vmem:[#allocation4 + $0x70] sm:$0xff]  ;;  %v2330_v57 = vld [vmem:[#allocation4 + $0x78] sm:$0xff] }
 0x34a   :  { %v1048_v37 = vadd.f32 %v1046_v11, %v1032_v14  ;;  %v1502_v8 = vpop.permute.xlu2 %1501  ;;  %v1076_v53 = vpop.permute.xlu1 %1075 }
 0x34b   :  { %v1077_v2 = vrot.slane %v1076_v53, 6  ;;  %v3290_v47 = vmul.f32 %v2325_v22, %v1502_v8  ;;  %v3292_v13 = vmul.f32 %v2326_v45, %v1502_v8  ;;  %v2331_v8 = vld [vmem:[#allocation4 + $0x60] sm:$0xff] }
 0x34c   :  { %v1064_v0 = vadd.f32 %v1062_v54, %v1048_v37 }
 0x34d   :  { %v1078_v61 = vsel %vm457_vm13, %v1077_v2, %v1076_v53  ;;  %3841 = vst [vmem:[#allocation15_spill] sm:$0xff] %v3290_v47  ;;  %v1522_v34 = vadd.f32 %v3290_v47, %v3294_v19  ;;  %v1531_v37 = vadd.f32 %v3292_v13, %v3296_v31  ;;  %v2332_v53 = vld [vmem:[#allocation4 + $0x68] sm:$0xff] }
 0x34e   :  { %v1080_v56 = vadd.f32 %v1078_v61, %v1064_v0  ;;  %3842 = vst [vmem:[#allocation22_spill] sm:$0xff] %v3292_v13  ;;  %v2449_v61 = vmov 34  }
 0x34f   :  { %2272 = vset.pattern.permute.xlu0 %v2449_v61 }
 0x352   :  { %v1512_v4 = vpop.permute.xlu2 %1511  ;;  %v1507_v11 = vpop.permute.xlu1 %1506 }
 0x353   :  { %v3300_v44 = vmul.f32 %v2329_v1, %v1512_v4  ;;  %v3302_v14 = vmul.f32 %v2330_v57, %v1512_v4  ;;  %v3306_v54 = vmul.f32 %v2331_v8, %v1507_v11  ;;  %v3308_v58 = vmul.f32 %v2332_v53, %v1507_v11 }
 0x355   :  { %3845 = vst [vmem:[#allocation42_spill] sm:$0xff] %v3300_v44  ;;  %v1549_v0 = vmax.f32 %v3290_v47, %v3300_v44  ;;  %v1558_v2 = vmax.f32 %v3292_v13, %v3302_v14  ;;  %v1523_v22 = vadd.f32 %v1522_v34, %v3306_v54  ;;  %v1532_v45 = vadd.f32 %v1531_v37, %v3308_v58 }
 0x356   :  { %3846 = vst [vmem:[#allocation43_spill] sm:$0xff] %v3302_v14  ;;  %v1548_v40 = vmax.f32 %v3294_v19, %v3306_v54  ;;  %v1557_v25 = vmax.f32 %v3296_v31, %v3308_v58 }
 0x357   :  { %3847 = vst [vmem:[#allocation44_spill] sm:$0xff] %v3306_v54  ;;  %v1524_v4 = vadd.f32 %v1523_v22, %v3300_v44  ;;  %v1533_v1 = vadd.f32 %v1532_v45, %v3302_v14 }
 0x358   :  { %3848 = vst [vmem:[#allocation45_spill] sm:$0xff] %v3308_v58  ;;  %v1550_v57 = vmax.f32 %v1548_v40, %v1549_v0  ;;  %v1559_v11 = vmax.f32 %v1557_v25, %v1558_v2 }
 0x359   :  { %v1525_v8 = vrot.slane %v1524_v4, 4  ;;  %v1534_v53 = vrot.slane %v1533_v1, 4 }
 0x35a   :  { %v1551_v47 = vrot.slane %v1550_v57, 4  ;;  %v1560_v61 = vrot.slane %v1559_v11, 4  ;;  %v1089_v34 = vpop.permute.xlu1 %1088 }
 0x35b   :  { %v1526_v13 = vadd.f32 %v1525_v8, %v1524_v4  ;;  %v1535_v37 = vadd.f32 %v1534_v53, %v1533_v1  ;;  %v1090_v54 = vrot.slane %v1089_v34, 6 }
 0x35c   :  { %v1552_v59 = vmax.f32 %v1550_v57, %v1551_v47  ;;  %v1561_v23 = vmax.f32 %v1559_v11, %v1560_v61 }
 0x35d   :  { %v1527_v19 = vrot.slane %v1526_v13, 2  ;;  %v1536_v5 = vrot.slane %v1535_v37, 2  ;;  %v1092_v22 = vsel %vm1091_vm15, %v1090_v54, %v1089_v34 }
 0x35e   :  { %v1553_v58 = vrot.slane %v1552_v59, 2  ;;  %v1562_v31 = vrot.slane %v1561_v23, 2  ;;  %v3323_v25 = vmul.f32 %v1092_v22, %v1080_v56 }
 0x35f   :  { %v1528_v45 = vadd.f32 %v1527_v19, %v1526_v13  ;;  %v1537_v0 = vadd.f32 %v1536_v5, %v1535_v37  ;;  %v1105_v19 = vpop.permute.xlu2 %1104 }
 0x360   :  { %v1554_v2 = vmax.f32 %v1552_v59, %v1553_v58  ;;  %v1563_v40 = vmax.f32 %v1561_v23, %v1562_v31 }
 0x361   :  { %v1529_v44 = vrot.slane %v1528_v45, 1  ;;  %v1538_v14 = vrot.slane %v1537_v0, 1 }
 0x362   :  { %v1555_v9 = vrot.slane %v1554_v2, 1  ;;  %v1564_v4 = vrot.slane %v1563_v40, 1  ;;  %v1115_v1 = vpop.permute.xlu1 %1114 }
 0x363   :  { %v1530_v47 = vadd.f32 %v1529_v44, %v1528_v45  ;;  %v1539_v57 = vadd.f32 %v1538_v14, %v1537_v0  ;;  %v1119_v8 = vperm.slane %v1115_v1, %v2879_v10  ;;  %v2140_v1 = vld [vmem:[%s3742_s5 + $0x2] ss:$8 sm:$0x3] }
 0x364   :  { %v1565_v11 = vmax.f32 %v1563_v40, %v1564_v4  ;;  %v1556_v61 = vmax.f32 %v1554_v2, %v1555_v9  ;;  %v3335_v9 = vperm.slane %v1105_v19, %v2879_v10 }
 0x365   :  { %v1541_v53 = vmul.f32 0.03125, %v1539_v57  ;;  %v1121_v13 = vmul.f32 %v1119_v8, %v2893_v48  ;;  %v1540_v5 = vmul.f32 0.03125, %v1530_v47  ;;  %v1759_v47 = vperm.slane %v2140_v1, 1 }
 0x366   :  { %v1568_v60 = vrot.slane %v1565_v11, 7 }
 0x367   :  { %v1544_v59 = vrot.slane %v1541_v53, 7  ;;  %1123 = vrot.lane.b32.xlu0 %v1121_v13, %s2438_s30  ;;  %v1760_v53 = vrot.slane %v1759_v47, 6  ;;  %v2143_v47 = vld [vmem:[%s3742_s5 + $0x6] ss:$8 sm:$0x3] }
 0x368   :  { %v1569_v23 = vsel %vm312_vm3, %v1556_v61, %v1568_v60 }
 0x369   :  { %1571 = vst.msk [vmem:[#allocation2 + $0x3] ss:$2 sm:$0x3] %vm2869_vm4, %v1569_v23  ;;  %v1545_v56 = vsel %vm312_vm3, %v1540_v5, %v1544_v59  ;;  %v3850_v23 = vld [vmem:[#allocation14_spill] sm:$0xff]  ;;  %vm592_vm3 = vcmask 637952  }
 0x36a   :  { %1547 = vst.msk [vmem:[#allocation2 + $0x2] ss:$2 sm:$0x3] %vm2869_vm4, %v1545_v56  ;;  %v591_v56 = vrot.slane %v3850_v23, 6  ;;  %vm720_vm4 = vcmask 646144  }
 0x36b   :  { %v1147_v11 = vpop.permute.xlu1 %1146 }
 0x36c   :  { %v1151_v61 = vperm.slane %v1147_v11, %v2879_v10 }
 0x36f   :  { %1162 = vperm.xlu0 %2272, %v3184_v39   ;;  %v3849_v39 = vmov 0  }
 0x371   :  { %v3338_v31 = vld [vmem:[#allocation2] sm:$0x3f] }
 0x372   :  { %v3342_v60 = vmul.f32 %v3338_v31, %v3335_v9  ;;  %v1647_v44 = vmul.f32 %v3338_v31, %v2958_v62  ;;  %v1639_v14 = vmul.f32 %v3338_v31, %v2912_v28  ;;  %v1708_v12 = vmul.f32 %v3338_v31, %v2973_v21  ;;  %v3354_v54 = vld [vmem:[#allocation2 + $0x2] sm:$0x3f] }
 0x373   :  { %v1716_v58 = vmul.f32 %v3338_v31, %v2995_v27  ;;  %v1655_v62 = vmul.f32 %v3338_v31, %v2933_v29  ;;  %v1663_v28 = vmul.f32 %v3354_v54, %v2950_v17  ;;  %v1777_v21 = vmul.f32 %v3338_v31, %v2977_v50 }
 0x374   :  { %1649 = vrot.lane.b32.xlu1 %v1647_v44, %s2440_s0  ;;  %1641 = vrot.lane.b32.xlu2 %v1639_v14, %s2438_s30  ;;  %v1724_v34 = vmul.f32 %v3338_v31, %v2954_v38  ;;  %v1835_v29 = vmul.f32 %v3338_v31, %v3022_v3  ;;  %v1732_v17 = vmul.f32 %v3354_v54, %v3003_v15  ;;  %v1793_v15 = vld [vmem:[#allocation2 + $0x2] sm:$0xf] }
 0x375   :  { %v1671_v27 = vmul.f32 %v3354_v54, %v2929_v16  ;;  %v1785_v38 = vmul.f32 %v3338_v31, %v3026_v36  ;;  %v1904_v50 = vmul.f32 %v3338_v31, %v3158_v43  ;;  %v1843_v3 = vmul.f32 %v3338_v31, %v3077_v26  ;;  %v1131_v43 = vpop.permute.xlu2 %1130 }
 0x376   :  { %v1679_v16 = vmul.f32 %v3354_v54, %v2982_v20  ;;  %v1794_v36 = vmul.f32 %v1793_v15, %v3066_v6  ;;  %v1740_v37 = vmul.f32 %v3354_v54, %v3018_v55  ;;  %v1851_v26 = vmul.f32 %v3354_v54, %v3116_v63  ;;  %v2139_v20 = vld [vmem:[%s3742_s5 + $0x1] ss:$8 sm:$0x3]  ;;  %v2142_v15 = vld [vmem:[%s3742_s5 + $0x5] ss:$8 sm:$0x3] }
 0x377   :  { %1710 = vrot.lane.b32.xlu0 %v1708_v12, %s2438_s30  ;;  %v1135_v22 = vperm.slane %v1131_v43, %v2879_v10  ;;  %v1690_v6 = vperm.slane %v2139_v20, 1  ;;  %v1973_v45 = vmul.f32 %v3338_v31, %v1119_v8  ;;  %v1912_v55 = vmul.f32 %v3338_v31, %v3168_v7 }
 0x378   :  { %2275 = vset.pattern.permute.xlu0 %v3849_v39  ;;  %v1689_v0 = vperm.slane %v2139_v20, 0  ;;  %v1748_v4 = vmul.f32 %v3354_v54, %v3043_v18  ;;  %v1802_v7 = vmul.f32 %v3354_v54, %v3094_v33  ;;  %v1859_v57 = vmul.f32 %v3354_v54, %v3137_v35 }
 0x379   :  { %v1137_v63 = vmul.f32 %v1135_v22, %v2893_v48  ;;  %v1691_v2 = vrot.slane %v1690_v6, 6  ;;  %v1920_v18 = vmul.f32 %v3354_v54, %v3120_v51  ;;  %v1981_v33 = vmul.f32 %v3338_v31, %v1135_v22  ;;  %v3854_v22 = vld [vmem:[#allocation17_spill] sm:$0xff] }
 0x37a   :  { %v1758_v8 = vperm.slane %v2140_v1, 0  ;;  %v1153_v35 = vmul.f32 %v1151_v61, %v2895_v32  ;;  %v1810_v51 = vmul.f32 %v3354_v54, %v2999_v52  ;;  %v1928_v5 = vmul.f32 %v3354_v54, %v3072_v24  ;;  %v3851_v52 = vld [vmem:[#allocation18_spill] sm:$0xff] }
 0x37b   :  { %v1692_v40 = vsel %vm466_vm0, %v1689_v0, %v1691_v2  ;;  %v1867_v59 = vmul.f32 %v3354_v54, %v3047_v42  ;;  %v719_v44 = vrot.slane %v3851_v52, 6  ;;  %v593_v24 = vsel %vm592_vm3, %v591_v56, %v3850_v23  ;;  %v2132_v56 = vld [vmem:[%s3742_s5 + $0x6] ss:$8 sm:$0x3] }
 0x37c   :  { %1718 = vrot.lane.b32.xlu1 %v1716_v58, %s2440_s0  ;;  %1657 = vrot.lane.b32.xlu2 %v1655_v62, %s2437_s1  ;;  %v1761_v13 = vsel %vm466_vm0, %v1758_v8, %v1760_v53  ;;  %v595_v42 = vmul.f32 %v593_v24, %v3240_v46  ;;  %v1818_v14 = vmul.f32 %v3354_v54, %v3051_v41  ;;  %v3852_v46 = vld [vmem:[#allocation13_spill] sm:$0xff]  ;;  %v1955_v43 = vperm.slane %v2142_v15, 1 }
 0x37d   :  { %v1179_v19 = vpop.permute.xlu2 %1178  ;;  %v721_v12 = vsel %vm720_vm4, %v719_v44, %v3851_v52  ;;  %v1944_v6 = vmul.f32 %v3354_v54, %v3854_v22 }
 0x37f   :  { %1665 = vrot.lane.b32.xlu0 %v1663_v28, %s2439_s9 }
 0x384   :  { %1779 = vrot.lane.b32.xlu1 %v1777_v21, %s2438_s30  ;;  %1726 = vrot.lane.b32.xlu2 %v1724_v34, %s2437_s1  ;;  %v1989_v21 = vmul.f32 %v3354_v54, %v1151_v61 }
 0x387   :  { %1837 = vrot.lane.b32.xlu0 %v1835_v29, %s2438_s30  ;;  %v1195_v29 = vpop.permute.xlu1 %1194 }
 0x38c   :  { %1734 = vrot.lane.b32.xlu1 %v1732_v17, %s2439_s9  ;;  %1673 = vrot.lane.b32.xlu2 %v1671_v27, %s2436_s4 }
 0x38f   :  { %1787 = vrot.lane.b32.xlu0 %v1785_v38, %s2440_s0 }
 0x394   :  { %1906 = vrot.lane.b32.xlu1 %v1904_v50, %s2438_s30  ;;  %1845 = vrot.lane.b32.xlu2 %v1843_v3, %s2440_s0  ;;  %v3853_v3 = vld [vmem:[#allocation19_spill] sm:$0xff] }
 0x397   :  { %1681 = vrot.lane.b32.xlu0 %v1679_v16, %s2441_s2 }
 0x39c   :  { %1796 = vrot.lane.b32.xlu1 %v1794_v36, %s2437_s1  ;;  %1742 = vrot.lane.b32.xlu2 %v1740_v37, %s2436_s4  ;;  %v2141_v36 = vld [vmem:[%s3742_s5 + $0x4] ss:$8 sm:$0x3]  ;;  %v1183_v37 = vperm.slane %v1179_v19, %v2879_v10 }
 0x39d   :  { %v1886_v20 = vperm.slane %v2141_v36, 1 }
 0x39e   :  { %v2005_v8 = vmul.f32 %v3354_v54, %v1183_v37 }
 0x39f   :  { %1853 = vrot.lane.b32.xlu0 %v1851_v26, %s2437_s1  ;;  %v1887_v1 = vrot.slane %v1886_v20, 6 }
 0x3a4   :  { %1914 = vrot.lane.b32.xlu2 %v1912_v55, %s2440_s0  ;;  %1975 = vrot.lane.b32.xlu1 %v1973_v45, %s2438_s30  ;;  %v3855_v45 = vld [vmem:[#allocation40_spill] sm:$0xff] }
 0x3a5   :  { %v1936_v55 = vmul.f32 %v3354_v54, %v3855_v45 }
 0x3a7   :  { %1139 = vrot.lane.b32.xlu0 %v1137_v63, %s2440_s0  ;;  %v1185_v63 = vmul.f32 %v1183_v37, %v2895_v32  ;;  %v3859_v37 = vld [vmem:[#allocation36_spill] sm:$0xff] }
 0x3ac   :  { %1693 = vrot.lane.b32.xlu2 %v1692_v40, %s2398_s18  ;;  %1750 = vrot.lane.b32.xlu1 %v1748_v4, %s2441_s2  ;;  %s2450_s18 = smov 125   ;;  %v1954_v40 = vperm.slane %v2142_v15, 0  ;;  %v1956_v4 = vrot.slane %v1955_v43, 6  ;;  %v1575_v43 = vmul.f32 %v3338_v31, %v3859_v37 }
 0x3af   :  { %1804 = vrot.lane.b32.xlu0 %v1802_v7, %s2439_s9  ;;  %v1885_v7 = vperm.slane %v2141_v36, 0 }
 0x3b1   :  { %v1888_v11 = vsel %vm466_vm0, %v1885_v7, %v1887_v1 }
 0x3b4   :  { %1861 = vrot.lane.b32.xlu2 %v1859_v57, %s2439_s9  ;;  %1922 = vrot.lane.b32.xlu1 %v1920_v18, %s2437_s1  ;;  %v1957_v18 = vsel %vm466_vm0, %v1954_v40, %v1956_v4  ;;  %v3861_v40 = vld [vmem:[#allocation10_spill] sm:$0xff] }
 0x3b5   :  { %v1902_v4 = vmul.f32 %v3338_v31, %v3861_v40 }
 0x3b7   :  { %1983 = vrot.lane.b32.xlu0 %v1981_v33, %s2440_s0  ;;  %v2024_v33 = vperm.slane %v2143_v47, 1 }
 0x3bc   :  { %1762 = vrot.lane.b32.xlu1 %v1761_v13, %s2417_s29  ;;  %1155 = vrot.lane.b32.xlu2 %v1153_v35, %s2437_s1  ;;  %s2451_s29 = smov 127   ;;  %v2023_v35 = vperm.slane %v2143_v47, 0 }
 0x3bf   :  { %1812 = vrot.lane.b32.xlu0 %v1810_v51, %s2436_s4  ;;  %v2025_v51 = vrot.slane %v2024_v33, 6 }
 0x3c4   :  { %1930 = vrot.lane.b32.xlu1 %v1928_v5, %s2439_s9  ;;  %1869 = vrot.lane.b32.xlu2 %v1867_v59, %s2436_s4  ;;  %v1199_v5 = vperm.slane %v1195_v29, %v2879_v10  ;;  %v3856_v59 = vld [vmem:[#allocation11_spill] sm:$0xff] }
 0x3c5   :  { %v1775_v23 = vmul.f32 %v3338_v31, %v3856_v59 }
 0x3c7   :  { %840 = vrot.lane.b32.xlu0 %v3259_v49, %s2450_s18  ;;  %v723_v49 = vmul.f32 %v721_v12, %v3252_v30  ;;  %v1111_v30 = vmul.f32 %v3335_v9, %v2893_v48  ;;  %v1875_v48 = vmul.f32 %v3354_v54, %v3853_v3 }
 0x3cc   :  { %1820 = vrot.lane.b32.xlu1 %v1818_v14, %s2441_s2  ;;  %597 = vrot.lane.b32.xlu2 %v595_v42, %s2451_s29  ;;  %v3857_v14 = vld [vmem:[#allocation16_spill] sm:$0xff] }
 0x3cd   :  { %v1833_v12 = vmul.f32 %v3338_v31, %v3857_v14 }
 0x3ce   :  { %v3458_v39 = vpop.permute.xlu2 %1641 }
 0x3cf   :  { %725 = vrot.lane.b32.xlu0 %v723_v49, %s2452_s21  ;;  %v2026_v49 = vsel %vm466_vm0, %v2023_v35, %v2025_v51 }
 0x3d4   :  { %968 = vrot.lane.b32.xlu2 %v3852_v46, %s2453_s23  ;;  %v1201_v46 = vmul.f32 %v1199_v5, %v2895_v32 }
 0x3d6   :  { %v3463_v41 = vpop.permute.xlu2 %1657 }
 0x3d7   :  { %1096 = vrot.lane.b32.xlu0 %v3323_v25, %s2454_s24  ;;  %v1659_v33 = vrot.slane %v3463_v41, 2 }
 0x3d9   :  { %v1124_v58 = vpop.permute.xlu0 %1123 }
 0x3da   :  { %v1125_v62 = vrot.slane %v1124_v58, 2 }
 0x3dc   :  { %v1126_v28 = vsel %vm371_vm8, %v1124_v58, %v1125_v62  ;;  %v2013_v62 = vmul.f32 %v3354_v54, %v1199_v5 }
 0x3dd   :  { %v3471_v34 = vadd.f32 %v1126_v28, %v1111_v30 }
 0x3de   :  { %v3473_v17 = vpop.permute.xlu2 %1726 }
 0x3df   :  { %1991 = vrot.lane.b32.xlu0 %v1989_v21, %s2437_s1 }
 0x3e1   :  { %v1163_v27 = vpop.permute.xlu0 %1162 }
 0x3e2   :  { %v1167_v38 = vperm.slane %v1163_v27, %v2879_v10  ;;  %v1213_v10 = vperm.slane %v2132_v56, 1  ;;  %v1212_v27 = vperm.slane %v2132_v56, 0  ;;  %v3864_v56 = vld [vmem:[#allocation37_spill] sm:$0xff] }
 0x3e4   :  { %v1169_v25 = vmul.f32 %v1167_v38, %v2895_v32  ;;  %v1997_v50 = vmul.f32 %v3354_v54, %v1167_v38  ;;  %v1214_v38 = vrot.slane %v1213_v10, 6 }
 0x3e6   :  { %v3481_v9 = vpop.permute.xlu2 %1673  ;;  %1999 = vrot.lane.b32.xlu1 %v1997_v50, %s2439_s9  ;;  %1171 = vrot.lane.b32.xlu2 %v1169_v25, %s2439_s9  ;;  %v3485_v16 = vpop.permute.xlu1 %1649  ;;  %v1643_v50 = vrot.slane %v3458_v39, 2  ;;  %v1215_v3 = vsel %vm466_vm0, %v1212_v27, %v1214_v38  ;;  %v3865_v27 = vld [vmem:[#allocation34_spill] sm:$0xff] }
 0x3e7   :  { %1877 = vrot.lane.b32.xlu0 %v1875_v48, %s2441_s2  ;;  %v3858_v48 = vld [vmem:[#allocation35_spill] sm:$0xff]  ;;  %v1651_v36 = vrot.slane %v3485_v16, 2  ;;  %v1608_v38 = vmul.f32 %v3354_v54, %v3865_v27 }
 0x3e8   :  { %v1591_v15 = vmul.f32 %v3338_v31, %v3858_v48 }
 0x3e9   :  { %v3495_v26 = vpop.permute.xlu0 %1710  ;;  %v1652_v7 = vsel %vm388_vm9, %v3485_v16, %v1651_v36  ;;  %v3863_v16 = vld [vmem:[#allocation38_spill] sm:$0xff] }
 0x3ea   :  { %v1583_v5 = vmul.f32 %v3338_v31, %v3863_v16 }
 0x3ee   :  { %v1846_v0 = vpop.permute.xlu2 %1845  ;;  %1946 = vrot.lane.b32.xlu1 %v1944_v6, %s2441_s2  ;;  %1938 = vrot.lane.b32.xlu2 %v1936_v55, %s2436_s4  ;;  %v3504_v2 = vpop.permute.xlu1 %1718  ;;  %v1644_v6 = vsel %vm371_vm8, %v3458_v39, %v1643_v50  ;;  %v1624_v39 = vld [vmem:[%s3742_s5] ss:$8 sm:$0x3]  ;;  %s2456_s5 = smov 122  }
 0x3ef   :  { %1187 = vrot.lane.b32.xlu0 %v1185_v63, %s2436_s4  ;;  %v1847_v44 = vrot.slane %v1846_v0, 2  ;;  %v3860_v63 = vld [vmem:[#allocation24_spill] sm:$0xff]  ;;  %v1627_v59 = vperm.slane %v1624_v39, 1  ;;  %v1720_v40 = vrot.slane %v3504_v2, 2 }
 0x3f1   :  { %v3510_v57 = vpop.permute.xlu0 %1665  ;;  %v1848_v28 = vsel %vm388_vm9, %v1846_v0, %v1847_v44  ;;  %v1637_v0 = vmul.f32 %v3338_v31, %v3860_v63  ;;  %v1628_v10 = vrot.slane %v1627_v59, 6 }
 0x3f6   :  { %v3515_v53 = vpop.permute.xlu2 %1742  ;;  %1958 = vrot.lane.b32.xlu1 %v1957_v18, %s2442_s14  ;;  %1889 = vrot.lane.b32.xlu2 %v1888_v11, %s2427_s22  ;;  %v1780_v61 = vpop.permute.xlu1 %1779  ;;  %s2455_s22 = smov 83   ;;  %v1646_v18 = vadd.f32 %v1644_v6, %v1637_v0 }
 0x3f7   :  { %v1781_v13 = vrot.slane %v1780_v61, 2  ;;  %2007 = vrot.lane.b32.xlu0 %v2005_v8, %s2436_s4  ;;  %v1667_v8 = vrot.slane %v3510_v57, 6 }
 0x3f8   :  { %v1654_v51 = vadd.f32 %v1652_v7, %v1646_v18 }
 0x3f9   :  { %v1782_v19 = vsel %vm371_vm8, %v1780_v61, %v1781_v13  ;;  %v1838_v52 = vpop.permute.xlu0 %1837  ;;  %v3862_v13 = vld [vmem:[#allocation39_spill] sm:$0xff]  ;;  %v1668_v14 = vsel %vm423_vm11, %v1667_v8, %v3510_v57 }
 0x3fa   :  { %v3527_v24 = vadd.f32 %v1782_v19, %v1775_v23  ;;  %v1839_v42 = vrot.slane %v1838_v52, 2  ;;  %v1616_v35 = vmul.f32 %v3354_v54, %v3862_v13  ;;  %v1600_v19 = vmul.f32 %v3354_v54, %v3864_v56  ;;  %v3868_v56 = vld [vmem:[#allocation23_spill] sm:$0xff] }
 0x3fc   :  { %v1840_v58 = vsel %vm371_vm8, %v1838_v52, %v1839_v42  ;;  %v1660_v42 = vsel %vm405_vm10, %v3463_v41, %v1659_v33  ;;  %v3867_v33 = vld [vmem:[#allocation12_spill] sm:$0xff] }
 0x3fd   :  { %v1842_v30 = vadd.f32 %v1840_v58, %v1833_v12  ;;  %v1662_v12 = vadd.f32 %v1660_v42, %v1654_v51  ;;  %v470_v8 = vrot.slane %v3867_v33, 6  ;;  %v1744_v42 = vrot.slane %v3515_v53, 6 }
 0x3fe   :  { %v1915_v21 = vpop.permute.xlu2 %1914  ;;  %2027 = vrot.lane.b32.xlu1 %v2026_v49, %s2455_s22  ;;  %1203 = vrot.lane.b32.xlu2 %v1201_v46, %s2441_s2  ;;  %v3537_v29 = vpop.permute.xlu1 %1734  ;;  %v1626_v49 = vperm.slane %v1624_v39, 0  ;;  %v1675_v46 = vrot.slane %v3481_v9, 6  ;;  %v1721_v39 = vsel %vm388_vm9, %v3504_v2, %v1720_v40 }
 0x3ff   :  { %2015 = vrot.lane.b32.xlu0 %v2013_v62, %s2441_s2  ;;  %v1850_v25 = vadd.f32 %v1848_v28, %v1842_v30  ;;  %v1916_v45 = vrot.slane %v1915_v21, 2  ;;  %v1670_v30 = vadd.f32 %v1668_v14, %v1662_v12 }
 0x400   :  { %v1629_v41 = vsel %vm466_vm0, %v1626_v49, %v1628_v10  ;;  %v1676_v57 = vsel %vm440_vm12, %v1675_v46, %v3481_v9  ;;  %vm471_vm0 = vcmask 629760  }
 0x401   :  { %v3540_v32 = vpop.permute.xlu0 %1787  ;;  %v1917_v61 = vsel %vm388_vm9, %v1915_v21, %v1916_v45 }
 0x406   :  { %v1694_v20 = vpop.permute.xlu2 %1693  ;;  %1593 = vrot.lane.b32.xlu1 %v1591_v15, %s2437_s1  ;;  %1216 = vrot.lane.b32.xlu2 %v1215_v3, %s2455_s22  ;;  %v1907_v22 = vpop.permute.xlu1 %1906  ;;  %v1678_v15 = vadd.f32 %v1676_v57, %v1670_v30 }
 0x407   :  { %v1908_v55 = vrot.slane %v1907_v22, 2  ;;  %1577 = vrot.lane.b32.xlu0 %v1575_v43, %s2438_s30  ;;  %v1695_v50 = vrot.slane %v1694_v20, 6  ;;  %s2458_s30 = smov [#allocation7]  }
 0x409   :  { %v1909_v1 = vsel %vm371_vm8, %v1907_v22, %v1908_v55  ;;  %v1682_v47 = vpop.permute.xlu0 %1681  ;;  %v1696_v22 = vsel %vm592_vm3, %v1695_v50, %v1694_v20 }
 0x40a   :  { %v1911_v11 = vadd.f32 %v1909_v1, %v1902_v4  ;;  %v1683_v58 = vrot.slane %v1682_v47, 6 }
 0x40c   :  { %v3570_v23 = vadd.f32 %v1917_v61, %v1911_v11  ;;  %v1684_v3 = vsel %vm457_vm13, %v1683_v58, %v1682_v47  ;;  %v1736_v61 = vrot.slane %v3537_v29, 6 }
 0x40d   :  { %v1686_v54 = vadd.f32 %v1684_v3, %v1678_v15  ;;  %v1789_v3 = vrot.slane %v3540_v32, 2 }
 0x40e   :  { %v3574_v52 = vpop.permute.xlu2 %1861  ;;  %1618 = vrot.lane.b32.xlu1 %v1616_v35, %s2441_s2  ;;  %1585 = vrot.lane.b32.xlu2 %v1583_v5, %s2440_s0  ;;  %v3578_v44 = vpop.permute.xlu1 %1796  ;;  %v1737_v16 = vsel %vm423_vm11, %v1736_v61, %v3537_v29 }
 0x40f   :  { %1602 = vrot.lane.b32.xlu0 %v1600_v19, %s2439_s9  ;;  %v1698_v63 = vmul.f32 %v1696_v22, %v1686_v54  ;;  %v1798_v15 = vrot.slane %v3578_v44, 6  ;;  %s2109_s9 = sshll.u32 %s2458_s30, 4  ;;  %s2110_s9 = int_to_ptr.vmem [resolvable:$true] %s2109_s9 }
 0x411   :  { %v1854_v62 = vpop.permute.xlu0 %1853  ;;  %v1799_v22 = vsel %vm405_vm10, %v1798_v15, %v3578_v44 }
 0x412   :  { %v1855_v28 = vrot.slane %v1854_v62, 6 }
 0x414   :  { %v1856_v21 = vsel %vm405_vm10, %v1855_v28, %v1854_v62 }
 0x415   :  { %v3593_v48 = vadd.f32 %v1856_v21, %v1850_v25  ;;  %v1712_v25 = vrot.slane %v3495_v26, 2 }
 0x416   :  { %v3595_v36 = vpop.permute.xlu2 %1155  ;;  %1610 = vrot.lane.b32.xlu2 %v1608_v38, %s2436_s4  ;;  %v1976_v37 = vpop.permute.xlu1 %1975 }
 0x417   :  { %v1977_v43 = vrot.slane %v1976_v37, 2  ;;  %1630 = vrot.lane.b32.xlu0 %v1629_v41, %s2392_s15  ;;  %v1713_v1 = vsel %vm371_vm8, %v3495_v26, %v1712_v25  ;;  %v472_v26 = vsel %vm471_vm0, %v470_v8, %v3867_v33 }
 0x418   :  { %v474_v19 = vmul.f32 %v472_v26, %v3868_v56 }
 0x419   :  { %v1978_v6 = vsel %vm371_vm8, %v1976_v37, %v1977_v43  ;;  %v1140_v9 = vpop.permute.xlu0 %1139 }
 0x41a   :  { %v1980_v45 = vadd.f32 %v1978_v6, %v3342_v60  ;;  %v1141_v55 = vrot.slane %v1140_v9, 2  ;;  %v3866_v60 = vld [vmem:[#allocation20_spill] sm:$0xff] }
 0x41b   :  { %v1706_v47 = vmul.f32 %v3338_v31, %v3866_v60 }
 0x41c   :  { %v1142_v0 = vsel %vm388_vm9, %v1140_v9, %v1141_v55 }
 0x41d   :  { %v3606_v4 = vadd.f32 %v1142_v0, %v3471_v34  ;;  %v1715_v11 = vadd.f32 %v1713_v1, %v1706_v47  ;;  %v1728_v34 = vrot.slane %v3473_v17, 2 }
 0x41e   :  { %v3608_v7 = vpop.permute.xlu2 %1869  ;;  %1700 = vrot.lane.b32.xlu2 %v1698_v63, %s2451_s29  ;;  %v1751_v20 = vpop.permute.xlu1 %1750 }
 0x41f   :  { %v1723_v13 = vadd.f32 %v1721_v39, %v1715_v11  ;;  %v1729_v2 = vsel %vm405_vm10, %v3473_v17, %v1728_v34  ;;  %v1752_v14 = vrot.slane %v1751_v20, 6  ;;  %v1745_v17 = vsel %vm440_vm12, %v1744_v42, %v3515_v53 }
 0x420   :  { %v1790_v53 = vsel %vm388_vm9, %v3540_v32, %v1789_v3  ;;  %v1871_v42 = vrot.slane %v3608_v7, 6 }
 0x421   :  { %v1805_v18 = vpop.permute.xlu0 %1804  ;;  %v1731_v59 = vadd.f32 %v1729_v2, %v1723_v13  ;;  %v1753_v29 = vsel %vm457_vm13, %v1752_v14, %v1751_v20 }
 0x422   :  { %v1806_v43 = vrot.slane %v1805_v18, 6 }
 0x423   :  { %v1739_v10 = vadd.f32 %v1737_v16, %v1731_v59 }
 0x424   :  { %v1807_v55 = vsel %vm423_vm11, %v1806_v43, %v1805_v18 }
 0x425   :  { %v1747_v28 = vadd.f32 %v1745_v17, %v1739_v10 }
 0x426   :  { %v598_v35 = vpop.permute.xlu2 %597  ;;  %v3620_v51 = vpop.permute.xlu1 %1922 }
 0x427   :  { %v599_v5 = vrot.slane %v598_v35, 2  ;;  %v1755_v38 = vadd.f32 %v1753_v29, %v1747_v28  ;;  %v1157_v28 = vrot.slane %v3595_v36, 6 }
 0x429   :  { %v601_v12 = vsel %vm600_vm1, %v598_v35, %v599_v5  ;;  %v1984_v49 = vpop.permute.xlu0 %1983 }
 0x42a   :  { %v603_v46 = vadd.f32 %v601_v12, %v474_v19  ;;  %v1985_v58 = vrot.slane %v1984_v49, 2  ;;  %v1863_v19 = vrot.slane %v3574_v52, 6  ;;  %v1872_v12 = vsel %vm440_vm12, %v1871_v42, %v3608_v7 }
 0x42c   :  { %v1986_v62 = vsel %vm388_vm9, %v1984_v49, %v1985_v58  ;;  %v1864_v14 = vsel %vm423_vm11, %v1863_v19, %v3574_v52 }
 0x42d   :  { %v3635_v30 = vadd.f32 %v1986_v62, %v1980_v45  ;;  %v1792_v45 = vadd.f32 %v1790_v53, %v3527_v24  ;;  %v1866_v10 = vadd.f32 %v1864_v14, %v3593_v48  ;;  %v1158_v48 = vsel %vm405_vm10, %v1157_v28, %v3595_v36 }
 0x42e   :  { %v1763_v21 = vpop.permute.xlu1 %1762  ;;  %v969_v54 = vpop.permute.xlu2 %968  ;;  %v1160_v53 = vadd.f32 %v1158_v48, %v3606_v4 }
 0x42f   :  { %v1764_v27 = vrot.slane %v1763_v21, 6  ;;  %v1801_v25 = vadd.f32 %v1799_v22, %v1792_v45  ;;  %v970_v33 = vrot.slane %v969_v54, 2  ;;  %v1874_v29 = vadd.f32 %v1872_v12, %v1866_v10 }
 0x431   :  { %v1765_v41 = vsel %vm720_vm4, %v1764_v27, %v1763_v21  ;;  %v1813_v57 = vpop.permute.xlu0 %1812  ;;  %v1809_v0 = vadd.f32 %v1807_v55, %v1801_v25  ;;  %v972_v61 = vsel %vm971_vm6, %v969_v54, %v970_v33 }
 0x432   :  { %v1767_v50 = vmul.f32 %v1765_v41, %v1755_v38  ;;  %v1814_v6 = vrot.slane %v1813_v57, 6  ;;  %v1924_v38 = vrot.slane %v3620_v51, 6 }
 0x434   :  { %1769 = vrot.lane.b32.xlu1 %v1767_v50, %s2452_s21  ;;  %v1815_v63 = vsel %vm440_vm12, %v1814_v6, %v1813_v57  ;;  %v1925_v15 = vsel %vm405_vm10, %v1924_v38, %v3620_v51 }
 0x435   :  { %v1817_v1 = vadd.f32 %v1815_v63, %v1809_v0  ;;  %v1927_v25 = vadd.f32 %v1925_v15, %v3570_v23 }
 0x436   :  { %v3641_v37 = vpop.permute.xlu1 %1930 }
 0x437   :  { %v1932_v7 = vrot.slane %v3641_v37, 6 }
 0x439   :  { %v841_v9 = vpop.permute.xlu0 %840 }
 0x43a   :  { %v842_v39 = vrot.slane %v841_v9, 2 }
 0x43c   :  { %v844_v8 = vsel %vm843_vm5, %v841_v9, %v842_v39  ;;  %v1933_v9 = vsel %vm423_vm11, %v1932_v7, %v3641_v37 }
 0x43e   :  { %v1821_v40 = vpop.permute.xlu1 %1820 }
 0x43f   :  { %v1822_v20 = vrot.slane %v1821_v40, 6 }
 0x440   :  { %v1172_v60 = vpop.permute.xlu2 %1171 }
 0x441   :  { %v1823_v32 = vsel %vm457_vm13, %v1822_v20, %v1821_v40  ;;  %v726_v47 = vpop.permute.xlu0 %725  ;;  %v1173_v21 = vrot.slane %v1172_v60, 6  ;;  %v1935_v40 = vadd.f32 %v1933_v9, %v1927_v25 }
 0x442   :  { %v1825_v44 = vadd.f32 %v1823_v32, %v1817_v1  ;;  %v727_v11 = vrot.slane %v726_v47, 2 }
 0x443   :  { %v1174_v50 = vsel %vm423_vm11, %v1173_v21, %v1172_v60 }
 0x444   :  { %v729_v24 = vsel %vm728_vm2, %v726_v47, %v727_v11  ;;  %1827 = vrot.lane.b32.xlu0 %v1825_v44, %s2450_s18  ;;  %v1176_v45 = vadd.f32 %v1174_v50, %v1160_v53 }
 0x445   :  { %v731_v18 = vadd.f32 %v729_v24, %v603_v46 }
 0x447   :  { %v846_v34 = vadd.f32 %v844_v8, %v731_v18 }
 0x448   :  { %v1939_v13 = vpop.permute.xlu2 %1938 }
 0x449   :  { %v1097_v35 = vpop.permute.xlu0 %1096  ;;  %v974_v26 = vadd.f32 %v972_v61, %v846_v34  ;;  %v1940_v43 = vrot.slane %v1939_v13, 6 }
 0x44a   :  { %v1098_v2 = vrot.slane %v1097_v35, 2 }
 0x44b   :  { %v1941_v51 = vsel %vm440_vm12, %v1940_v43, %v1939_v13 }
 0x44c   :  { %v1100_v16 = vsel %vm1099_vm7, %v1097_v35, %v1098_v2  ;;  %v1943_v32 = vadd.f32 %v1941_v51, %v1935_v40 }
 0x44d   :  { %v3656_v5 = vadd.f32 %v1100_v16, %v974_v26 }
 0x450   :  { %v1890_v59 = vpop.permute.xlu2 %1889 }
 0x451   :  { %v1992_v56 = vpop.permute.xlu0 %1991  ;;  %v1891_v62 = vrot.slane %v1890_v59, 6 }
 0x452   :  { %v1993_v37 = vrot.slane %v1992_v56, 6 }
 0x453   :  { %v1892_v52 = vsel %vm963_vm14, %v1891_v62, %v1890_v59  ;;  %vm1219_vm14 = vcmask 678912  }
 0x454   :  { %v1994_v8 = vsel %vm405_vm10, %v1993_v37, %v1992_v56 }
 0x455   :  { %v1996_v35 = vadd.f32 %v1994_v8, %v3635_v30 }
 0x458   :  { %v2000_v49 = vpop.permute.xlu1 %1999  ;;  %v1204_v46 = vpop.permute.xlu2 %1203 }
 0x459   :  { %v1878_v58 = vpop.permute.xlu0 %1877  ;;  %v1205_v22 = vrot.slane %v1204_v46, 6  ;;  %v2001_v33 = vrot.slane %v2000_v49, 6 }
 0x45a   :  { %v1879_v17 = vrot.slane %v1878_v58, 6 }
 0x45b   :  { %v1206_v20 = vsel %vm457_vm13, %v1205_v22, %v1204_v46  ;;  %v2002_v13 = vsel %vm423_vm11, %v2001_v33, %v2000_v49 }
 0x45c   :  { %v1880_v27 = vsel %vm457_vm13, %v1879_v17, %v1878_v58  ;;  %v2004_v16 = vadd.f32 %v2002_v13, %v1996_v35 }
 0x45d   :  { %v1882_v41 = vadd.f32 %v1880_v27, %v1874_v29  ;;  %v3869_v29 = vld [vmem:[#allocation25_spill] sm:$0xff] }
 0x45e   :  { %v1573_v28 = vmul.f32 %v3338_v31, %v3869_v29 }
 0x45f   :  { %v1894_v57 = vmul.f32 %v1892_v52, %v1882_v41 }
 0x460   :  { %v1947_v3 = vpop.permute.xlu1 %1946  ;;  %v1217_v55 = vpop.permute.xlu2 %1216 }
 0x461   :  { %v1188_v54 = vpop.permute.xlu0 %1187  ;;  %1896 = vrot.lane.b32.xlu2 %v1894_v57, %s2453_s23  ;;  %v1948_v36 = vrot.slane %v1947_v3, 6  ;;  %v1218_v63 = vrot.slane %v1217_v55, 6 }
 0x462   :  { %v1189_v6 = vrot.slane %v1188_v54, 6 }
 0x463   :  { %v1949_v1 = vsel %vm457_vm13, %v1948_v36, %v1947_v3  ;;  %v1220_v47 = vsel %vm1219_vm14, %v1218_v63, %v1217_v55 }
 0x464   :  { %v1190_v0 = vsel %vm440_vm12, %v1189_v6, %v1188_v54  ;;  %v1951_v24 = vadd.f32 %v1949_v1, %v1943_v32 }
 0x465   :  { %v1192_v4 = vadd.f32 %v1190_v0, %v1176_v45 }
 0x467   :  { %v1208_v60 = vadd.f32 %v1206_v20, %v1192_v4 }
 0x468   :  { %v1959_v39 = vpop.permute.xlu1 %1958  ;;  %v1586_v58 = vpop.permute.xlu2 %1585 }
 0x469   :  { %v1222_v44 = vmul.f32 %v1220_v47, %v1208_v60  ;;  %v1960_v23 = vrot.slane %v1959_v39, 6  ;;  %v2008_v11 = vpop.permute.xlu0 %2007  ;;  %v1587_v21 = vrot.slane %v1586_v58, 2 }
 0x46a   :  { %v2009_v61 = vrot.slane %v2008_v11, 6 }
 0x46b   :  { %v1961_v18 = vsel %vm1091_vm15, %v1960_v23, %v1959_v39  ;;  %1224 = vrot.lane.b32.xlu0 %v1222_v44, %s2456_s5  ;;  %v1588_v52 = vsel %vm388_vm9, %v1586_v58, %v1587_v21 }
 0x46c   :  { %v1963_v34 = vmul.f32 %v1961_v18, %v1951_v24  ;;  %v2010_v26 = vsel %vm440_vm12, %v2009_v61, %v2008_v11 }
 0x46d   :  { %v2012_v14 = vadd.f32 %v2010_v26, %v2004_v16 }
 0x46e   :  { %1965 = vrot.lane.b32.xlu1 %v1963_v34, %s2454_s24 }
 0x470   :  { %v2028_v2 = vpop.permute.xlu1 %2027  ;;  %v1611_v38 = vpop.permute.xlu2 %1610 }
 0x471   :  { %v2029_v59 = vrot.slane %v2028_v2, 6  ;;  %v2016_v19 = vpop.permute.xlu0 %2015  ;;  %v1612_v43 = vrot.slane %v1611_v38, 6 }
 0x472   :  { %v2017_v42 = vrot.slane %v2016_v19, 6 }
 0x473   :  { %v2030_v12 = vsel %vm1219_vm14, %v2029_v59, %v2028_v2  ;;  %v1613_v31 = vsel %vm440_vm12, %v1612_v43, %v1611_v38 }
 0x474   :  { %v2018_v56 = vsel %vm457_vm13, %v2017_v42, %v2016_v19  ;;  %v1236_v19 = vstv %s3744_s7  ;;  %s2457_s7 = smov 51  }
 0x475   :  { %v2020_v10 = vadd.f32 %v2018_v56, %v2012_v14 }
 0x477   :  { %v2032_v46 = vmul.f32 %v2030_v12, %v2020_v10 }
 0x478   :  { %v1594_v17 = vpop.permute.xlu1 %1593  ;;  %v1701_v22 = vpop.permute.xlu2 %1700 }
 0x479   :  { %2034 = vrot.lane.b32.xlu2 %v2032_v46, %s2456_s5  ;;  %v1578_v49 = vpop.permute.xlu0 %1577  ;;  %v1595_v7 = vrot.slane %v1594_v17, 2  ;;  %v1702_v40 = vrot.slane %v1701_v22, 2 }
 0x47a   :  { %v1579_v62 = vrot.slane %v1578_v49, 2 }
 0x47b   :  { %v1596_v50 = vsel %vm405_vm10, %v1594_v17, %v1595_v7  ;;  %v1703_v32 = vsel %vm600_vm1, %v1701_v22, %v1702_v40 }
 0x47c   :  { %v1580_v30 = vsel %vm371_vm8, %v1578_v49, %v1579_v62  ;;  %vm1227_vm8 = vcmask 998400  }
 0x47d   :  { %v1582_v41 = vadd.f32 %v1580_v30, %v1573_v28 }
 0x47f   :  { %v1590_v48 = vadd.f32 %v1588_v52, %v1582_v41 }
 0x480   :  { %v1619_v15 = vpop.permute.xlu1 %1618 }
 0x481   :  { %v1603_v27 = vpop.permute.xlu0 %1602  ;;  %v1598_v53 = vadd.f32 %v1596_v50, %v1590_v48  ;;  %v1620_v9 = vrot.slane %v1619_v15, 6 }
 0x482   :  { %v1604_v57 = vrot.slane %v1603_v27, 6 }
 0x483   :  { %v1621_v25 = vsel %vm457_vm13, %v1620_v9, %v1619_v15 }
 0x484   :  { %v1605_v3 = vsel %vm423_vm11, %v1604_v57, %v1603_v27 }
 0x485   :  { %v1607_v6 = vadd.f32 %v1605_v3, %v1598_v53 }
 0x487   :  { %v1615_v55 = vadd.f32 %v1613_v31, %v1607_v6 }
 0x489   :  { %v1631_v54 = vpop.permute.xlu0 %1630  ;;  %v1623_v51 = vadd.f32 %v1621_v25, %v1615_v55 }
 0x48a   :  { %v1632_v45 = vrot.slane %v1631_v54, 6 }
 0x48c   :  { %v1633_v63 = vsel %vm471_vm0, %v1632_v45, %v1631_v54  ;;  %vm1276_vm0 = vcmask 416768  }
 0x48d   :  { %v1635_v1 = vmul.f32 %v1633_v63, %v1623_v51 }
 0x48f   :  { %v1705_v39 = vadd.f32 %v1703_v32, %v1635_v1 }
 0x4a6   :  { %v1770_v36 = vpop.permute.xlu1 %1769 }
 0x4a7   :  { %v1771_v20 = vrot.slane %v1770_v36, 2 }
 0x4a9   :  { %v1772_v37 = vsel %vm728_vm2, %v1770_v36, %v1771_v20 }
 0x4aa   :  { %v1774_v11 = vadd.f32 %v1772_v37, %v1705_v39 }
 0x4b6   :  { %v1828_v0 = vpop.permute.xlu0 %1827 }
 0x4b7   :  { %v1829_v60 = vrot.slane %v1828_v0, 2 }
 0x4b9   :  { %v1830_v44 = vsel %vm843_vm5, %v1828_v0, %v1829_v60 }
 0x4ba   :  { %v1832_v8 = vadd.f32 %v1830_v44, %v1774_v11  ;;  %v3870_v11 = vld [vmem:[#allocation29_spill] sm:$0xff] }
 0x4bb   :  { %v1897_v4 = vpop.permute.xlu2 %1896 }
 0x4bc   :  { %v1898_v47 = vrot.slane %v1897_v4, 2 }
 0x4be   :  { %v1899_v18 = vsel %vm971_vm6, %v1897_v4, %v1898_v47 }
 0x4bf   :  { %v1901_v2 = vadd.f32 %v1899_v18, %v1832_v8  ;;  %v3872_v8 = vld [vmem:[#allocation31_spill] sm:$0xff] }
 0x4d3   :  { %v2035_v33 = vpop.permute.xlu2 %2034 }
 0x4d4   :  { %v2036_v13 = vrot.slane %v2035_v33, 2 }
 0x4d6   :  { %v2037_v14 = vsel %vm1227_vm8, %v2035_v33, %v2036_v13 }
 0x4dd   :  { %v1225_v23 = vpop.permute.xlu0 %1224 }
 0x4de   :  { %v1226_v24 = vrot.slane %v1225_v23, 2 }
 0x4e0   :  { %v1228_v34 = vsel %vm1227_vm8, %v1225_v23, %v1226_v24  ;;  %v1966_v61 = vpop.permute.xlu1 %1965  ;;  %v3871_v24 = vld [vmem:[#allocation27_spill] sm:$0xff] }
 0x4e1   :  { %v1230_v35 = vadd.f32 %v1228_v34, %v3656_v5  ;;  %v1967_v26 = vrot.slane %v1966_v61, 2 }
 0x4e3   :  { %v2133_v16 = vrot.slane %v1230_v35, 9  ;;  %v1968_v59 = vsel %vm1099_vm7, %v1966_v61, %v1967_v26  ;;  %v3873_v61 = vld [vmem:[#allocation33_spill] sm:$0xff]  ;;  %v3874_v26 = vld [vmem:[#allocation28_spill] sm:$0xff] }
 0x4e4   :  { %v1970_v42 = vadd.f32 %v1968_v59, %v1901_v2 }
 0x4e5   :  { %v1235_v12 = vadd.f32 %v2133_v16, %v1230_v35  ;;  %v3875_v16 = vld [vmem:[#allocation26_spill] sm:$0xff] }
 0x4e6   :  { %v2039_v56 = vadd.f32 %v2037_v14, %v1970_v42  ;;  %v3877_v14 = vld [vmem:[#allocation32_spill] sm:$0xff] }
 0x4e7   :  { %v1237_v10 = vadd.f32 %v1236_v19, %v1235_v12 }
 0x4e8   :  { %v2144_v46 = vrot.slane %v2039_v56, 9 }
 0x4e9   :  { %v2134_v49 = vmul.f32 -1.442695, %v1237_v10 }
 0x4ea   :  { %v2044_v58 = vadd.f32 %v2144_v46, %v2039_v56 }
 0x4eb   :  { %2308 = vpow2.f32 %v2134_v49 }
 0x4ec   :  { %v2045_v62 = vadd.f32 %v2044_v58, %v1236_v19  ;;  %v3876_v19 = vld [vmem:[#allocation30_spill] sm:$0xff]  ;;  %v3878_v58 = vld [vmem:[#allocation41_spill] sm:$0xff] }
 0x4ee   :  { %v2145_v5 = vmul.f32 -1.442695, %v2045_v62 }
 0x4f0   :  { %2310 = vpow2.f32 %v2145_v5  ;;  %v3879_v5 = vld [vmem:[#allocation22_spill] sm:$0xff] }
 0x4f1   :  { %v2309_v30 = vpop.eup %2308 }
 0x4f2   :  { %v1241_v17 = vadd.f32 1.0, %v2309_v30 }
 0x4f4   :  { %2312 = vrcp.f32 %v1241_v17  ;;  %v1253_v41 = vand.u32 2147483648, %v1241_v17  ;;  %v1251_v57 = vand.u32 2147483647, %v1241_v17  ;;  %vm1247_vm10 = vweird.f32 %v1241_v17 }
 0x4f6   :  { %v2311_v29 = vpop.eup %2310  ;;  %v1254_v3 = vor.u32 1.1754944e-38, %v1253_v41  ;;  %vm1252_vm12 = vcmp.eq.f32.partialorder %v1251_v57, 8.507059e+37  ;;  %v3884_v57 = vld [vmem:[#allocation44_spill] sm:$0xff] }
 0x4f7   :  { %v2049_v28 = vadd.f32 1.0, %v2311_v29 }
 0x4f9   :  { %2314 = vrcp.f32 %v2049_v28  ;;  %v2061_v43 = vand.u32 2147483648, %v2049_v28  ;;  %v2059_v6 = vand.u32 2147483647, %v2049_v28  ;;  %vm2055_vm15 = vweird.f32 %v2049_v28 }
 0x4fa   :  { %v2313_v21 = vpop.eup %2312 }
 0x4fb   :  { %v1243_v27 = vmul.f32 %v2313_v21, %v1241_v17  ;;  %vm1248_vm9 = vweird.f32 %v2313_v21  ;;  %v2062_v0 = vor.u32 1.1754944e-38, %v2061_v43  ;;  %vm2060_vm4 = vcmp.eq.f32.partialorder %v2059_v6, 8.507059e+37  ;;  %v3880_v17 = vld [vmem:[#allocation45_spill] sm:$0xff] }
 0x4fc   :  { %vm1249_vm11 = vmor %vm1247_vm10, %vm1248_vm9 }
 0x4fd   :  { %v1244_v38 = vsub.f32 1.0, %v1243_v27 }
 0x4ff   :  { %v2315_v52 = vpop.eup %2314  ;;  %v1245_v7 = vmul.f32 %v2313_v21, %v1244_v38  ;;  %v3882_v38 = vld [vmem:[#allocation21_spill] sm:$0xff] }
 0x500   :  { %v2051_v48 = vmul.f32 %v2315_v52, %v2049_v28  ;;  %vm2056_vm13 = vweird.f32 %v2315_v52  ;;  %v3881_v28 = vld [vmem:[#allocation43_spill] sm:$0xff] }
 0x501   :  { %v1246_v50 = vadd.f32 %v2313_v21, %v1245_v7  ;;  %vm2057_vm3 = vmor %vm2055_vm15, %vm2056_vm13 }
 0x502   :  { %v2052_v15 = vsub.f32 1.0, %v2051_v48 }
 0x503   :  { %v1250_v53 = vsel %vm1249_vm11, %v2313_v21, %v1246_v50  ;;  %v3885_v50 = vld [vmem:[#allocation42_spill] sm:$0xff] }
 0x504   :  { %v1255_v54 = vsel %vm1252_vm12, %v1254_v3, %v1250_v53  ;;  %v2053_v22 = vmul.f32 %v2315_v52, %v2052_v15 }
 0x505   :  { %v1260_v31 = vperm.slane %v1255_v54, 4  ;;  %v1259_v9 = vperm.slane %v1255_v54, 2  ;;  %v1258_v45 = vperm.slane %v1255_v54, 0 }
 0x506   :  { %v2054_v55 = vadd.f32 %v2315_v52, %v2053_v22 }
 0x507   :  { %v1266_v36 = vperm.slane %v1260_v31, 0  ;;  %v1265_v25 = vperm.slane %v1259_v9, 0  ;;  %v1264_v63 = vperm.slane %v1258_v45, 0 }
 0x508   :  { %v2058_v51 = vsel %vm2057_vm3, %v2315_v52, %v2054_v55  ;;  %v3883_v52 = vld [vmem:[#allocation15_spill] sm:$0xff] }
 0x509   :  { %1274 = vrot.lane.b32.xlu2 %v1266_v36, %s2457_s7  ;;  %1272 = vrot.lane.b32.xlu0 %v1265_v25, %s2457_s7  ;;  %v2063_v4 = vsel %vm2060_vm4, %v2062_v0, %v2058_v51 }
 0x50a   :  { %1270 = vrot.lane.b32.xlu1 %v1264_v63, %s2457_s7  ;;  %v2068_v40 = vperm.slane %v2063_v4, 4  ;;  %v2067_v20 = vperm.slane %v2063_v4, 2  ;;  %v2066_v1 = vperm.slane %v2063_v4, 0 }
 0x50c   :  { %v2074_v60 = vperm.slane %v2068_v40, 0  ;;  %v2073_v32 = vperm.slane %v2067_v20, 0  ;;  %v2072_v37 = vperm.slane %v2066_v1, 0 }
 0x511   :  { %2082 = vrot.lane.b32.xlu2 %v2074_v60, %s2457_s7  ;;  %2080 = vrot.lane.b32.xlu0 %v2073_v32, %s2457_s7 }
 0x512   :  { %2078 = vrot.lane.b32.xlu1 %v2072_v37, %s2457_s7 }
 0x563   :  { %v1275_v47 = vpop.permute.xlu2 %1274 }
 0x56b   :  { %v2083_v56 = vpop.permute.xlu2 %2082 }
 0x57b   :  { %v1273_v39 = vpop.permute.xlu0 %1272 }
 0x57c   :  { %v1278_v44 = vsel %vm1276_vm0, %v1273_v39, %v1275_v47  ;;  %v1271_v23 = vpop.permute.xlu1 %1270 }
 0x57d   :  { %v1282_v33 = vmul.f32 %v1278_v44, %v3870_v11  ;;  %v1284_v18 = vmul.f32 %v1278_v44, %v3871_v24  ;;  %v1286_v34 = vmul.f32 %v1278_v44, %v3872_v8  ;;  %v1288_v13 = vmul.f32 %v1278_v44, %v3873_v61 }
 0x57e   :  { %v1277_v35 = vsel %vm1276_vm0, %v1271_v23, %v1273_v39 }
 0x57f   :  { %1290 = vst [vmem:[#allocation7 + $0x8] sm:$0xff] %v1282_v33  ;;  %v1281_v2 = vmul.f32 %v1277_v35, %v3874_v26  ;;  %v1283_v59 = vmul.f32 %v1277_v35, %v3875_v16  ;;  %v1285_v42 = vmul.f32 %v1277_v35, %v3876_v19  ;;  %v1287_v12 = vmul.f32 %v1277_v35, %v3877_v14 }
 0x580   :  { %1292 = vst [vmem:[#allocation7 + $0x18] sm:$0xff] %v1284_v18 }
 0x581   :  { %1294 = vst [vmem:[#allocation7 + $0x28] sm:$0xff] %v1286_v34 }
 0x582   :  { %1296 = vst [vmem:[#allocation7 + $0x38] sm:$0xff] %v1288_v13 }
 0x583   :  { %1289 = vst [vmem:[#allocation7] sm:$0xff] %v1281_v2  ;;  %v2081_v10 = vpop.permute.xlu0 %2080 }
 0x584   :  { %1291 = vst [vmem:[#allocation7 + $0x10] sm:$0xff] %v1283_v59  ;;  %v2085_v46 = vsel %vm1276_vm0, %v2081_v10, %v2083_v56  ;;  %v2079_v49 = vpop.permute.xlu1 %2078 }
 0x585   :  { %1293 = vst [vmem:[#allocation7 + $0x20] sm:$0xff] %v1285_v42  ;;  %v2089_v62 = vmul.f32 %v2085_v46, %v3878_v58  ;;  %v2091_v30 = vmul.f32 %v2085_v46, %v3879_v5  ;;  %v2093_v29 = vmul.f32 %v2085_v46, %v3880_v17  ;;  %v2095_v21 = vmul.f32 %v2085_v46, %v3881_v28 }
 0x586   :  { %1295 = vst [vmem:[#allocation7 + $0x30] sm:$0xff] %v1287_v12  ;;  %v2084_v27 = vsel %vm1276_vm0, %v2079_v49, %v2081_v10 }
 0x587   :  { %2098 = vst [vmem:[#allocation7 + $0x48] sm:$0xff] %v2089_v62  ;;  %v2088_v41 = vmul.f32 %v2084_v27, %v3882_v38  ;;  %v2090_v7 = vmul.f32 %v2084_v27, %v3883_v52  ;;  %v2092_v48 = vmul.f32 %v2084_v27, %v3884_v57  ;;  %v2094_v3 = vmul.f32 %v2084_v27, %v3885_v50 }
 0x588   :  { %2100 = vst [vmem:[#allocation7 + $0x58] sm:$0xff] %v2091_v30 }
 0x589   :  { %2102 = vst [vmem:[#allocation7 + $0x68] sm:$0xff] %v2093_v29 }
 0x58a   :  { %2104 = vst [vmem:[#allocation7 + $0x78] sm:$0xff] %v2095_v21 }
 0x58b   :  { %2097 = vst [vmem:[#allocation7 + $0x40] sm:$0xff] %v2088_v41 }
 0x58c   :  { %2099 = vst [vmem:[#allocation7 + $0x50] sm:$0xff] %v2090_v7 }
 0x58d   :  { %2101 = vst [vmem:[#allocation7 + $0x60] sm:$0xff] %v2092_v48 }
 0x58e   :  { %2103 = vst [vmem:[#allocation7 + $0x70] sm:$0xff] %v2094_v3 }
 0x58f   :  { %2117 = dma.vmem_to_hbm [thread:$0]  %s2110_s9, 2048, %s2112_s6, [#allocation6], %s2386_s10, %s2386_s10, %s2387_s11  }
 0x590   :  { %2383 = dma.done.wait [#allocation6], 2048  }
 0x591   :  { %2384 = vsyncadd [#allocation6], 4294965248 }
 0x592   :  { %2122 = vsyncpa [#allocation5], 1 }
 0x593   :  { %2123 = vsyncpa [#allocation6], 1 }

</bundles_post_ra>
